<compile_context>
chip_gen: v6e
topology: v6e:2x2x1
jax: 0.10.0
libtpu: 0.0.40
codegen_flags: <defaults>
</compile_context>

<pallas_src>
import functools
import math

import numpy as np
import jax
import jax.numpy as jnp
from jax.experimental import pallas as pl
from jax.experimental.pallas import tpu as pltpu


# ----------------------------------------------------------------------------
# Trace-time helpers (all static Python; fully unrolled inside the kernel)
# ----------------------------------------------------------------------------

def _nearest_indices(n_in, n_out):
    # PyTorch F.interpolate(mode='nearest'): src = floor(dst * in / out)
    return [(k * n_in) // n_out for k in range(n_out)]


def _contiguous_runs(idx):
    """Group a static index list into maximal [start, stop) stride-1 runs.
    Handles skips (downsample) and repeats (upsample)."""
    runs = []
    start = prev = idx[0]
    for v in idx[1:]:
        if v == prev + 1:
            prev = v
        else:
            runs.append((start, prev + 1))
            start = prev = v
    runs.append((start, prev + 1))
    return runs


def _conv_valid_chans(chans, w, b, relu):
    """Valid (stride 1, pad 0) conv on a per-channel list representation.

    chans: list of Cin arrays, each (B, H, W) f32, held in vregs.
    w:     numpy (Cout, Cin, Kh, Kw) — baked as Python float immediates.
    b:     numpy (Cout,)
    Returns list of Cout arrays, each (B, Ho, Wo) f32.

    The shifted window x[:, i:i+Ho, j:j+Wo] is computed ONCE per (ci, i, j)
    tap and reused across every output channel (review item 1).
    """
    cout, cin, kh, kw = w.shape
    assert cin == len(chans)
    B, H, W = chans[0].shape
    Ho, Wo = H - kh + 1, W - kw + 1
    accs = [None] * cout
    for ci in range(cin):
        for i in range(kh):
            for j in range(kw):
                win = chans[ci][:, i:i + Ho, j:j + Wo]     # one slice per tap
                for co in range(cout):
                    wv = float(w[co, ci, i, j])            # immediate
                    term = wv * win                        # VPU scalar*vector
                    accs[co] = term if accs[co] is None else accs[co] + term
    outs = []
    for co in range(cout):
        acc = accs[co] + float(b[co])
        if relu:
            acc = jnp.maximum(acc, 0.0)
        outs.append(acc)
    return outs


def _nearest_resize(a, Ht, Wt):
    """Exact nearest-neighbor resize of (B, H, W) -> (B, Ht, Wt) via static
    slicing + concat (no gather, no MXU)."""
    _, H, W = a.shape
    if H != Ht:
        parts = [a[:, s:e, :] for s, e in _contiguous_runs(_nearest_indices(H, Ht))]
        a = parts[0] if len(parts) == 1 else jnp.concatenate(parts, axis=1)
    if W != Wt:
        parts = [a[:, :, s:e] for s, e in _contiguous_runs(_nearest_indices(W, Wt))]
        a = parts[0] if len(parts) == 1 else jnp.concatenate(parts, axis=2)
    return a


# ----------------------------------------------------------------------------
# Fused Pallas kernel
# ----------------------------------------------------------------------------

def _fused_kernel(x_ref, z_ref, res_ref, *, weights):
    """x_ref: (B,1,H,W) VMEM in; z_ref: (B,2,Ht,Wt) / res_ref: (B,1,Hr,Wr) VMEM out.
    `weights` is a static pytree of numpy arrays baked into the trace."""
    x = x_ref[:, 0, :, :].astype(jnp.float32)               # (B, H, W)

    # init_layer (ConvBlock 1->1, 3x3, conv + ReLU)
    z_chans = _conv_valid_chans([x], *weights["init"])       # 1 channel
    res_ref[:, 0, :, :] = z_chans[0].astype(res_ref.dtype)   # residual output

    zh = z_chans
    for (w, b, relu) in weights["horizontal"]:
        zh = _conv_valid_chans(zh, w, b, relu)
    zv = z_chans
    for (w, b, relu) in weights["vertical"]:
        zv = _conv_valid_chans(zv, w, b, relu)

    Ht, Wt = zh[0].shape[1], zv[0].shape[2]                  # static (trace-time)
    zh_r = _nearest_resize(zh[0], Ht, Wt)                    # (B, Ht, Wt)
    zv_r = _nearest_resize(zv[0], Ht, Wt)                    # (B, Ht, Wt)

    # Write the two channels directly into the output ref (no stack temp).
    z_ref[:, 0, :, :] = zh_r.astype(z_ref.dtype)
    z_ref[:, 1, :, :] = zv_r.astype(z_ref.dtype)


# ----------------------------------------------------------------------------
# Module config, parameter init, and forward
# ----------------------------------------------------------------------------

CONFIG = {
    "feature_extractor": "none",          # feature_extractor is None -> features = x
    "spec_augment": None,                 # training-only; inference path
    "conv_skip_connection": False,
    "transpose_channels_height": False,
    "init_layer_kernel": (3, 3),
    "horizontal_filter_conv": {
        "conv_block_dims": [4, 4],
        "conv_block_kernels": [[1, 3], [1, 3]],
    },
    "vertical_filter_conv": {
        "conv_block_dims": [4, 4],
        "conv_block_kernels": [[3, 1], [3, 1]],
    },
}


def _conv_params(key, cin, cout, kh, kw):
    """PyTorch-default-style (uniform +/- 1/sqrt(fan_in)) deterministic init.
    Returned as host numpy so the kernel can bake them as immediates."""
    kwk, kbk = jax.random.split(key)
    scale = 1.0 / math.sqrt(cin * kh * kw)
    w = jax.random.uniform(kwk, (cout, cin, kh, kw), jnp.float32, -scale, scale)
    b = jax.random.uniform(kbk, (cout,), jnp.float32, -scale, scale)
    return np.asarray(jax.device_get(w)), np.asarray(jax.device_get(b))


def _setup_conv_sequence(key, cfg):
    """Mirrors setup_conv_sequence: ConvBlocks (+ReLU) then Conv2d(inc->1, 3x3, pad 0)."""
    kernels = list(cfg["conv_block_kernels"])  # consumed in original order
    dims = cfg["conv_block_dims"]
    layers = []
    keys = jax.random.split(key, len(dims) + 1)
    inc = 1
    for li, dim in enumerate(dims):
        kh, kw = kernels[li]
        w, b = _conv_params(keys[li], inc, dim, kh, kw)
        layers.append((w, b, True))        # ConvBlock = conv + ReLU
        inc = dim
    w, b = _conv_params(keys[-1], inc, 1, 3, 3)
    layers.append((w, b, False))           # final plain Conv2d
    return layers


def init_params(key, config):
    k_init, k_h, k_v = jax.random.split(key, 3)
    kh, kw = config["init_layer_kernel"]
    w0, b0 = _conv_params(k_init, 1, 1, kh, kw)
    return {
        "init": (w0, b0, True),
        "horizontal": _setup_conv_sequence(k_h, config["horizontal_filter_conv"]),
        "vertical": _setup_conv_sequence(k_v, config["vertical_filter_conv"]),
    }


def _chain_shape_flops(h, w, layers, batch):
    flops = 0
    for (wt, _b, _r) in layers:
        cout, cin, kh, kw = wt.shape
        h, w = h - kh + 1, w - kw + 1
        flops += 2 * batch * cout * cin * kh * kw * h * w
    return h, w, flops


def forward(x, params, config):
    # feature_extractor is None -> features = x ; spec-augment skipped (eval)
    features = x

    B, _, H, W = x.shape
    Hr, Wr, f0 = _chain_shape_flops(H, W, [params["init"]], B)
    Hh, Wh, fh = _chain_shape_flops(Hr, Wr, params["horizontal"], B)
    Hv, Wv, fv = _chain_shape_flops(Hr, Wr, params["vertical"], B)
    assert Hh >= Hv, "z_h.size(2) must be >= z_v.size(2)"
    assert Wv >= Wh, "z_v.size(3) must be >= z_h.size(3)"
    Ht, Wt = Hh, Wv                                     # target_size[2:]

    bytes_accessed = 4 * (x.size + B * 2 * Ht * Wt + B * 1 * Hr * Wr)

    z_out, residual = pl.pallas_call(
        functools.partial(_fused_kernel, weights=params),
        out_shape=(jax.ShapeDtypeStruct((B, 2, Ht, Wt), x.dtype),
                   jax.ShapeDtypeStruct((B, 1, Hr, Wr), x.dtype)),
        in_specs=[
            pl.BlockSpec(memory_space=pltpu.MemorySpace.VMEM),   # x (whole batch)
        ],
        out_specs=(
            pl.BlockSpec(memory_space=pltpu.MemorySpace.VMEM),
            pl.BlockSpec(memory_space=pltpu.MemorySpace.VMEM),
        ),
        cost_estimate=pl.CostEstimate(flops=int(f0 + fh + fv),
                                      transcendentals=0,
                                      bytes_accessed=int(bytes_accessed)),
    )(x)

    if config.get("transpose_channels_height", False):
        z_out = jnp.transpose(z_out, (0, 2, 1, 3))
    return z_out, residual, features


# ----------------------------------------------------------------------------
# Pure-JAX reference (for verification only)
# ----------------------------------------------------------------------------

def _ref_conv(x, w, b, relu):
    y = jax.lax.conv_general_dilated(
        x, jnp.asarray(w), (1, 1), "VALID",
        dimension_numbers=("NCHW", "OIHW", "NCHW"),
        precision=jax.lax.Precision.HIGHEST)
    y = y + jnp.asarray(b).reshape(1, -1, 1, 1)
    return jnp.maximum(y, 0.0) if relu else y


def _ref_nearest(a, Ht, Wt):
    H, W = a.shape[2], a.shape[3]
    ri = (jnp.arange(Ht) * H) // Ht
    ci = (jnp.arange(Wt) * W) // Wt
    return a[:, :, ri, :][:, :, :, ci]


def ref_forward(x, params, config):
    w0, b0, r0 = params["init"]
    z = _ref_conv(x, w0, b0, r0)
    residual = z
    z_h = z
    for (w, b, r) in params["horizontal"]:
        z_h = _ref_conv(z_h, w, b, r)
    z_v = z
    for (w, b, r) in params["vertical"]:
        z_v = _ref_conv(z_v, w, b, r)
    Ht, Wt = z_h.shape[2], z_v.shape[3]
    z_out = jnp.concatenate([_ref_nearest(z_h, Ht, Wt), _ref_nearest(z_v, Ht, Wt)], axis=1)
    if config.get("transpose_channels_height", False):
        z_out = jnp.transpose(z_out, (0, 2, 1, 3))
    return z_out, residual, x


# ----------------------------------------------------------------------------

if __name__ == "__main__":
    key = jax.random.PRNGKey(0)
    kx, kp = jax.random.split(key)

    # Input: (B=2, C=1, H=16, W=16) spectrogram-like tensor (feature_extractor=None)
    x = jax.random.normal(kx, (2, 1, 16, 16), jnp.float32)
    params = init_params(kp, CONFIG)

    z, residual, features = forward(x, params, CONFIG)
    jax.block_until_ready((z, residual, features))

    # Expected shapes from the config above
    assert z.shape == (2, 2, 12, 12), z.shape
    assert residual.shape == (2, 1, 14, 14), residual.shape
    assert features.shape == (2, 1, 16, 16), features.shape

    # Verify against pure-JAX reference
    z_ref, res_ref, feat_ref = ref_forward(x, params, CONFIG)
    assert jnp.allclose(z, z_ref, atol=1e-4, rtol=1e-4)
    assert jnp.allclose(residual, res_ref, atol=1e-4, rtol=1e-4)
    assert jnp.allclose(features, feat_ref)

    print("KERNEL_OK")
</pallas_src>

<mosaic_0001>
module attributes {stable_mosaic.version = 11 : i64} {
  func.func @_fused_kernel(%arg0: memref<2x1x16x16xf32, #tpu.memory_space<vmem>>, %arg1: memref<2x2x12x12xf32, #tpu.memory_space<vmem>>, %arg2: memref<2x1x14x14xf32, #tpu.memory_space<vmem>>) attributes {dimension_semantics = [], scalar_prefetch = 0 : i64, scratch_operands = 0 : i64, tpu.core_type = #tpu.core_type<tc>} {
    %c0 = arith.constant 0 : index
    %c0_0 = arith.constant 0 : index
    %c0_1 = arith.constant 0 : index
    %c0_2 = arith.constant 0 : index
    %0 = vector.load %arg0[%c0, %c0_0, %c0_1, %c0_2] : memref<2x1x16x16xf32, #tpu.memory_space<vmem>>, vector<2x1x16x16xf32>
    %1 = vector.shape_cast %0 : vector<2x1x16x16xf32> to vector<2x16x16xf32>
    %2 = vector.extract_strided_slice %1 {offsets = [0, 0, 0], sizes = [2, 14, 14], strides = [1, 1, 1]} : vector<2x16x16xf32> to vector<2x14x14xf32>
    %cst = arith.constant 0.0834417343 : f32
    %3 = vector.broadcast %cst : f32 to vector<2x14x14xf32>
    %4 = arith.mulf %3, %2 : vector<2x14x14xf32>
    %5 = vector.extract_strided_slice %1 {offsets = [0, 0, 1], sizes = [2, 14, 14], strides = [1, 1, 1]} : vector<2x16x16xf32> to vector<2x14x14xf32>
    %cst_3 = arith.constant -0.0790317878 : f32
    %6 = vector.broadcast %cst_3 : f32 to vector<2x14x14xf32>
    %7 = arith.mulf %6, %5 : vector<2x14x14xf32>
    %8 = arith.addf %4, %7 : vector<2x14x14xf32>
    %9 = vector.extract_strided_slice %1 {offsets = [0, 0, 2], sizes = [2, 14, 14], strides = [1, 1, 1]} : vector<2x16x16xf32> to vector<2x14x14xf32>
    %cst_4 = arith.constant -0.212903902 : f32
    %10 = vector.broadcast %cst_4 : f32 to vector<2x14x14xf32>
    %11 = arith.mulf %10, %9 : vector<2x14x14xf32>
    %12 = arith.addf %8, %11 : vector<2x14x14xf32>
    %13 = vector.extract_strided_slice %1 {offsets = [0, 1, 0], sizes = [2, 14, 14], strides = [1, 1, 1]} : vector<2x16x16xf32> to vector<2x14x14xf32>
    %cst_5 = arith.constant -0.229426309 : f32
    %14 = vector.broadcast %cst_5 : f32 to vector<2x14x14xf32>
    %15 = arith.mulf %14, %13 : vector<2x14x14xf32>
    %16 = arith.addf %12, %15 : vector<2x14x14xf32>
    %17 = vector.extract_strided_slice %1 {offsets = [0, 1, 1], sizes = [2, 14, 14], strides = [1, 1, 1]} : vector<2x16x16xf32> to vector<2x14x14xf32>
    %cst_6 = arith.constant -0.184686422 : f32
    %18 = vector.broadcast %cst_6 : f32 to vector<2x14x14xf32>
    %19 = arith.mulf %18, %17 : vector<2x14x14xf32>
    %20 = arith.addf %16, %19 : vector<2x14x14xf32>
    %21 = vector.extract_strided_slice %1 {offsets = [0, 1, 2], sizes = [2, 14, 14], strides = [1, 1, 1]} : vector<2x16x16xf32> to vector<2x14x14xf32>
    %cst_7 = arith.constant -0.0870528221 : f32
    %22 = vector.broadcast %cst_7 : f32 to vector<2x14x14xf32>
    %23 = arith.mulf %22, %21 : vector<2x14x14xf32>
    %24 = arith.addf %20, %23 : vector<2x14x14xf32>
    %25 = vector.extract_strided_slice %1 {offsets = [0, 2, 0], sizes = [2, 14, 14], strides = [1, 1, 1]} : vector<2x16x16xf32> to vector<2x14x14xf32>
    %cst_8 = arith.constant 0.100564562 : f32
    %26 = vector.broadcast %cst_8 : f32 to vector<2x14x14xf32>
    %27 = arith.mulf %26, %25 : vector<2x14x14xf32>
    %28 = arith.addf %24, %27 : vector<2x14x14xf32>
    %29 = vector.extract_strided_slice %1 {offsets = [0, 2, 1], sizes = [2, 14, 14], strides = [1, 1, 1]} : vector<2x16x16xf32> to vector<2x14x14xf32>
    %cst_9 = arith.constant -0.0134518947 : f32
    %30 = vector.broadcast %cst_9 : f32 to vector<2x14x14xf32>
    %31 = arith.mulf %30, %29 : vector<2x14x14xf32>
    %32 = arith.addf %28, %31 : vector<2x14x14xf32>
    %33 = vector.extract_strided_slice %1 {offsets = [0, 2, 2], sizes = [2, 14, 14], strides = [1, 1, 1]} : vector<2x16x16xf32> to vector<2x14x14xf32>
    %cst_10 = arith.constant -0.0221347027 : f32
    %34 = vector.broadcast %cst_10 : f32 to vector<2x14x14xf32>
    %35 = arith.mulf %34, %33 : vector<2x14x14xf32>
    %36 = arith.addf %32, %35 : vector<2x14x14xf32>
    %cst_11 = arith.constant 0.14089641 : f32
    %37 = vector.broadcast %cst_11 : f32 to vector<2x14x14xf32>
    %38 = arith.addf %36, %37 : vector<2x14x14xf32>
    %cst_12 = arith.constant 0.000000e+00 : f32
    %39 = vector.broadcast %cst_12 : f32 to vector<2x14x14xf32>
    %40 = arith.maximumf %38, %39 : vector<2x14x14xf32>
    %c0_13 = arith.constant 0 : index
    %c0_14 = arith.constant 0 : index
    %c0_15 = arith.constant 0 : index
    %c0_16 = arith.constant 0 : index
    %41 = vector.load %arg2[%c0_13, %c0_14, %c0_15, %c0_16] : memref<2x1x14x14xf32, #tpu.memory_space<vmem>>, vector<2x1x14x14xf32>
    %42 = vector.shape_cast %41 : vector<2x1x14x14xf32> to vector<2x14x14xf32>
    %43 = vector.shape_cast %40 : vector<2x14x14xf32> to vector<2x1x14x14xf32>
    tpu.vector_store %arg2[%c0_13, %c0_14, %c0_15, %c0_16], %43 {strides = array<i32>} : memref<2x1x14x14xf32, #tpu.memory_space<vmem>>, vector<2x1x14x14xf32>,
    %44 = vector.extract_strided_slice %40 {offsets = [0, 0, 0], sizes = [2, 14, 12], strides = [1, 1, 1]} : vector<2x14x14xf32> to vector<2x14x12xf32>
    %cst_17 = arith.constant 0.326159567 : f32
    %45 = vector.broadcast %cst_17 : f32 to vector<2x14x12xf32>
    %46 = arith.mulf %45, %44 : vector<2x14x12xf32>
    %cst_18 = arith.constant 0.192851424 : f32
    %47 = vector.broadcast %cst_18 : f32 to vector<2x14x12xf32>
    %48 = arith.mulf %47, %44 : vector<2x14x12xf32>
    %cst_19 = arith.constant 0.297631949 : f32
    %49 = vector.broadcast %cst_19 : f32 to vector<2x14x12xf32>
    %50 = arith.mulf %49, %44 : vector<2x14x12xf32>
    %cst_20 = arith.constant 0.462501675 : f32
    %51 = vector.broadcast %cst_20 : f32 to vector<2x14x12xf32>
    %52 = arith.mulf %51, %44 : vector<2x14x12xf32>
    %53 = vector.extract_strided_slice %40 {offsets = [0, 0, 1], sizes = [2, 14, 12], strides = [1, 1, 1]} : vector<2x14x14xf32> to vector<2x14x12xf32>
    %cst_21 = arith.constant 0.385924757 : f32
    %54 = vector.broadcast %cst_21 : f32 to vector<2x14x12xf32>
    %55 = arith.mulf %54, %53 : vector<2x14x12xf32>
    %56 = arith.addf %46, %55 : vector<2x14x12xf32>
    %cst_22 = arith.constant -0.0180786736 : f32
    %57 = vector.broadcast %cst_22 : f32 to vector<2x14x12xf32>
    %58 = arith.mulf %57, %53 : vector<2x14x12xf32>
    %59 = arith.addf %48, %58 : vector<2x14x12xf32>
    %cst_23 = arith.constant 0.355216861 : f32
    %60 = vector.broadcast %cst_23 : f32 to vector<2x14x12xf32>
    %61 = arith.mulf %60, %53 : vector<2x14x12xf32>
    %62 = arith.addf %50, %61 : vector<2x14x12xf32>
    %cst_24 = arith.constant -0.306342781 : f32
    %63 = vector.broadcast %cst_24 : f32 to vector<2x14x12xf32>
    %64 = arith.mulf %63, %53 : vector<2x14x12xf32>
    %65 = arith.addf %52, %64 : vector<2x14x12xf32>
    %66 = vector.extract_strided_slice %40 {offsets = [0, 0, 2], sizes = [2, 14, 12], strides = [1, 1, 1]} : vector<2x14x14xf32> to vector<2x14x12xf32>
    %cst_25 = arith.constant 0.185326606 : f32
    %67 = vector.broadcast %cst_25 : f32 to vector<2x14x12xf32>
    %68 = arith.mulf %67, %66 : vector<2x14x12xf32>
    %69 = arith.addf %56, %68 : vector<2x14x12xf32>
    %cst_26 = arith.constant 0.139300913 : f32
    %70 = vector.broadcast %cst_26 : f32 to vector<2x14x12xf32>
    %71 = arith.mulf %70, %66 : vector<2x14x12xf32>
    %72 = arith.addf %59, %71 : vector<2x14x12xf32>
    %cst_27 = arith.constant -0.519843817 : f32
    %73 = vector.broadcast %cst_27 : f32 to vector<2x14x12xf32>
    %74 = arith.mulf %73, %66 : vector<2x14x12xf32>
    %75 = arith.addf %62, %74 : vector<2x14x12xf32>
    %cst_28 = arith.constant -0.073930718 : f32
    %76 = vector.broadcast %cst_28 : f32 to vector<2x14x12xf32>
    %77 = arith.mulf %76, %66 : vector<2x14x12xf32>
    %78 = arith.addf %65, %77 : vector<2x14x12xf32>
    %cst_29 = arith.constant -0.140208587 : f32
    %79 = vector.broadcast %cst_29 : f32 to vector<2x14x12xf32>
    %80 = arith.addf %69, %79 : vector<2x14x12xf32>
    %cst_30 = arith.constant 0.000000e+00 : f32
    %81 = vector.broadcast %cst_30 : f32 to vector<2x14x12xf32>
    %82 = arith.maximumf %80, %81 : vector<2x14x12xf32>
    %cst_31 = arith.constant -0.199343324 : f32
    %83 = vector.broadcast %cst_31 : f32 to vector<2x14x12xf32>
    %84 = arith.addf %72, %83 : vector<2x14x12xf32>
    %cst_32 = arith.constant 0.000000e+00 : f32
    %85 = vector.broadcast %cst_32 : f32 to vector<2x14x12xf32>
    %86 = arith.maximumf %84, %85 : vector<2x14x12xf32>
    %cst_33 = arith.constant 0.315590858 : f32
    %87 = vector.broadcast %cst_33 : f32 to vector<2x14x12xf32>
    %88 = arith.addf %75, %87 : vector<2x14x12xf32>
    %cst_34 = arith.constant 0.000000e+00 : f32
    %89 = vector.broadcast %cst_34 : f32 to vector<2x14x12xf32>
    %90 = arith.maximumf %88, %89 : vector<2x14x12xf32>
    %cst_35 = arith.constant -4.634710e-03 : f32
    %91 = vector.broadcast %cst_35 : f32 to vector<2x14x12xf32>
    %92 = arith.addf %78, %91 : vector<2x14x12xf32>
    %cst_36 = arith.constant 0.000000e+00 : f32
    %93 = vector.broadcast %cst_36 : f32 to vector<2x14x12xf32>
    %94 = arith.maximumf %92, %93 : vector<2x14x12xf32>
    %95 = vector.extract_strided_slice %82 {offsets = [0, 0, 0], sizes = [2, 14, 10], strides = [1, 1, 1]} : vector<2x14x12xf32> to vector<2x14x10xf32>
    %cst_37 = arith.constant 0.246374488 : f32
    %96 = vector.broadcast %cst_37 : f32 to vector<2x14x10xf32>
    %97 = arith.mulf %96, %95 : vector<2x14x10xf32>
    %cst_38 = arith.constant -0.1711279 : f32
    %98 = vector.broadcast %cst_38 : f32 to vector<2x14x10xf32>
    %99 = arith.mulf %98, %95 : vector<2x14x10xf32>
    %cst_39 = arith.constant -0.115976498 : f32
    %100 = vector.broadcast %cst_39 : f32 to vector<2x14x10xf32>
    %101 = arith.mulf %100, %95 : vector<2x14x10xf32>
    %cst_40 = arith.constant -0.0612761118 : f32
    %102 = vector.broadcast %cst_40 : f32 to vector<2x14x10xf32>
    %103 = arith.mulf %102, %95 : vector<2x14x10xf32>
    %104 = vector.extract_strided_slice %82 {offsets = [0, 0, 1], sizes = [2, 14, 10], strides = [1, 1, 1]} : vector<2x14x12xf32> to vector<2x14x10xf32>
    %cst_41 = arith.constant 0.0351646766 : f32
    %105 = vector.broadcast %cst_41 : f32 to vector<2x14x10xf32>
    %106 = arith.mulf %105, %104 : vector<2x14x10xf32>
    %107 = arith.addf %97, %106 : vector<2x14x10xf32>
    %cst_42 = arith.constant -0.0967758968 : f32
    %108 = vector.broadcast %cst_42 : f32 to vector<2x14x10xf32>
    %109 = arith.mulf %108, %104 : vector<2x14x10xf32>
    %110 = arith.addf %99, %109 : vector<2x14x10xf32>
    %cst_43 = arith.constant -0.0790008828 : f32
    %111 = vector.broadcast %cst_43 : f32 to vector<2x14x10xf32>
    %112 = arith.mulf %111, %104 : vector<2x14x10xf32>
    %113 = arith.addf %101, %112 : vector<2x14x10xf32>
    %cst_44 = arith.constant 0.0225503352 : f32
    %114 = vector.broadcast %cst_44 : f32 to vector<2x14x10xf32>
    %115 = arith.mulf %114, %104 : vector<2x14x10xf32>
    %116 = arith.addf %103, %115 : vector<2x14x10xf32>
    %117 = vector.extract_strided_slice %82 {offsets = [0, 0, 2], sizes = [2, 14, 10], strides = [1, 1, 1]} : vector<2x14x12xf32> to vector<2x14x10xf32>
    %cst_45 = arith.constant 0.114390343 : f32
    %118 = vector.broadcast %cst_45 : f32 to vector<2x14x10xf32>
    %119 = arith.mulf %118, %117 : vector<2x14x10xf32>
    %120 = arith.addf %107, %119 : vector<2x14x10xf32>
    %cst_46 = arith.constant 0.065821141 : f32
    %121 = vector.broadcast %cst_46 : f32 to vector<2x14x10xf32>
    %122 = arith.mulf %121, %117 : vector<2x14x10xf32>
    %123 = arith.addf %110, %122 : vector<2x14x10xf32>
    %cst_47 = arith.constant -0.0573724657 : f32
    %124 = vector.broadcast %cst_47 : f32 to vector<2x14x10xf32>
    %125 = arith.mulf %124, %117 : vector<2x14x10xf32>
    %126 = arith.addf %113, %125 : vector<2x14x10xf32>
    %cst_48 = arith.constant -0.180423602 : f32
    %127 = vector.broadcast %cst_48 : f32 to vector<2x14x10xf32>
    %128 = arith.mulf %127, %117 : vector<2x14x10xf32>
    %129 = arith.addf %116, %128 : vector<2x14x10xf32>
    %130 = vector.extract_strided_slice %86 {offsets = [0, 0, 0], sizes = [2, 14, 10], strides = [1, 1, 1]} : vector<2x14x12xf32> to vector<2x14x10xf32>
    %cst_49 = arith.constant 0.0876013934 : f32
    %131 = vector.broadcast %cst_49 : f32 to vector<2x14x10xf32>
    %132 = arith.mulf %131, %130 : vector<2x14x10xf32>
    %133 = arith.addf %120, %132 : vector<2x14x10xf32>
    %cst_50 = arith.constant 0.141683236 : f32
    %134 = vector.broadcast %cst_50 : f32 to vector<2x14x10xf32>
    %135 = arith.mulf %134, %130 : vector<2x14x10xf32>
    %136 = arith.addf %123, %135 : vector<2x14x10xf32>
    %cst_51 = arith.constant -0.182294279 : f32
    %137 = vector.broadcast %cst_51 : f32 to vector<2x14x10xf32>
    %138 = arith.mulf %137, %130 : vector<2x14x10xf32>
    %139 = arith.addf %126, %138 : vector<2x14x10xf32>
    %cst_52 = arith.constant -0.271194339 : f32
    %140 = vector.broadcast %cst_52 : f32 to vector<2x14x10xf32>
    %141 = arith.mulf %140, %130 : vector<2x14x10xf32>
    %142 = arith.addf %129, %141 : vector<2x14x10xf32>
    %143 = vector.extract_strided_slice %86 {offsets = [0, 0, 1], sizes = [2, 14, 10], strides = [1, 1, 1]} : vector<2x14x12xf32> to vector<2x14x10xf32>
    %cst_53 = arith.constant -0.225398123 : f32
    %144 = vector.broadcast %cst_53 : f32 to vector<2x14x10xf32>
    %145 = arith.mulf %144, %143 : vector<2x14x10xf32>
    %146 = arith.addf %133, %145 : vector<2x14x10xf32>
    %cst_54 = arith.constant 0.0853925049 : f32
    %147 = vector.broadcast %cst_54 : f32 to vector<2x14x10xf32>
    %148 = arith.mulf %147, %143 : vector<2x14x10xf32>
    %149 = arith.addf %136, %148 : vector<2x14x10xf32>
    %cst_55 = arith.constant -0.276693791 : f32
    %150 = vector.broadcast %cst_55 : f32 to vector<2x14x10xf32>
    %151 = arith.mulf %150, %143 : vector<2x14x10xf32>
    %152 = arith.addf %139, %151 : vector<2x14x10xf32>
    %cst_56 = arith.constant -0.271268129 : f32
    %153 = vector.broadcast %cst_56 : f32 to vector<2x14x10xf32>
    %154 = arith.mulf %153, %143 : vector<2x14x10xf32>
    %155 = arith.addf %142, %154 : vector<2x14x10xf32>
    %156 = vector.extract_strided_slice %86 {offsets = [0, 0, 2], sizes = [2, 14, 10], strides = [1, 1, 1]} : vector<2x14x12xf32> to vector<2x14x10xf32>
    %cst_57 = arith.constant -0.177969843 : f32
    %157 = vector.broadcast %cst_57 : f32 to vector<2x14x10xf32>
    %158 = arith.mulf %157, %156 : vector<2x14x10xf32>
    %159 = arith.addf %146, %158 : vector<2x14x10xf32>
    %cst_58 = arith.constant 0.0450103022 : f32
    %160 = vector.broadcast %cst_58 : f32 to vector<2x14x10xf32>
    %161 = arith.mulf %160, %156 : vector<2x14x10xf32>
    %162 = arith.addf %149, %161 : vector<2x14x10xf32>
    %cst_59 = arith.constant 0.0516129397 : f32
    %163 = vector.broadcast %cst_59 : f32 to vector<2x14x10xf32>
    %164 = arith.mulf %163, %156 : vector<2x14x10xf32>
    %165 = arith.addf %152, %164 : vector<2x14x10xf32>
    %cst_60 = arith.constant 0.133320257 : f32
    %166 = vector.broadcast %cst_60 : f32 to vector<2x14x10xf32>
    %167 = arith.mulf %166, %156 : vector<2x14x10xf32>
    %168 = arith.addf %155, %167 : vector<2x14x10xf32>
    %169 = vector.extract_strided_slice %90 {offsets = [0, 0, 0], sizes = [2, 14, 10], strides = [1, 1, 1]} : vector<2x14x12xf32> to vector<2x14x10xf32>
    %cst_61 = arith.constant -0.100719467 : f32
    %170 = vector.broadcast %cst_61 : f32 to vector<2x14x10xf32>
    %171 = arith.mulf %170, %169 : vector<2x14x10xf32>
    %172 = arith.addf %159, %171 : vector<2x14x10xf32>
    %cst_62 = arith.constant -0.234309852 : f32
    %173 = vector.broadcast %cst_62 : f32 to vector<2x14x10xf32>
    %174 = arith.mulf %173, %169 : vector<2x14x10xf32>
    %175 = arith.addf %162, %174 : vector<2x14x10xf32>
    %cst_63 = arith.constant 0.133593351 : f32
    %176 = vector.broadcast %cst_63 : f32 to vector<2x14x10xf32>
    %177 = arith.mulf %176, %169 : vector<2x14x10xf32>
    %178 = arith.addf %165, %177 : vector<2x14x10xf32>
    %cst_64 = arith.constant -1.608510e-01 : f32
    %179 = vector.broadcast %cst_64 : f32 to vector<2x14x10xf32>
    %180 = arith.mulf %179, %169 : vector<2x14x10xf32>
    %181 = arith.addf %168, %180 : vector<2x14x10xf32>
    %182 = vector.extract_strided_slice %90 {offsets = [0, 0, 1], sizes = [2, 14, 10], strides = [1, 1, 1]} : vector<2x14x12xf32> to vector<2x14x10xf32>
    %cst_65 = arith.constant 0.279995531 : f32
    %183 = vector.broadcast %cst_65 : f32 to vector<2x14x10xf32>
    %184 = arith.mulf %183, %182 : vector<2x14x10xf32>
    %185 = arith.addf %172, %184 : vector<2x14x10xf32>
    %cst_66 = arith.constant 0.00966950319 : f32
    %186 = vector.broadcast %cst_66 : f32 to vector<2x14x10xf32>
    %187 = arith.mulf %186, %182 : vector<2x14x10xf32>
    %188 = arith.addf %175, %187 : vector<2x14x10xf32>
    %cst_67 = arith.constant -0.0503966585 : f32
    %189 = vector.broadcast %cst_67 : f32 to vector<2x14x10xf32>
    %190 = arith.mulf %189, %182 : vector<2x14x10xf32>
    %191 = arith.addf %178, %190 : vector<2x14x10xf32>
    %cst_68 = arith.constant 0.227484092 : f32
    %192 = vector.broadcast %cst_68 : f32 to vector<2x14x10xf32>
    %193 = arith.mulf %192, %182 : vector<2x14x10xf32>
    %194 = arith.addf %181, %193 : vector<2x14x10xf32>
    %195 = vector.extract_strided_slice %90 {offsets = [0, 0, 2], sizes = [2, 14, 10], strides = [1, 1, 1]} : vector<2x14x12xf32> to vector<2x14x10xf32>
    %cst_69 = arith.constant 0.166838765 : f32
    %196 = vector.broadcast %cst_69 : f32 to vector<2x14x10xf32>
    %197 = arith.mulf %196, %195 : vector<2x14x10xf32>
    %198 = arith.addf %185, %197 : vector<2x14x10xf32>
    %cst_70 = arith.constant -0.277489066 : f32
    %199 = vector.broadcast %cst_70 : f32 to vector<2x14x10xf32>
    %200 = arith.mulf %199, %195 : vector<2x14x10xf32>
    %201 = arith.addf %188, %200 : vector<2x14x10xf32>
    %cst_71 = arith.constant 0.0238531344 : f32
    %202 = vector.broadcast %cst_71 : f32 to vector<2x14x10xf32>
    %203 = arith.mulf %202, %195 : vector<2x14x10xf32>
    %204 = arith.addf %191, %203 : vector<2x14x10xf32>
    %cst_72 = arith.constant -0.224595755 : f32
    %205 = vector.broadcast %cst_72 : f32 to vector<2x14x10xf32>
    %206 = arith.mulf %205, %195 : vector<2x14x10xf32>
    %207 = arith.addf %194, %206 : vector<2x14x10xf32>
    %208 = vector.extract_strided_slice %94 {offsets = [0, 0, 0], sizes = [2, 14, 10], strides = [1, 1, 1]} : vector<2x14x12xf32> to vector<2x14x10xf32>
    %cst_73 = arith.constant -1.630740e-01 : f32
    %209 = vector.broadcast %cst_73 : f32 to vector<2x14x10xf32>
    %210 = arith.mulf %209, %208 : vector<2x14x10xf32>
    %211 = arith.addf %198, %210 : vector<2x14x10xf32>
    %cst_74 = arith.constant -0.0530500859 : f32
    %212 = vector.broadcast %cst_74 : f32 to vector<2x14x10xf32>
    %213 = arith.mulf %212, %208 : vector<2x14x10xf32>
    %214 = arith.addf %201, %213 : vector<2x14x10xf32>
    %cst_75 = arith.constant -0.0189249516 : f32
    %215 = vector.broadcast %cst_75 : f32 to vector<2x14x10xf32>
    %216 = arith.mulf %215, %208 : vector<2x14x10xf32>
    %217 = arith.addf %204, %216 : vector<2x14x10xf32>
    %cst_76 = arith.constant 0.165470928 : f32
    %218 = vector.broadcast %cst_76 : f32 to vector<2x14x10xf32>
    %219 = arith.mulf %218, %208 : vector<2x14x10xf32>
    %220 = arith.addf %207, %219 : vector<2x14x10xf32>
    %221 = vector.extract_strided_slice %94 {offsets = [0, 0, 1], sizes = [2, 14, 10], strides = [1, 1, 1]} : vector<2x14x12xf32> to vector<2x14x10xf32>
    %cst_77 = arith.constant -0.196215972 : f32
    %222 = vector.broadcast %cst_77 : f32 to vector<2x14x10xf32>
    %223 = arith.mulf %222, %221 : vector<2x14x10xf32>
    %224 = arith.addf %211, %223 : vector<2x14x10xf32>
    %cst_78 = arith.constant 0.0924405083 : f32
    %225 = vector.broadcast %cst_78 : f32 to vector<2x14x10xf32>
    %226 = arith.mulf %225, %221 : vector<2x14x10xf32>
    %227 = arith.addf %214, %226 : vector<2x14x10xf32>
    %cst_79 = arith.constant -0.162377492 : f32
    %228 = vector.broadcast %cst_79 : f32 to vector<2x14x10xf32>
    %229 = arith.mulf %228, %221 : vector<2x14x10xf32>
    %230 = arith.addf %217, %229 : vector<2x14x10xf32>
    %cst_80 = arith.constant -0.143584818 : f32
    %231 = vector.broadcast %cst_80 : f32 to vector<2x14x10xf32>
    %232 = arith.mulf %231, %221 : vector<2x14x10xf32>
    %233 = arith.addf %220, %232 : vector<2x14x10xf32>
    %234 = vector.extract_strided_slice %94 {offsets = [0, 0, 2], sizes = [2, 14, 10], strides = [1, 1, 1]} : vector<2x14x12xf32> to vector<2x14x10xf32>
    %cst_81 = arith.constant 0.250692189 : f32
    %235 = vector.broadcast %cst_81 : f32 to vector<2x14x10xf32>
    %236 = arith.mulf %235, %234 : vector<2x14x10xf32>
    %237 = arith.addf %224, %236 : vector<2x14x10xf32>
    %cst_82 = arith.constant 0.283182085 : f32
    %238 = vector.broadcast %cst_82 : f32 to vector<2x14x10xf32>
    %239 = arith.mulf %238, %234 : vector<2x14x10xf32>
    %240 = arith.addf %227, %239 : vector<2x14x10xf32>
    %cst_83 = arith.constant 0.143737614 : f32
    %241 = vector.broadcast %cst_83 : f32 to vector<2x14x10xf32>
    %242 = arith.mulf %241, %234 : vector<2x14x10xf32>
    %243 = arith.addf %230, %242 : vector<2x14x10xf32>
    %cst_84 = arith.constant 0.0419341475 : f32
    %244 = vector.broadcast %cst_84 : f32 to vector<2x14x10xf32>
    %245 = arith.mulf %244, %234 : vector<2x14x10xf32>
    %246 = arith.addf %233, %245 : vector<2x14x10xf32>
    %cst_85 = arith.constant -0.255239964 : f32
    %247 = vector.broadcast %cst_85 : f32 to vector<2x14x10xf32>
    %248 = arith.addf %237, %247 : vector<2x14x10xf32>
    %cst_86 = arith.constant 0.000000e+00 : f32
    %249 = vector.broadcast %cst_86 : f32 to vector<2x14x10xf32>
    %250 = arith.maximumf %248, %249 : vector<2x14x10xf32>
    %cst_87 = arith.constant -0.0232585501 : f32
    %251 = vector.broadcast %cst_87 : f32 to vector<2x14x10xf32>
    %252 = arith.addf %240, %251 : vector<2x14x10xf32>
    %cst_88 = arith.constant 0.000000e+00 : f32
    %253 = vector.broadcast %cst_88 : f32 to vector<2x14x10xf32>
    %254 = arith.maximumf %252, %253 : vector<2x14x10xf32>
    %cst_89 = arith.constant -0.0884360373 : f32
    %255 = vector.broadcast %cst_89 : f32 to vector<2x14x10xf32>
    %256 = arith.addf %243, %255 : vector<2x14x10xf32>
    %cst_90 = arith.constant 0.000000e+00 : f32
    %257 = vector.broadcast %cst_90 : f32 to vector<2x14x10xf32>
    %258 = arith.maximumf %256, %257 : vector<2x14x10xf32>
    %cst_91 = arith.constant -0.0540637486 : f32
    %259 = vector.broadcast %cst_91 : f32 to vector<2x14x10xf32>
    %260 = arith.addf %246, %259 : vector<2x14x10xf32>
    %cst_92 = arith.constant 0.000000e+00 : f32
    %261 = vector.broadcast %cst_92 : f32 to vector<2x14x10xf32>
    %262 = arith.maximumf %260, %261 : vector<2x14x10xf32>
    %263 = vector.extract_strided_slice %250 {offsets = [0, 0, 0], sizes = [2, 12, 8], strides = [1, 1, 1]} : vector<2x14x10xf32> to vector<2x12x8xf32>
    %cst_93 = arith.constant -0.133585736 : f32
    %264 = vector.broadcast %cst_93 : f32 to vector<2x12x8xf32>
    %265 = arith.mulf %264, %263 : vector<2x12x8xf32>
    %266 = vector.extract_strided_slice %250 {offsets = [0, 0, 1], sizes = [2, 12, 8], strides = [1, 1, 1]} : vector<2x14x10xf32> to vector<2x12x8xf32>
    %cst_94 = arith.constant 0.0967892408 : f32
    %267 = vector.broadcast %cst_94 : f32 to vector<2x12x8xf32>
    %268 = arith.mulf %267, %266 : vector<2x12x8xf32>
    %269 = arith.addf %265, %268 : vector<2x12x8xf32>
    %270 = vector.extract_strided_slice %250 {offsets = [0, 0, 2], sizes = [2, 12, 8], strides = [1, 1, 1]} : vector<2x14x10xf32> to vector<2x12x8xf32>
    %cst_95 = arith.constant 0.0833108872 : f32
    %271 = vector.broadcast %cst_95 : f32 to vector<2x12x8xf32>
    %272 = arith.mulf %271, %270 : vector<2x12x8xf32>
    %273 = arith.addf %269, %272 : vector<2x12x8xf32>
    %274 = vector.extract_strided_slice %250 {offsets = [0, 1, 0], sizes = [2, 12, 8], strides = [1, 1, 1]} : vector<2x14x10xf32> to vector<2x12x8xf32>
    %cst_96 = arith.constant 0.0291908588 : f32
    %275 = vector.broadcast %cst_96 : f32 to vector<2x12x8xf32>
    %276 = arith.mulf %275, %274 : vector<2x12x8xf32>
    %277 = arith.addf %273, %276 : vector<2x12x8xf32>
    %278 = vector.extract_strided_slice %250 {offsets = [0, 1, 1], sizes = [2, 12, 8], strides = [1, 1, 1]} : vector<2x14x10xf32> to vector<2x12x8xf32>
    %cst_97 = arith.constant -0.0478343964 : f32
    %279 = vector.broadcast %cst_97 : f32 to vector<2x12x8xf32>
    %280 = arith.mulf %279, %278 : vector<2x12x8xf32>
    %281 = arith.addf %277, %280 : vector<2x12x8xf32>
    %282 = vector.extract_strided_slice %250 {offsets = [0, 1, 2], sizes = [2, 12, 8], strides = [1, 1, 1]} : vector<2x14x10xf32> to vector<2x12x8xf32>
    %cst_98 = arith.constant 0.0190650634 : f32
    %283 = vector.broadcast %cst_98 : f32 to vector<2x12x8xf32>
    %284 = arith.mulf %283, %282 : vector<2x12x8xf32>
    %285 = arith.addf %281, %284 : vector<2x12x8xf32>
    %286 = vector.extract_strided_slice %250 {offsets = [0, 2, 0], sizes = [2, 12, 8], strides = [1, 1, 1]} : vector<2x14x10xf32> to vector<2x12x8xf32>
    %cst_99 = arith.constant -0.116691075 : f32
    %287 = vector.broadcast %cst_99 : f32 to vector<2x12x8xf32>
    %288 = arith.mulf %287, %286 : vector<2x12x8xf32>
    %289 = arith.addf %285, %288 : vector<2x12x8xf32>
    %290 = vector.extract_strided_slice %250 {offsets = [0, 2, 1], sizes = [2, 12, 8], strides = [1, 1, 1]} : vector<2x14x10xf32> to vector<2x12x8xf32>
    %cst_100 = arith.constant -0.133271933 : f32
    %291 = vector.broadcast %cst_100 : f32 to vector<2x12x8xf32>
    %292 = arith.mulf %291, %290 : vector<2x12x8xf32>
    %293 = arith.addf %289, %292 : vector<2x12x8xf32>
    %294 = vector.extract_strided_slice %250 {offsets = [0, 2, 2], sizes = [2, 12, 8], strides = [1, 1, 1]} : vector<2x14x10xf32> to vector<2x12x8xf32>
    %cst_101 = arith.constant 0.109915778 : f32
    %295 = vector.broadcast %cst_101 : f32 to vector<2x12x8xf32>
    %296 = arith.mulf %295, %294 : vector<2x12x8xf32>
    %297 = arith.addf %293, %296 : vector<2x12x8xf32>
    %298 = vector.extract_strided_slice %254 {offsets = [0, 0, 0], sizes = [2, 12, 8], strides = [1, 1, 1]} : vector<2x14x10xf32> to vector<2x12x8xf32>
    %cst_102 = arith.constant -0.155778572 : f32
    %299 = vector.broadcast %cst_102 : f32 to vector<2x12x8xf32>
    %300 = arith.mulf %299, %298 : vector<2x12x8xf32>
    %301 = arith.addf %297, %300 : vector<2x12x8xf32>
    %302 = vector.extract_strided_slice %254 {offsets = [0, 0, 1], sizes = [2, 12, 8], strides = [1, 1, 1]} : vector<2x14x10xf32> to vector<2x12x8xf32>
    %cst_103 = arith.constant -0.0921330899 : f32
    %303 = vector.broadcast %cst_103 : f32 to vector<2x12x8xf32>
    %304 = arith.mulf %303, %302 : vector<2x12x8xf32>
    %305 = arith.addf %301, %304 : vector<2x12x8xf32>
    %306 = vector.extract_strided_slice %254 {offsets = [0, 0, 2], sizes = [2, 12, 8], strides = [1, 1, 1]} : vector<2x14x10xf32> to vector<2x12x8xf32>
    %cst_104 = arith.constant -0.0555064678 : f32
    %307 = vector.broadcast %cst_104 : f32 to vector<2x12x8xf32>
    %308 = arith.mulf %307, %306 : vector<2x12x8xf32>
    %309 = arith.addf %305, %308 : vector<2x12x8xf32>
    %310 = vector.extract_strided_slice %254 {offsets = [0, 1, 0], sizes = [2, 12, 8], strides = [1, 1, 1]} : vector<2x14x10xf32> to vector<2x12x8xf32>
    %cst_105 = arith.constant -0.145633981 : f32
    %311 = vector.broadcast %cst_105 : f32 to vector<2x12x8xf32>
    %312 = arith.mulf %311, %310 : vector<2x12x8xf32>
    %313 = arith.addf %309, %312 : vector<2x12x8xf32>
    %314 = vector.extract_strided_slice %254 {offsets = [0, 1, 1], sizes = [2, 12, 8], strides = [1, 1, 1]} : vector<2x14x10xf32> to vector<2x12x8xf32>
    %cst_106 = arith.constant -0.0691896304 : f32
    %315 = vector.broadcast %cst_106 : f32 to vector<2x12x8xf32>
    %316 = arith.mulf %315, %314 : vector<2x12x8xf32>
    %317 = arith.addf %313, %316 : vector<2x12x8xf32>
    %318 = vector.extract_strided_slice %254 {offsets = [0, 1, 2], sizes = [2, 12, 8], strides = [1, 1, 1]} : vector<2x14x10xf32> to vector<2x12x8xf32>
    %cst_107 = arith.constant -0.140682027 : f32
    %319 = vector.broadcast %cst_107 : f32 to vector<2x12x8xf32>
    %320 = arith.mulf %319, %318 : vector<2x12x8xf32>
    %321 = arith.addf %317, %320 : vector<2x12x8xf32>
    %322 = vector.extract_strided_slice %254 {offsets = [0, 2, 0], sizes = [2, 12, 8], strides = [1, 1, 1]} : vector<2x14x10xf32> to vector<2x12x8xf32>
    %cst_108 = arith.constant -0.106226169 : f32
    %323 = vector.broadcast %cst_108 : f32 to vector<2x12x8xf32>
    %324 = arith.mulf %323, %322 : vector<2x12x8xf32>
    %325 = arith.addf %321, %324 : vector<2x12x8xf32>
    %326 = vector.extract_strided_slice %254 {offsets = [0, 2, 1], sizes = [2, 12, 8], strides = [1, 1, 1]} : vector<2x14x10xf32> to vector<2x12x8xf32>
    %cst_109 = arith.constant 0.136110231 : f32
    %327 = vector.broadcast %cst_109 : f32 to vector<2x12x8xf32>
    %328 = arith.mulf %327, %326 : vector<2x12x8xf32>
    %329 = arith.addf %325, %328 : vector<2x12x8xf32>
    %330 = vector.extract_strided_slice %254 {offsets = [0, 2, 2], sizes = [2, 12, 8], strides = [1, 1, 1]} : vector<2x14x10xf32> to vector<2x12x8xf32>
    %cst_110 = arith.constant -0.143163681 : f32
    %331 = vector.broadcast %cst_110 : f32 to vector<2x12x8xf32>
    %332 = arith.mulf %331, %330 : vector<2x12x8xf32>
    %333 = arith.addf %329, %332 : vector<2x12x8xf32>
    %334 = vector.extract_strided_slice %258 {offsets = [0, 0, 0], sizes = [2, 12, 8], strides = [1, 1, 1]} : vector<2x14x10xf32> to vector<2x12x8xf32>
    %cst_111 = arith.constant 0.048604887 : f32
    %335 = vector.broadcast %cst_111 : f32 to vector<2x12x8xf32>
    %336 = arith.mulf %335, %334 : vector<2x12x8xf32>
    %337 = arith.addf %333, %336 : vector<2x12x8xf32>
    %338 = vector.extract_strided_slice %258 {offsets = [0, 0, 1], sizes = [2, 12, 8], strides = [1, 1, 1]} : vector<2x14x10xf32> to vector<2x12x8xf32>
    %cst_112 = arith.constant 0.0320260935 : f32
    %339 = vector.broadcast %cst_112 : f32 to vector<2x12x8xf32>
    %340 = arith.mulf %339, %338 : vector<2x12x8xf32>
    %341 = arith.addf %337, %340 : vector<2x12x8xf32>
    %342 = vector.extract_strided_slice %258 {offsets = [0, 0, 2], sizes = [2, 12, 8], strides = [1, 1, 1]} : vector<2x14x10xf32> to vector<2x12x8xf32>
    %cst_113 = arith.constant -0.131199479 : f32
    %343 = vector.broadcast %cst_113 : f32 to vector<2x12x8xf32>
    %344 = arith.mulf %343, %342 : vector<2x12x8xf32>
    %345 = arith.addf %341, %344 : vector<2x12x8xf32>
    %346 = vector.extract_strided_slice %258 {offsets = [0, 1, 0], sizes = [2, 12, 8], strides = [1, 1, 1]} : vector<2x14x10xf32> to vector<2x12x8xf32>
    %cst_114 = arith.constant 0.106685922 : f32
    %347 = vector.broadcast %cst_114 : f32 to vector<2x12x8xf32>
    %348 = arith.mulf %347, %346 : vector<2x12x8xf32>
    %349 = arith.addf %345, %348 : vector<2x12x8xf32>
    %350 = vector.extract_strided_slice %258 {offsets = [0, 1, 1], sizes = [2, 12, 8], strides = [1, 1, 1]} : vector<2x14x10xf32> to vector<2x12x8xf32>
    %cst_115 = arith.constant 0.0851062163 : f32
    %351 = vector.broadcast %cst_115 : f32 to vector<2x12x8xf32>
    %352 = arith.mulf %351, %350 : vector<2x12x8xf32>
    %353 = arith.addf %349, %352 : vector<2x12x8xf32>
    %354 = vector.extract_strided_slice %258 {offsets = [0, 1, 2], sizes = [2, 12, 8], strides = [1, 1, 1]} : vector<2x14x10xf32> to vector<2x12x8xf32>
    %cst_116 = arith.constant 0.0371485166 : f32
    %355 = vector.broadcast %cst_116 : f32 to vector<2x12x8xf32>
    %356 = arith.mulf %355, %354 : vector<2x12x8xf32>
    %357 = arith.addf %353, %356 : vector<2x12x8xf32>
    %358 = vector.extract_strided_slice %258 {offsets = [0, 2, 0], sizes = [2, 12, 8], strides = [1, 1, 1]} : vector<2x14x10xf32> to vector<2x12x8xf32>
    %cst_117 = arith.constant -0.0333037786 : f32
    %359 = vector.broadcast %cst_117 : f32 to vector<2x12x8xf32>
    %360 = arith.mulf %359, %358 : vector<2x12x8xf32>
    %361 = arith.addf %357, %360 : vector<2x12x8xf32>
    %362 = vector.extract_strided_slice %258 {offsets = [0, 2, 1], sizes = [2, 12, 8], strides = [1, 1, 1]} : vector<2x14x10xf32> to vector<2x12x8xf32>
    %cst_118 = arith.constant 0.0444660187 : f32
    %363 = vector.broadcast %cst_118 : f32 to vector<2x12x8xf32>
    %364 = arith.mulf %363, %362 : vector<2x12x8xf32>
    %365 = arith.addf %361, %364 : vector<2x12x8xf32>
    %366 = vector.extract_strided_slice %258 {offsets = [0, 2, 2], sizes = [2, 12, 8], strides = [1, 1, 1]} : vector<2x14x10xf32> to vector<2x12x8xf32>
    %cst_119 = arith.constant 0.0132931471 : f32
    %367 = vector.broadcast %cst_119 : f32 to vector<2x12x8xf32>
    %368 = arith.mulf %367, %366 : vector<2x12x8xf32>
    %369 = arith.addf %365, %368 : vector<2x12x8xf32>
    %370 = vector.extract_strided_slice %262 {offsets = [0, 0, 0], sizes = [2, 12, 8], strides = [1, 1, 1]} : vector<2x14x10xf32> to vector<2x12x8xf32>
    %cst_120 = arith.constant -0.117967807 : f32
    %371 = vector.broadcast %cst_120 : f32 to vector<2x12x8xf32>
    %372 = arith.mulf %371, %370 : vector<2x12x8xf32>
    %373 = arith.addf %369, %372 : vector<2x12x8xf32>
    %374 = vector.extract_strided_slice %262 {offsets = [0, 0, 1], sizes = [2, 12, 8], strides = [1, 1, 1]} : vector<2x14x10xf32> to vector<2x12x8xf32>
    %cst_121 = arith.constant 0.119933486 : f32
    %375 = vector.broadcast %cst_121 : f32 to vector<2x12x8xf32>
    %376 = arith.mulf %375, %374 : vector<2x12x8xf32>
    %377 = arith.addf %373, %376 : vector<2x12x8xf32>
    %378 = vector.extract_strided_slice %262 {offsets = [0, 0, 2], sizes = [2, 12, 8], strides = [1, 1, 1]} : vector<2x14x10xf32> to vector<2x12x8xf32>
    %cst_122 = arith.constant 0.16415529 : f32
    %379 = vector.broadcast %cst_122 : f32 to vector<2x12x8xf32>
    %380 = arith.mulf %379, %378 : vector<2x12x8xf32>
    %381 = arith.addf %377, %380 : vector<2x12x8xf32>
    %382 = vector.extract_strided_slice %262 {offsets = [0, 1, 0], sizes = [2, 12, 8], strides = [1, 1, 1]} : vector<2x14x10xf32> to vector<2x12x8xf32>
    %cst_123 = arith.constant -0.00800013542 : f32
    %383 = vector.broadcast %cst_123 : f32 to vector<2x12x8xf32>
    %384 = arith.mulf %383, %382 : vector<2x12x8xf32>
    %385 = arith.addf %381, %384 : vector<2x12x8xf32>
    %386 = vector.extract_strided_slice %262 {offsets = [0, 1, 1], sizes = [2, 12, 8], strides = [1, 1, 1]} : vector<2x14x10xf32> to vector<2x12x8xf32>
    %cst_124 = arith.constant -0.025521636 : f32
    %387 = vector.broadcast %cst_124 : f32 to vector<2x12x8xf32>
    %388 = arith.mulf %387, %386 : vector<2x12x8xf32>
    %389 = arith.addf %385, %388 : vector<2x12x8xf32>
    %390 = vector.extract_strided_slice %262 {offsets = [0, 1, 2], sizes = [2, 12, 8], strides = [1, 1, 1]} : vector<2x14x10xf32> to vector<2x12x8xf32>
    %cst_125 = arith.constant 0.135991141 : f32
    %391 = vector.broadcast %cst_125 : f32 to vector<2x12x8xf32>
    %392 = arith.mulf %391, %390 : vector<2x12x8xf32>
    %393 = arith.addf %389, %392 : vector<2x12x8xf32>
    %394 = vector.extract_strided_slice %262 {offsets = [0, 2, 0], sizes = [2, 12, 8], strides = [1, 1, 1]} : vector<2x14x10xf32> to vector<2x12x8xf32>
    %cst_126 = arith.constant 0.0184557047 : f32
    %395 = vector.broadcast %cst_126 : f32 to vector<2x12x8xf32>
    %396 = arith.mulf %395, %394 : vector<2x12x8xf32>
    %397 = arith.addf %393, %396 : vector<2x12x8xf32>
    %398 = vector.extract_strided_slice %262 {offsets = [0, 2, 1], sizes = [2, 12, 8], strides = [1, 1, 1]} : vector<2x14x10xf32> to vector<2x12x8xf32>
    %cst_127 = arith.constant -0.145131707 : f32
    %399 = vector.broadcast %cst_127 : f32 to vector<2x12x8xf32>
    %400 = arith.mulf %399, %398 : vector<2x12x8xf32>
    %401 = arith.addf %397, %400 : vector<2x12x8xf32>
    %402 = vector.extract_strided_slice %262 {offsets = [0, 2, 2], sizes = [2, 12, 8], strides = [1, 1, 1]} : vector<2x14x10xf32> to vector<2x12x8xf32>
    %cst_128 = arith.constant 0.0411779098 : f32
    %403 = vector.broadcast %cst_128 : f32 to vector<2x12x8xf32>
    %404 = arith.mulf %403, %402 : vector<2x12x8xf32>
    %405 = arith.addf %401, %404 : vector<2x12x8xf32>
    %cst_129 = arith.constant -0.10048493 : f32
    %406 = vector.broadcast %cst_129 : f32 to vector<2x12x8xf32>
    %407 = arith.addf %405, %406 : vector<2x12x8xf32>
    %408 = vector.extract_strided_slice %40 {offsets = [0, 0, 0], sizes = [2, 12, 14], strides = [1, 1, 1]} : vector<2x14x14xf32> to vector<2x12x14xf32>
    %cst_130 = arith.constant -0.0194447227 : f32
    %409 = vector.broadcast %cst_130 : f32 to vector<2x12x14xf32>
    %410 = arith.mulf %409, %408 : vector<2x12x14xf32>
    %cst_131 = arith.constant 0.0530999862 : f32
    %411 = vector.broadcast %cst_131 : f32 to vector<2x12x14xf32>
    %412 = arith.mulf %411, %408 : vector<2x12x14xf32>
    %cst_132 = arith.constant -0.206265524 : f32
    %413 = vector.broadcast %cst_132 : f32 to vector<2x12x14xf32>
    %414 = arith.mulf %413, %408 : vector<2x12x14xf32>
    %cst_133 = arith.constant -0.390082926 : f32
    %415 = vector.broadcast %cst_133 : f32 to vector<2x12x14xf32>
    %416 = arith.mulf %415, %408 : vector<2x12x14xf32>
    %417 = vector.extract_strided_slice %40 {offsets = [0, 1, 0], sizes = [2, 12, 14], strides = [1, 1, 1]} : vector<2x14x14xf32> to vector<2x12x14xf32>
    %cst_134 = arith.constant 0.0175437611 : f32
    %418 = vector.broadcast %cst_134 : f32 to vector<2x12x14xf32>
    %419 = arith.mulf %418, %417 : vector<2x12x14xf32>
    %420 = arith.addf %410, %419 : vector<2x12x14xf32>
    %cst_135 = arith.constant -0.522804916 : f32
    %421 = vector.broadcast %cst_135 : f32 to vector<2x12x14xf32>
    %422 = arith.mulf %421, %417 : vector<2x12x14xf32>
    %423 = arith.addf %412, %422 : vector<2x12x14xf32>
    %cst_136 = arith.constant -0.453283608 : f32
    %424 = vector.broadcast %cst_136 : f32 to vector<2x12x14xf32>
    %425 = arith.mulf %424, %417 : vector<2x12x14xf32>
    %426 = arith.addf %414, %425 : vector<2x12x14xf32>
    %cst_137 = arith.constant -0.100310981 : f32
    %427 = vector.broadcast %cst_137 : f32 to vector<2x12x14xf32>
    %428 = arith.mulf %427, %417 : vector<2x12x14xf32>
    %429 = arith.addf %416, %428 : vector<2x12x14xf32>
    %430 = vector.extract_strided_slice %40 {offsets = [0, 2, 0], sizes = [2, 12, 14], strides = [1, 1, 1]} : vector<2x14x14xf32> to vector<2x12x14xf32>
    %cst_138 = arith.constant -0.340035081 : f32
    %431 = vector.broadcast %cst_138 : f32 to vector<2x12x14xf32>
    %432 = arith.mulf %431, %430 : vector<2x12x14xf32>
    %433 = arith.addf %420, %432 : vector<2x12x14xf32>
    %cst_139 = arith.constant 0.2130173 : f32
    %434 = vector.broadcast %cst_139 : f32 to vector<2x12x14xf32>
    %435 = arith.mulf %434, %430 : vector<2x12x14xf32>
    %436 = arith.addf %423, %435 : vector<2x12x14xf32>
    %cst_140 = arith.constant 4.245290e-01 : f32
    %437 = vector.broadcast %cst_140 : f32 to vector<2x12x14xf32>
    %438 = arith.mulf %437, %430 : vector<2x12x14xf32>
    %439 = arith.addf %426, %438 : vector<2x12x14xf32>
    %cst_141 = arith.constant 0.420817375 : f32
    %440 = vector.broadcast %cst_141 : f32 to vector<2x12x14xf32>
    %441 = arith.mulf %440, %430 : vector<2x12x14xf32>
    %442 = arith.addf %429, %441 : vector<2x12x14xf32>
    %cst_142 = arith.constant 0.126655877 : f32
    %443 = vector.broadcast %cst_142 : f32 to vector<2x12x14xf32>
    %444 = arith.addf %433, %443 : vector<2x12x14xf32>
    %cst_143 = arith.constant 0.000000e+00 : f32
    %445 = vector.broadcast %cst_143 : f32 to vector<2x12x14xf32>
    %446 = arith.maximumf %444, %445 : vector<2x12x14xf32>
    %cst_144 = arith.constant -0.212613434 : f32
    %447 = vector.broadcast %cst_144 : f32 to vector<2x12x14xf32>
    %448 = arith.addf %436, %447 : vector<2x12x14xf32>
    %cst_145 = arith.constant 0.000000e+00 : f32
    %449 = vector.broadcast %cst_145 : f32 to vector<2x12x14xf32>
    %450 = arith.maximumf %448, %449 : vector<2x12x14xf32>
    %cst_146 = arith.constant -0.418281972 : f32
    %451 = vector.broadcast %cst_146 : f32 to vector<2x12x14xf32>
    %452 = arith.addf %439, %451 : vector<2x12x14xf32>
    %cst_147 = arith.constant 0.000000e+00 : f32
    %453 = vector.broadcast %cst_147 : f32 to vector<2x12x14xf32>
    %454 = arith.maximumf %452, %453 : vector<2x12x14xf32>
    %cst_148 = arith.constant 0.429246426 : f32
    %455 = vector.broadcast %cst_148 : f32 to vector<2x12x14xf32>
    %456 = arith.addf %442, %455 : vector<2x12x14xf32>
    %cst_149 = arith.constant 0.000000e+00 : f32
    %457 = vector.broadcast %cst_149 : f32 to vector<2x12x14xf32>
    %458 = arith.maximumf %456, %457 : vector<2x12x14xf32>
    %459 = vector.extract_strided_slice %446 {offsets = [0, 0, 0], sizes = [2, 10, 14], strides = [1, 1, 1]} : vector<2x12x14xf32> to vector<2x10x14xf32>
    %cst_150 = arith.constant 0.0361010469 : f32
    %460 = vector.broadcast %cst_150 : f32 to vector<2x10x14xf32>
    %461 = arith.mulf %460, %459 : vector<2x10x14xf32>
    %cst_151 = arith.constant 0.240727291 : f32
    %462 = vector.broadcast %cst_151 : f32 to vector<2x10x14xf32>
    %463 = arith.mulf %462, %459 : vector<2x10x14xf32>
    %cst_152 = arith.constant 0.0616293251 : f32
    %464 = vector.broadcast %cst_152 : f32 to vector<2x10x14xf32>
    %465 = arith.mulf %464, %459 : vector<2x10x14xf32>
    %cst_153 = arith.constant -0.0882919132 : f32
    %466 = vector.broadcast %cst_153 : f32 to vector<2x10x14xf32>
    %467 = arith.mulf %466, %459 : vector<2x10x14xf32>
    %468 = vector.extract_strided_slice %446 {offsets = [0, 1, 0], sizes = [2, 10, 14], strides = [1, 1, 1]} : vector<2x12x14xf32> to vector<2x10x14xf32>
    %cst_154 = arith.constant -0.00464049168 : f32
    %469 = vector.broadcast %cst_154 : f32 to vector<2x10x14xf32>
    %470 = arith.mulf %469, %468 : vector<2x10x14xf32>
    %471 = arith.addf %461, %470 : vector<2x10x14xf32>
    %cst_155 = arith.constant -0.121983729 : f32
    %472 = vector.broadcast %cst_155 : f32 to vector<2x10x14xf32>
    %473 = arith.mulf %472, %468 : vector<2x10x14xf32>
    %474 = arith.addf %463, %473 : vector<2x10x14xf32>
    %cst_156 = arith.constant 0.101015829 : f32
    %475 = vector.broadcast %cst_156 : f32 to vector<2x10x14xf32>
    %476 = arith.mulf %475, %468 : vector<2x10x14xf32>
    %477 = arith.addf %465, %476 : vector<2x10x14xf32>
    %cst_157 = arith.constant 0.21983853 : f32
    %478 = vector.broadcast %cst_157 : f32 to vector<2x10x14xf32>
    %479 = arith.mulf %478, %468 : vector<2x10x14xf32>
    %480 = arith.addf %467, %479 : vector<2x10x14xf32>
    %481 = vector.extract_strided_slice %446 {offsets = [0, 2, 0], sizes = [2, 10, 14], strides = [1, 1, 1]} : vector<2x12x14xf32> to vector<2x10x14xf32>
    %cst_158 = arith.constant -0.0533142388 : f32
    %482 = vector.broadcast %cst_158 : f32 to vector<2x10x14xf32>
    %483 = arith.mulf %482, %481 : vector<2x10x14xf32>
    %484 = arith.addf %471, %483 : vector<2x10x14xf32>
    %cst_159 = arith.constant -0.0300513525 : f32
    %485 = vector.broadcast %cst_159 : f32 to vector<2x10x14xf32>
    %486 = arith.mulf %485, %481 : vector<2x10x14xf32>
    %487 = arith.addf %474, %486 : vector<2x10x14xf32>
    %cst_160 = arith.constant 0.206211284 : f32
    %488 = vector.broadcast %cst_160 : f32 to vector<2x10x14xf32>
    %489 = arith.mulf %488, %481 : vector<2x10x14xf32>
    %490 = arith.addf %477, %489 : vector<2x10x14xf32>
    %cst_161 = arith.constant -0.130161986 : f32
    %491 = vector.broadcast %cst_161 : f32 to vector<2x10x14xf32>
    %492 = arith.mulf %491, %481 : vector<2x10x14xf32>
    %493 = arith.addf %480, %492 : vector<2x10x14xf32>
    %494 = vector.extract_strided_slice %450 {offsets = [0, 0, 0], sizes = [2, 10, 14], strides = [1, 1, 1]} : vector<2x12x14xf32> to vector<2x10x14xf32>
    %cst_162 = arith.constant 0.0139956679 : f32
    %495 = vector.broadcast %cst_162 : f32 to vector<2x10x14xf32>
    %496 = arith.mulf %495, %494 : vector<2x10x14xf32>
    %497 = arith.addf %484, %496 : vector<2x10x14xf32>
    %cst_163 = arith.constant -0.228252515 : f32
    %498 = vector.broadcast %cst_163 : f32 to vector<2x10x14xf32>
    %499 = arith.mulf %498, %494 : vector<2x10x14xf32>
    %500 = arith.addf %487, %499 : vector<2x10x14xf32>
    %cst_164 = arith.constant -0.0420958176 : f32
    %501 = vector.broadcast %cst_164 : f32 to vector<2x10x14xf32>
    %502 = arith.mulf %501, %494 : vector<2x10x14xf32>
    %503 = arith.addf %490, %502 : vector<2x10x14xf32>
    %cst_165 = arith.constant 0.163872585 : f32
    %504 = vector.broadcast %cst_165 : f32 to vector<2x10x14xf32>
    %505 = arith.mulf %504, %494 : vector<2x10x14xf32>
    %506 = arith.addf %493, %505 : vector<2x10x14xf32>
    %507 = vector.extract_strided_slice %450 {offsets = [0, 1, 0], sizes = [2, 10, 14], strides = [1, 1, 1]} : vector<2x12x14xf32> to vector<2x10x14xf32>
    %cst_166 = arith.constant 0.108163491 : f32
    %508 = vector.broadcast %cst_166 : f32 to vector<2x10x14xf32>
    %509 = arith.mulf %508, %507 : vector<2x10x14xf32>
    %510 = arith.addf %497, %509 : vector<2x10x14xf32>
    %cst_167 = arith.constant 0.205649331 : f32
    %511 = vector.broadcast %cst_167 : f32 to vector<2x10x14xf32>
    %512 = arith.mulf %511, %507 : vector<2x10x14xf32>
    %513 = arith.addf %500, %512 : vector<2x10x14xf32>
    %cst_168 = arith.constant 0.144674197 : f32
    %514 = vector.broadcast %cst_168 : f32 to vector<2x10x14xf32>
    %515 = arith.mulf %514, %507 : vector<2x10x14xf32>
    %516 = arith.addf %503, %515 : vector<2x10x14xf32>
    %cst_169 = arith.constant 0.149456605 : f32
    %517 = vector.broadcast %cst_169 : f32 to vector<2x10x14xf32>
    %518 = arith.mulf %517, %507 : vector<2x10x14xf32>
    %519 = arith.addf %506, %518 : vector<2x10x14xf32>
    %520 = vector.extract_strided_slice %450 {offsets = [0, 2, 0], sizes = [2, 10, 14], strides = [1, 1, 1]} : vector<2x12x14xf32> to vector<2x10x14xf32>
    %cst_170 = arith.constant -0.0927323997 : f32
    %521 = vector.broadcast %cst_170 : f32 to vector<2x10x14xf32>
    %522 = arith.mulf %521, %520 : vector<2x10x14xf32>
    %523 = arith.addf %510, %522 : vector<2x10x14xf32>
    %cst_171 = arith.constant 0.1075771 : f32
    %524 = vector.broadcast %cst_171 : f32 to vector<2x10x14xf32>
    %525 = arith.mulf %524, %520 : vector<2x10x14xf32>
    %526 = arith.addf %513, %525 : vector<2x10x14xf32>
    %cst_172 = arith.constant 0.0293422434 : f32
    %527 = vector.broadcast %cst_172 : f32 to vector<2x10x14xf32>
    %528 = arith.mulf %527, %520 : vector<2x10x14xf32>
    %529 = arith.addf %516, %528 : vector<2x10x14xf32>
    %cst_173 = arith.constant 0.259755671 : f32
    %530 = vector.broadcast %cst_173 : f32 to vector<2x10x14xf32>
    %531 = arith.mulf %530, %520 : vector<2x10x14xf32>
    %532 = arith.addf %519, %531 : vector<2x10x14xf32>
    %533 = vector.extract_strided_slice %454 {offsets = [0, 0, 0], sizes = [2, 10, 14], strides = [1, 1, 1]} : vector<2x12x14xf32> to vector<2x10x14xf32>
    %cst_174 = arith.constant 0.141878217 : f32
    %534 = vector.broadcast %cst_174 : f32 to vector<2x10x14xf32>
    %535 = arith.mulf %534, %533 : vector<2x10x14xf32>
    %536 = arith.addf %523, %535 : vector<2x10x14xf32>
    %cst_175 = arith.constant -0.117616333 : f32
    %537 = vector.broadcast %cst_175 : f32 to vector<2x10x14xf32>
    %538 = arith.mulf %537, %533 : vector<2x10x14xf32>
    %539 = arith.addf %526, %538 : vector<2x10x14xf32>
    %cst_176 = arith.constant -0.0327161402 : f32
    %540 = vector.broadcast %cst_176 : f32 to vector<2x10x14xf32>
    %541 = arith.mulf %540, %533 : vector<2x10x14xf32>
    %542 = arith.addf %529, %541 : vector<2x10x14xf32>
    %cst_177 = arith.constant -0.0556730255 : f32
    %543 = vector.broadcast %cst_177 : f32 to vector<2x10x14xf32>
    %544 = arith.mulf %543, %533 : vector<2x10x14xf32>
    %545 = arith.addf %532, %544 : vector<2x10x14xf32>
    %546 = vector.extract_strided_slice %454 {offsets = [0, 1, 0], sizes = [2, 10, 14], strides = [1, 1, 1]} : vector<2x12x14xf32> to vector<2x10x14xf32>
    %cst_178 = arith.constant 0.107525207 : f32
    %547 = vector.broadcast %cst_178 : f32 to vector<2x10x14xf32>
    %548 = arith.mulf %547, %546 : vector<2x10x14xf32>
    %549 = arith.addf %536, %548 : vector<2x10x14xf32>
    %cst_179 = arith.constant -0.0779172256 : f32
    %550 = vector.broadcast %cst_179 : f32 to vector<2x10x14xf32>
    %551 = arith.mulf %550, %546 : vector<2x10x14xf32>
    %552 = arith.addf %539, %551 : vector<2x10x14xf32>
    %cst_180 = arith.constant -0.243226275 : f32
    %553 = vector.broadcast %cst_180 : f32 to vector<2x10x14xf32>
    %554 = arith.mulf %553, %546 : vector<2x10x14xf32>
    %555 = arith.addf %542, %554 : vector<2x10x14xf32>
    %cst_181 = arith.constant -0.231669635 : f32
    %556 = vector.broadcast %cst_181 : f32 to vector<2x10x14xf32>
    %557 = arith.mulf %556, %546 : vector<2x10x14xf32>
    %558 = arith.addf %545, %557 : vector<2x10x14xf32>
    %559 = vector.extract_strided_slice %454 {offsets = [0, 2, 0], sizes = [2, 10, 14], strides = [1, 1, 1]} : vector<2x12x14xf32> to vector<2x10x14xf32>
    %cst_182 = arith.constant -0.14753361 : f32
    %560 = vector.broadcast %cst_182 : f32 to vector<2x10x14xf32>
    %561 = arith.mulf %560, %559 : vector<2x10x14xf32>
    %562 = arith.addf %549, %561 : vector<2x10x14xf32>
    %cst_183 = arith.constant 0.024832245 : f32
    %563 = vector.broadcast %cst_183 : f32 to vector<2x10x14xf32>
    %564 = arith.mulf %563, %559 : vector<2x10x14xf32>
    %565 = arith.addf %552, %564 : vector<2x10x14xf32>
    %cst_184 = arith.constant 0.164648041 : f32
    %566 = vector.broadcast %cst_184 : f32 to vector<2x10x14xf32>
    %567 = arith.mulf %566, %559 : vector<2x10x14xf32>
    %568 = arith.addf %555, %567 : vector<2x10x14xf32>
    %cst_185 = arith.constant -0.0877647101 : f32
    %569 = vector.broadcast %cst_185 : f32 to vector<2x10x14xf32>
    %570 = arith.mulf %569, %559 : vector<2x10x14xf32>
    %571 = arith.addf %558, %570 : vector<2x10x14xf32>
    %572 = vector.extract_strided_slice %458 {offsets = [0, 0, 0], sizes = [2, 10, 14], strides = [1, 1, 1]} : vector<2x12x14xf32> to vector<2x10x14xf32>
    %cst_186 = arith.constant -0.0787006691 : f32
    %573 = vector.broadcast %cst_186 : f32 to vector<2x10x14xf32>
    %574 = arith.mulf %573, %572 : vector<2x10x14xf32>
    %575 = arith.addf %562, %574 : vector<2x10x14xf32>
    %cst_187 = arith.constant -0.0929638594 : f32
    %576 = vector.broadcast %cst_187 : f32 to vector<2x10x14xf32>
    %577 = arith.mulf %576, %572 : vector<2x10x14xf32>
    %578 = arith.addf %565, %577 : vector<2x10x14xf32>
    %cst_188 = arith.constant -0.0191690754 : f32
    %579 = vector.broadcast %cst_188 : f32 to vector<2x10x14xf32>
    %580 = arith.mulf %579, %572 : vector<2x10x14xf32>
    %581 = arith.addf %568, %580 : vector<2x10x14xf32>
    %cst_189 = arith.constant 0.25560838 : f32
    %582 = vector.broadcast %cst_189 : f32 to vector<2x10x14xf32>
    %583 = arith.mulf %582, %572 : vector<2x10x14xf32>
    %584 = arith.addf %571, %583 : vector<2x10x14xf32>
    %585 = vector.extract_strided_slice %458 {offsets = [0, 1, 0], sizes = [2, 10, 14], strides = [1, 1, 1]} : vector<2x12x14xf32> to vector<2x10x14xf32>
    %cst_190 = arith.constant 0.0683554336 : f32
    %586 = vector.broadcast %cst_190 : f32 to vector<2x10x14xf32>
    %587 = arith.mulf %586, %585 : vector<2x10x14xf32>
    %588 = arith.addf %575, %587 : vector<2x10x14xf32>
    %cst_191 = arith.constant -0.280510694 : f32
    %589 = vector.broadcast %cst_191 : f32 to vector<2x10x14xf32>
    %590 = arith.mulf %589, %585 : vector<2x10x14xf32>
    %591 = arith.addf %578, %590 : vector<2x10x14xf32>
    %cst_192 = arith.constant 0.174143136 : f32
    %592 = vector.broadcast %cst_192 : f32 to vector<2x10x14xf32>
    %593 = arith.mulf %592, %585 : vector<2x10x14xf32>
    %594 = arith.addf %581, %593 : vector<2x10x14xf32>
    %cst_193 = arith.constant -0.172630489 : f32
    %595 = vector.broadcast %cst_193 : f32 to vector<2x10x14xf32>
    %596 = arith.mulf %595, %585 : vector<2x10x14xf32>
    %597 = arith.addf %584, %596 : vector<2x10x14xf32>
    %598 = vector.extract_strided_slice %458 {offsets = [0, 2, 0], sizes = [2, 10, 14], strides = [1, 1, 1]} : vector<2x12x14xf32> to vector<2x10x14xf32>
    %cst_194 = arith.constant -0.223956987 : f32
    %599 = vector.broadcast %cst_194 : f32 to vector<2x10x14xf32>
    %600 = arith.mulf %599, %598 : vector<2x10x14xf32>
    %601 = arith.addf %588, %600 : vector<2x10x14xf32>
    %cst_195 = arith.constant -0.14458926 : f32
    %602 = vector.broadcast %cst_195 : f32 to vector<2x10x14xf32>
    %603 = arith.mulf %602, %598 : vector<2x10x14xf32>
    %604 = arith.addf %591, %603 : vector<2x10x14xf32>
    %cst_196 = arith.constant 0.234595895 : f32
    %605 = vector.broadcast %cst_196 : f32 to vector<2x10x14xf32>
    %606 = arith.mulf %605, %598 : vector<2x10x14xf32>
    %607 = arith.addf %594, %606 : vector<2x10x14xf32>
    %cst_197 = arith.constant -0.132446781 : f32
    %608 = vector.broadcast %cst_197 : f32 to vector<2x10x14xf32>
    %609 = arith.mulf %608, %598 : vector<2x10x14xf32>
    %610 = arith.addf %597, %609 : vector<2x10x14xf32>
    %cst_198 = arith.constant 0.164105564 : f32
    %611 = vector.broadcast %cst_198 : f32 to vector<2x10x14xf32>
    %612 = arith.addf %601, %611 : vector<2x10x14xf32>
    %cst_199 = arith.constant 0.000000e+00 : f32
    %613 = vector.broadcast %cst_199 : f32 to vector<2x10x14xf32>
    %614 = arith.maximumf %612, %613 : vector<2x10x14xf32>
    %cst_200 = arith.constant 0.182622507 : f32
    %615 = vector.broadcast %cst_200 : f32 to vector<2x10x14xf32>
    %616 = arith.addf %604, %615 : vector<2x10x14xf32>
    %cst_201 = arith.constant 0.000000e+00 : f32
    %617 = vector.broadcast %cst_201 : f32 to vector<2x10x14xf32>
    %618 = arith.maximumf %616, %617 : vector<2x10x14xf32>
    %cst_202 = arith.constant 0.237196267 : f32
    %619 = vector.broadcast %cst_202 : f32 to vector<2x10x14xf32>
    %620 = arith.addf %607, %619 : vector<2x10x14xf32>
    %cst_203 = arith.constant 0.000000e+00 : f32
    %621 = vector.broadcast %cst_203 : f32 to vector<2x10x14xf32>
    %622 = arith.maximumf %620, %621 : vector<2x10x14xf32>
    %cst_204 = arith.constant 0.128739715 : f32
    %623 = vector.broadcast %cst_204 : f32 to vector<2x10x14xf32>
    %624 = arith.addf %610, %623 : vector<2x10x14xf32>
    %cst_205 = arith.constant 0.000000e+00 : f32
    %625 = vector.broadcast %cst_205 : f32 to vector<2x10x14xf32>
    %626 = arith.maximumf %624, %625 : vector<2x10x14xf32>
    %627 = vector.extract_strided_slice %614 {offsets = [0, 0, 0], sizes = [2, 8, 12], strides = [1, 1, 1]} : vector<2x10x14xf32> to vector<2x8x12xf32>
    %cst_206 = arith.constant -0.107961461 : f32
    %628 = vector.broadcast %cst_206 : f32 to vector<2x8x12xf32>
    %629 = arith.mulf %628, %627 : vector<2x8x12xf32>
    %630 = vector.extract_strided_slice %614 {offsets = [0, 0, 1], sizes = [2, 8, 12], strides = [1, 1, 1]} : vector<2x10x14xf32> to vector<2x8x12xf32>
    %cst_207 = arith.constant 0.0796796083 : f32
    %631 = vector.broadcast %cst_207 : f32 to vector<2x8x12xf32>
    %632 = arith.mulf %631, %630 : vector<2x8x12xf32>
    %633 = arith.addf %629, %632 : vector<2x8x12xf32>
    %634 = vector.extract_strided_slice %614 {offsets = [0, 0, 2], sizes = [2, 8, 12], strides = [1, 1, 1]} : vector<2x10x14xf32> to vector<2x8x12xf32>
    %cst_208 = arith.constant -0.0600863323 : f32
    %635 = vector.broadcast %cst_208 : f32 to vector<2x8x12xf32>
    %636 = arith.mulf %635, %634 : vector<2x8x12xf32>
    %637 = arith.addf %633, %636 : vector<2x8x12xf32>
    %638 = vector.extract_strided_slice %614 {offsets = [0, 1, 0], sizes = [2, 8, 12], strides = [1, 1, 1]} : vector<2x10x14xf32> to vector<2x8x12xf32>
    %cst_209 = arith.constant -0.0260067396 : f32
    %639 = vector.broadcast %cst_209 : f32 to vector<2x8x12xf32>
    %640 = arith.mulf %639, %638 : vector<2x8x12xf32>
    %641 = arith.addf %637, %640 : vector<2x8x12xf32>
    %642 = vector.extract_strided_slice %614 {offsets = [0, 1, 1], sizes = [2, 8, 12], strides = [1, 1, 1]} : vector<2x10x14xf32> to vector<2x8x12xf32>
    %cst_210 = arith.constant -0.121326849 : f32
    %643 = vector.broadcast %cst_210 : f32 to vector<2x8x12xf32>
    %644 = arith.mulf %643, %642 : vector<2x8x12xf32>
    %645 = arith.addf %641, %644 : vector<2x8x12xf32>
    %646 = vector.extract_strided_slice %614 {offsets = [0, 1, 2], sizes = [2, 8, 12], strides = [1, 1, 1]} : vector<2x10x14xf32> to vector<2x8x12xf32>
    %cst_211 = arith.constant 0.115704656 : f32
    %647 = vector.broadcast %cst_211 : f32 to vector<2x8x12xf32>
    %648 = arith.mulf %647, %646 : vector<2x8x12xf32>
    %649 = arith.addf %645, %648 : vector<2x8x12xf32>
    %650 = vector.extract_strided_slice %614 {offsets = [0, 2, 0], sizes = [2, 8, 12], strides = [1, 1, 1]} : vector<2x10x14xf32> to vector<2x8x12xf32>
    %cst_212 = arith.constant -0.0431112871 : f32
    %651 = vector.broadcast %cst_212 : f32 to vector<2x8x12xf32>
    %652 = arith.mulf %651, %650 : vector<2x8x12xf32>
    %653 = arith.addf %649, %652 : vector<2x8x12xf32>
    %654 = vector.extract_strided_slice %614 {offsets = [0, 2, 1], sizes = [2, 8, 12], strides = [1, 1, 1]} : vector<2x10x14xf32> to vector<2x8x12xf32>
    %cst_213 = arith.constant -0.0790946483 : f32
    %655 = vector.broadcast %cst_213 : f32 to vector<2x8x12xf32>
    %656 = arith.mulf %655, %654 : vector<2x8x12xf32>
    %657 = arith.addf %653, %656 : vector<2x8x12xf32>
    %658 = vector.extract_strided_slice %614 {offsets = [0, 2, 2], sizes = [2, 8, 12], strides = [1, 1, 1]} : vector<2x10x14xf32> to vector<2x8x12xf32>
    %cst_214 = arith.constant -0.151825309 : f32
    %659 = vector.broadcast %cst_214 : f32 to vector<2x8x12xf32>
    %660 = arith.mulf %659, %658 : vector<2x8x12xf32>
    %661 = arith.addf %657, %660 : vector<2x8x12xf32>
    %662 = vector.extract_strided_slice %618 {offsets = [0, 0, 0], sizes = [2, 8, 12], strides = [1, 1, 1]} : vector<2x10x14xf32> to vector<2x8x12xf32>
    %cst_215 = arith.constant 0.0976862534 : f32
    %663 = vector.broadcast %cst_215 : f32 to vector<2x8x12xf32>
    %664 = arith.mulf %663, %662 : vector<2x8x12xf32>
    %665 = arith.addf %661, %664 : vector<2x8x12xf32>
    %666 = vector.extract_strided_slice %618 {offsets = [0, 0, 1], sizes = [2, 8, 12], strides = [1, 1, 1]} : vector<2x10x14xf32> to vector<2x8x12xf32>
    %cst_216 = arith.constant -0.0291983299 : f32
    %667 = vector.broadcast %cst_216 : f32 to vector<2x8x12xf32>
    %668 = arith.mulf %667, %666 : vector<2x8x12xf32>
    %669 = arith.addf %665, %668 : vector<2x8x12xf32>
    %670 = vector.extract_strided_slice %618 {offsets = [0, 0, 2], sizes = [2, 8, 12], strides = [1, 1, 1]} : vector<2x10x14xf32> to vector<2x8x12xf32>
    %cst_217 = arith.constant 0.0576363802 : f32
    %671 = vector.broadcast %cst_217 : f32 to vector<2x8x12xf32>
    %672 = arith.mulf %671, %670 : vector<2x8x12xf32>
    %673 = arith.addf %669, %672 : vector<2x8x12xf32>
    %674 = vector.extract_strided_slice %618 {offsets = [0, 1, 0], sizes = [2, 8, 12], strides = [1, 1, 1]} : vector<2x10x14xf32> to vector<2x8x12xf32>
    %cst_218 = arith.constant -0.0146007538 : f32
    %675 = vector.broadcast %cst_218 : f32 to vector<2x8x12xf32>
    %676 = arith.mulf %675, %674 : vector<2x8x12xf32>
    %677 = arith.addf %673, %676 : vector<2x8x12xf32>
    %678 = vector.extract_strided_slice %618 {offsets = [0, 1, 1], sizes = [2, 8, 12], strides = [1, 1, 1]} : vector<2x10x14xf32> to vector<2x8x12xf32>
    %cst_219 = arith.constant 0.146512672 : f32
    %679 = vector.broadcast %cst_219 : f32 to vector<2x8x12xf32>
    %680 = arith.mulf %679, %678 : vector<2x8x12xf32>
    %681 = arith.addf %677, %680 : vector<2x8x12xf32>
    %682 = vector.extract_strided_slice %618 {offsets = [0, 1, 2], sizes = [2, 8, 12], strides = [1, 1, 1]} : vector<2x10x14xf32> to vector<2x8x12xf32>
    %cst_220 = arith.constant -0.151660725 : f32
    %683 = vector.broadcast %cst_220 : f32 to vector<2x8x12xf32>
    %684 = arith.mulf %683, %682 : vector<2x8x12xf32>
    %685 = arith.addf %681, %684 : vector<2x8x12xf32>
    %686 = vector.extract_strided_slice %618 {offsets = [0, 2, 0], sizes = [2, 8, 12], strides = [1, 1, 1]} : vector<2x10x14xf32> to vector<2x8x12xf32>
    %cst_221 = arith.constant 0.0490892343 : f32
    %687 = vector.broadcast %cst_221 : f32 to vector<2x8x12xf32>
    %688 = arith.mulf %687, %686 : vector<2x8x12xf32>
    %689 = arith.addf %685, %688 : vector<2x8x12xf32>
    %690 = vector.extract_strided_slice %618 {offsets = [0, 2, 1], sizes = [2, 8, 12], strides = [1, 1, 1]} : vector<2x10x14xf32> to vector<2x8x12xf32>
    %cst_222 = arith.constant 0.154583573 : f32
    %691 = vector.broadcast %cst_222 : f32 to vector<2x8x12xf32>
    %692 = arith.mulf %691, %690 : vector<2x8x12xf32>
    %693 = arith.addf %689, %692 : vector<2x8x12xf32>
    %694 = vector.extract_strided_slice %618 {offsets = [0, 2, 2], sizes = [2, 8, 12], strides = [1, 1, 1]} : vector<2x10x14xf32> to vector<2x8x12xf32>
    %cst_223 = arith.constant 0.0469395332 : f32
    %695 = vector.broadcast %cst_223 : f32 to vector<2x8x12xf32>
    %696 = arith.mulf %695, %694 : vector<2x8x12xf32>
    %697 = arith.addf %693, %696 : vector<2x8x12xf32>
    %698 = vector.extract_strided_slice %622 {offsets = [0, 0, 0], sizes = [2, 8, 12], strides = [1, 1, 1]} : vector<2x10x14xf32> to vector<2x8x12xf32>
    %cst_224 = arith.constant -0.163461491 : f32
    %699 = vector.broadcast %cst_224 : f32 to vector<2x8x12xf32>
    %700 = arith.mulf %699, %698 : vector<2x8x12xf32>
    %701 = arith.addf %697, %700 : vector<2x8x12xf32>
    %702 = vector.extract_strided_slice %622 {offsets = [0, 0, 1], sizes = [2, 8, 12], strides = [1, 1, 1]} : vector<2x10x14xf32> to vector<2x8x12xf32>
    %cst_225 = arith.constant 0.0558813438 : f32
    %703 = vector.broadcast %cst_225 : f32 to vector<2x8x12xf32>
    %704 = arith.mulf %703, %702 : vector<2x8x12xf32>
    %705 = arith.addf %701, %704 : vector<2x8x12xf32>
    %706 = vector.extract_strided_slice %622 {offsets = [0, 0, 2], sizes = [2, 8, 12], strides = [1, 1, 1]} : vector<2x10x14xf32> to vector<2x8x12xf32>
    %cst_226 = arith.constant 0.125629947 : f32
    %707 = vector.broadcast %cst_226 : f32 to vector<2x8x12xf32>
    %708 = arith.mulf %707, %706 : vector<2x8x12xf32>
    %709 = arith.addf %705, %708 : vector<2x8x12xf32>
    %710 = vector.extract_strided_slice %622 {offsets = [0, 1, 0], sizes = [2, 8, 12], strides = [1, 1, 1]} : vector<2x10x14xf32> to vector<2x8x12xf32>
    %cst_227 = arith.constant -0.0305099487 : f32
    %711 = vector.broadcast %cst_227 : f32 to vector<2x8x12xf32>
    %712 = arith.mulf %711, %710 : vector<2x8x12xf32>
    %713 = arith.addf %709, %712 : vector<2x8x12xf32>
    %714 = vector.extract_strided_slice %622 {offsets = [0, 1, 1], sizes = [2, 8, 12], strides = [1, 1, 1]} : vector<2x10x14xf32> to vector<2x8x12xf32>
    %cst_228 = arith.constant 0.0376510248 : f32
    %715 = vector.broadcast %cst_228 : f32 to vector<2x8x12xf32>
    %716 = arith.mulf %715, %714 : vector<2x8x12xf32>
    %717 = arith.addf %713, %716 : vector<2x8x12xf32>
    %718 = vector.extract_strided_slice %622 {offsets = [0, 1, 2], sizes = [2, 8, 12], strides = [1, 1, 1]} : vector<2x10x14xf32> to vector<2x8x12xf32>
    %cst_229 = arith.constant 0.0471490249 : f32
    %719 = vector.broadcast %cst_229 : f32 to vector<2x8x12xf32>
    %720 = arith.mulf %719, %718 : vector<2x8x12xf32>
    %721 = arith.addf %717, %720 : vector<2x8x12xf32>
    %722 = vector.extract_strided_slice %622 {offsets = [0, 2, 0], sizes = [2, 8, 12], strides = [1, 1, 1]} : vector<2x10x14xf32> to vector<2x8x12xf32>
    %cst_230 = arith.constant -0.00682810973 : f32
    %723 = vector.broadcast %cst_230 : f32 to vector<2x8x12xf32>
    %724 = arith.mulf %723, %722 : vector<2x8x12xf32>
    %725 = arith.addf %721, %724 : vector<2x8x12xf32>
    %726 = vector.extract_strided_slice %622 {offsets = [0, 2, 1], sizes = [2, 8, 12], strides = [1, 1, 1]} : vector<2x10x14xf32> to vector<2x8x12xf32>
    %cst_231 = arith.constant 0.0615129098 : f32
    %727 = vector.broadcast %cst_231 : f32 to vector<2x8x12xf32>
    %728 = arith.mulf %727, %726 : vector<2x8x12xf32>
    %729 = arith.addf %725, %728 : vector<2x8x12xf32>
    %730 = vector.extract_strided_slice %622 {offsets = [0, 2, 2], sizes = [2, 8, 12], strides = [1, 1, 1]} : vector<2x10x14xf32> to vector<2x8x12xf32>
    %cst_232 = arith.constant 0.137252018 : f32
    %731 = vector.broadcast %cst_232 : f32 to vector<2x8x12xf32>
    %732 = arith.mulf %731, %730 : vector<2x8x12xf32>
    %733 = arith.addf %729, %732 : vector<2x8x12xf32>
    %734 = vector.extract_strided_slice %626 {offsets = [0, 0, 0], sizes = [2, 8, 12], strides = [1, 1, 1]} : vector<2x10x14xf32> to vector<2x8x12xf32>
    %cst_233 = arith.constant 0.0170941353 : f32
    %735 = vector.broadcast %cst_233 : f32 to vector<2x8x12xf32>
    %736 = arith.mulf %735, %734 : vector<2x8x12xf32>
    %737 = arith.addf %733, %736 : vector<2x8x12xf32>
    %738 = vector.extract_strided_slice %626 {offsets = [0, 0, 1], sizes = [2, 8, 12], strides = [1, 1, 1]} : vector<2x10x14xf32> to vector<2x8x12xf32>
    %cst_234 = arith.constant -0.132845446 : f32
    %739 = vector.broadcast %cst_234 : f32 to vector<2x8x12xf32>
    %740 = arith.mulf %739, %738 : vector<2x8x12xf32>
    %741 = arith.addf %737, %740 : vector<2x8x12xf32>
    %742 = vector.extract_strided_slice %626 {offsets = [0, 0, 2], sizes = [2, 8, 12], strides = [1, 1, 1]} : vector<2x10x14xf32> to vector<2x8x12xf32>
    %cst_235 = arith.constant -0.0964807719 : f32
    %743 = vector.broadcast %cst_235 : f32 to vector<2x8x12xf32>
    %744 = arith.mulf %743, %742 : vector<2x8x12xf32>
    %745 = arith.addf %741, %744 : vector<2x8x12xf32>
    %746 = vector.extract_strided_slice %626 {offsets = [0, 1, 0], sizes = [2, 8, 12], strides = [1, 1, 1]} : vector<2x10x14xf32> to vector<2x8x12xf32>
    %cst_236 = arith.constant -1.506170e-01 : f32
    %747 = vector.broadcast %cst_236 : f32 to vector<2x8x12xf32>
    %748 = arith.mulf %747, %746 : vector<2x8x12xf32>
    %749 = arith.addf %745, %748 : vector<2x8x12xf32>
    %750 = vector.extract_strided_slice %626 {offsets = [0, 1, 1], sizes = [2, 8, 12], strides = [1, 1, 1]} : vector<2x10x14xf32> to vector<2x8x12xf32>
    %cst_237 = arith.constant 0.121388838 : f32
    %751 = vector.broadcast %cst_237 : f32 to vector<2x8x12xf32>
    %752 = arith.mulf %751, %750 : vector<2x8x12xf32>
    %753 = arith.addf %749, %752 : vector<2x8x12xf32>
    %754 = vector.extract_strided_slice %626 {offsets = [0, 1, 2], sizes = [2, 8, 12], strides = [1, 1, 1]} : vector<2x10x14xf32> to vector<2x8x12xf32>
    %cst_238 = arith.constant 0.0849578828 : f32
    %755 = vector.broadcast %cst_238 : f32 to vector<2x8x12xf32>
    %756 = arith.mulf %755, %754 : vector<2x8x12xf32>
    %757 = arith.addf %753, %756 : vector<2x8x12xf32>
    %758 = vector.extract_strided_slice %626 {offsets = [0, 2, 0], sizes = [2, 8, 12], strides = [1, 1, 1]} : vector<2x10x14xf32> to vector<2x8x12xf32>
    %cst_239 = arith.constant 0.155546546 : f32
    %759 = vector.broadcast %cst_239 : f32 to vector<2x8x12xf32>
    %760 = arith.mulf %759, %758 : vector<2x8x12xf32>
    %761 = arith.addf %757, %760 : vector<2x8x12xf32>
    %762 = vector.extract_strided_slice %626 {offsets = [0, 2, 1], sizes = [2, 8, 12], strides = [1, 1, 1]} : vector<2x10x14xf32> to vector<2x8x12xf32>
    %cst_240 = arith.constant -0.11738845 : f32
    %763 = vector.broadcast %cst_240 : f32 to vector<2x8x12xf32>
    %764 = arith.mulf %763, %762 : vector<2x8x12xf32>
    %765 = arith.addf %761, %764 : vector<2x8x12xf32>
    %766 = vector.extract_strided_slice %626 {offsets = [0, 2, 2], sizes = [2, 8, 12], strides = [1, 1, 1]} : vector<2x10x14xf32> to vector<2x8x12xf32>
    %cst_241 = arith.constant -0.111051127 : f32
    %767 = vector.broadcast %cst_241 : f32 to vector<2x8x12xf32>
    %768 = arith.mulf %767, %766 : vector<2x8x12xf32>
    %769 = arith.addf %765, %768 : vector<2x8x12xf32>
    %cst_242 = arith.constant -0.158542275 : f32
    %770 = vector.broadcast %cst_242 : f32 to vector<2x8x12xf32>
    %771 = arith.addf %769, %770 : vector<2x8x12xf32>
    %772 = vector.extract_strided_slice %407 {offsets = [0, 0, 0], sizes = [2, 12, 1], strides = [1, 1, 1]} : vector<2x12x8xf32> to vector<2x12x1xf32>
    %773 = vector.extract_strided_slice %407 {offsets = [0, 0, 0], sizes = [2, 12, 3], strides = [1, 1, 1]} : vector<2x12x8xf32> to vector<2x12x3xf32>
    %774 = vector.extract_strided_slice %407 {offsets = [0, 0, 2], sizes = [2, 12, 3], strides = [1, 1, 1]} : vector<2x12x8xf32> to vector<2x12x3xf32>
    %775 = vector.extract_strided_slice %407 {offsets = [0, 0, 4], sizes = [2, 12, 3], strides = [1, 1, 1]} : vector<2x12x8xf32> to vector<2x12x3xf32>
    %776 = vector.extract_strided_slice %407 {offsets = [0, 0, 6], sizes = [2, 12, 2], strides = [1, 1, 1]} : vector<2x12x8xf32> to vector<2x12x2xf32>
    %777 = tpu.concatenate %772, %773, %774, %775, %776 in 2 : vector<2x12x1xf32>, vector<2x12x3xf32>, vector<2x12x3xf32>, vector<2x12x3xf32>, vector<2x12x2xf32> -> vector<2x12x12xf32>
    %778 = vector.extract_strided_slice %771 {offsets = [0, 0, 0], sizes = [2, 1, 12], strides = [1, 1, 1]} : vector<2x8x12xf32> to vector<2x1x12xf32>
    %779 = vector.extract_strided_slice %771 {offsets = [0, 0, 0], sizes = [2, 3, 12], strides = [1, 1, 1]} : vector<2x8x12xf32> to vector<2x3x12xf32>
    %780 = vector.extract_strided_slice %771 {offsets = [0, 2, 0], sizes = [2, 3, 12], strides = [1, 1, 1]} : vector<2x8x12xf32> to vector<2x3x12xf32>
    %781 = vector.extract_strided_slice %771 {offsets = [0, 4, 0], sizes = [2, 3, 12], strides = [1, 1, 1]} : vector<2x8x12xf32> to vector<2x3x12xf32>
    %782 = vector.extract_strided_slice %771 {offsets = [0, 6, 0], sizes = [2, 2, 12], strides = [1, 1, 1]} : vector<2x8x12xf32> to vector<2x2x12xf32>
    %783 = tpu.concatenate %778, %779, %780, %781, %782 in 1 : vector<2x1x12xf32>, vector<2x3x12xf32>, vector<2x3x12xf32>, vector<2x3x12xf32>, vector<2x2x12xf32> -> vector<2x12x12xf32>
    %c0_243 = arith.constant 0 : index
    %c0_244 = arith.constant 0 : index
    %c0_245 = arith.constant 0 : index
    %c0_246 = arith.constant 0 : index
    %784 = vector.load %arg1[%c0_243, %c0_244, %c0_245, %c0_246] : memref<2x2x12x12xf32, #tpu.memory_space<vmem>>, vector<2x1x12x12xf32>
    %785 = vector.shape_cast %784 : vector<2x1x12x12xf32> to vector<2x12x12xf32>
    %786 = vector.shape_cast %777 : vector<2x12x12xf32> to vector<2x1x12x12xf32>
    tpu.vector_store %arg1[%c0_243, %c0_244, %c0_245, %c0_246], %786 {strides = array<i32>} : memref<2x2x12x12xf32, #tpu.memory_space<vmem>>, vector<2x1x12x12xf32>,
    %c0_247 = arith.constant 0 : index
    %c1 = arith.constant 1 : index
    %c0_248 = arith.constant 0 : index
    %c0_249 = arith.constant 0 : index
    %787 = vector.load %arg1[%c0_247, %c1, %c0_248, %c0_249] : memref<2x2x12x12xf32, #tpu.memory_space<vmem>>, vector<2x1x12x12xf32>
    %788 = vector.shape_cast %787 : vector<2x1x12x12xf32> to vector<2x12x12xf32>
    %789 = vector.shape_cast %783 : vector<2x12x12xf32> to vector<2x1x12x12xf32>
    tpu.vector_store %arg1[%c0_247, %c1, %c0_248, %c0_249], %789 {strides = array<i32>} : memref<2x2x12x12xf32, #tpu.memory_space<vmem>>, vector<2x1x12x12xf32>,
    return
  }
}

</mosaic_0001>

<bundles_post_ra>
// kernel: tpu_custom_call.1
= control target key start
LH: loop header
LB: loop body
LE: loop exit
PB: predicated region body
PF: predicated region fallthrough
CT: control target
= control target key end

     0   :  { %8 = vsyncpa [#allocation3], 0  ;;  %s4128_s9 = smov [#allocation2]   ;;  %s7323_s0 = inlined_call_operand.hbm [shape: f32[2,1,16,16], index: 0, kind: input, shape index: {}]   ;;  %s7324_s1 = inlined_call_operand.vmem [shape: f32[2,2,12,12], index: 1, kind: output, shape index: {0}]   ;;  %s7325_s2 = inlined_call_operand.vmem [shape: f32[2,1,14,14], index: 2, kind: output, shape index: {1}]  }
   0x1   :  { %s14_s10 = sshll.u32 %s4128_s9, 4  ;;  %s15_s10 = int_to_ptr.vmem [resolvable:$true] %s14_s10 }
   0x2   :  { %s4114_s11 = scalar_lea.vmem %s15_s10, 512  ;;  %p4119_p1 = scmp.lt.s32.totalorder %s15_s10, %s15_s10 }
   0x3   :  { %p4115_p0 = scmp.ne.s32.totalorder %s15_s10, %s4114_s11  ;;  %p4120_p2 = scmp.lt.s32.totalorder %s4114_s11, %s4114_s11 }
   0x5   :  { %p4121_p3 = por %p4120_p2, %p4119_p1 }
   0x7   :  { %p4122_p4 = pnand %p4121_p3, %p4115_p0 }
   0x9   :  { %4125 = shalt.err (!%p4122_p4)
}
   0xa   :  { %s4129_s12 = smov 128   ;;  %s4130_s13 = smov 8  }
   0xb   :  { %20 = dma.hbm_to_vmem [thread:$0]  %s7323_s0, 512, %s15_s10, [#allocation3], %s4129_s12, %s4129_s12, %s4130_s13  }
   0xc   :  { %4126 = dma.done.wait [#allocation3], 512  }
   0xd   :  { %4127 = vsyncadd [#allocation3], 4294966784  ;;  %v4155_v0 = vld [vmem:[#allocation2 + $0x10] sm:$0xff]  ;;  %v4157_v1 = vld [vmem:[#allocation2] sm:$0xff]  ;;  %s4131_s16 = smov 127   ;;  %s4132_s0 = smov 126  }
   0xe   :  { %v4159_v2 = vld [vmem:[#allocation2 + $0x18] sm:$0xff]  ;;  %v34_v3 = vmul.f32 -0.07903179, %v4155_v0  ;;  %v32_v4 = vmul.f32 -0.07903179, %v4157_v1  ;;  %v4163_v5 = vld [vmem:[#allocation2 + $0x8] sm:$0xff] }
   0xf   :  { %v35_v6 = vmul.f32 -0.07903179, %v4159_v2  ;;  %v33_v7 = vmul.f32 -0.07903179, %v4163_v5  ;;  %v57_v8 = vmul.f32 -0.2129039, %v4163_v5 }
  0x10   :  { %44 = vrot.lane.b32.xlu1 %v34_v3, %s4131_s16  ;;  %40 = vrot.lane.b32.xlu0 %v32_v4, %s4131_s16  ;;  %v56_v9 = vmul.f32 -0.2129039, %v4157_v1  ;;  %v104_v10 = vmul.f32 -0.18468642, %v4163_v5  ;;  %v103_v11 = vmul.f32 -0.18468642, %v4157_v1 }
  0x11   :  { %v106_v12 = vmul.f32 -0.18468642, %v4159_v2  ;;  %v105_v13 = vmul.f32 -0.18468642, %v4155_v0  ;;  %v134_v14 = vmul.f32 -0.08705282, %v4163_v5 }
  0x12   :  { %v59_v15 = vmul.f32 -0.2129039, %v4159_v2  ;;  %v58_v16 = vmul.f32 -0.2129039, %v4155_v0  ;;  %v112_v17 = vrot.slane %v104_v10, 1  ;;  %v111_v18 = vrot.slane %v103_v11, 1 }
  0x13   :  { %vm88_vm0 = vcmask 1046528   ;;  %v133_v19 = vmul.f32 -0.08705282, %v4157_v1  ;;  %vm171_vm1 = vcmask 1045504   ;;  %v115_v20 = vrot.slane %v106_v12, 1  ;;  %s4134_s25 = smov 2  }
  0x14   :  { %46 = vrot.lane.b32.xlu1 %v35_v6, %s4131_s16  ;;  %42 = vrot.lane.b32.xlu0 %v33_v7, %s4131_s16  ;;  %v114_v21 = vrot.slane %v105_v13, 1  ;;  %v142_v22 = vrot.slane %v134_v14, 1  ;;  %v136_v23 = vmul.f32 -0.08705282, %v4159_v2  ;;  %v4187_v24 = vmul.f32 -0.22942631, %v4163_v5 }
  0x15   :  { %v80_v25 = vmul.f32 -0.22942631, %v4157_v1  ;;  %v4191_v26 = vmul.f32 -0.22942631, %v4159_v2  ;;  %v113_v27 = vsel %vm88_vm0, %v111_v18, %v112_v17  ;;  %v82_v28 = vmul.f32 -0.22942631, %v4155_v0 }
  0x16   :  { %v4196_v29 = vmul.f32 0.10056456, %v4163_v5  ;;  %v163_v30 = vmul.f32 0.10056456, %v4157_v1  ;;  %v90_v31 = vrot.slane %v4187_v24, 1  ;;  %v141_v39 = vrot.slane %v133_v19, 1 }
  0x17   :  { %v89_v32 = vrot.slane %v80_v25, 1  ;;  %v93_v33 = vrot.slane %v4191_v26, 1  ;;  %v4202_v34 = vmul.f32 0.10056456, %v4159_v2  ;;  %v92_v35 = vrot.slane %v82_v28, 1  ;;  %s4135_s26 = smov 3  }
  0x18   :  { %66 = vrot.lane.b32.xlu1 %v57_v8, %s4132_s0  ;;  %64 = vrot.lane.b32.xlu0 %v56_v9, %s4132_s0  ;;  %v173_v36 = vrot.slane %v4196_v29, 2  ;;  %v172_v37 = vrot.slane %v163_v30, 2  ;;  %v165_v38 = vmul.f32 0.10056456, %v4155_v0  ;;  %v135_v40 = vmul.f32 -0.08705282, %v4155_v0 }
  0x19   :  { %v91_v41 = vsel %vm88_vm0, %v89_v32, %v90_v31  ;;  %v176_v42 = vrot.slane %v4202_v34, 2  ;;  %v116_v43 = vsel %vm88_vm0, %v114_v21, %v115_v20  ;;  %v94_v44 = vsel %vm88_vm0, %v92_v35, %v93_v33  ;;  %s4136_s27 = smov 4  }
  0x1a   :  { %v4220_v45 = vsel %vm171_vm1, %v172_v37, %v173_v36  ;;  %v175_v46 = vrot.slane %v165_v38, 2  ;;  %v145_v48 = vrot.slane %v136_v23, 1  ;;  %v143_v49 = vsel %vm88_vm0, %v141_v39, %v142_v22 }
  0x1b   :  { %v144_v50 = vrot.slane %v135_v40, 1  ;;  %v187_v51 = vmul.f32 -0.013451895, %v4163_v5  ;;  %v186_v52 = vmul.f32 -0.013451895, %v4157_v1  ;;  %vm256_vm2 = vcmask 111616  }
  0x1c   :  { %70 = vrot.lane.b32.xlu1 %v59_v15, %s4132_s0  ;;  %68 = vrot.lane.b32.xlu0 %v58_v16, %s4132_s0  ;;  %v4225_v47 = vsel %vm171_vm1, %v175_v46, %v176_v42  ;;  %v189_v53 = vmul.f32 -0.013451895, %v4159_v2  ;;  %v188_v57 = vmul.f32 -0.013451895, %v4155_v0  ;;  %v217_v58 = vmul.f32 -0.022134703, %v4163_v5 }
  0x1d   :  { %v146_v54 = vsel %vm88_vm0, %v144_v50, %v145_v48  ;;  %v195_v55 = vrot.slane %v187_v51, 2  ;;  %v194_v56 = vrot.slane %v186_v52, 2  ;;  %v216_v62 = vmul.f32 -0.022134703, %v4157_v1 }
  0x1e   :  { %v198_v60 = vrot.slane %v189_v53, 2  ;;  %v197_v61 = vrot.slane %v188_v57, 2  ;;  %v219_v63 = vmul.f32 -0.022134703, %v4159_v2  ;;  %v225_v4 = vrot.slane %v217_v58, 2 }
  0x1f   :  { %v196_v59 = vsel %vm171_vm1, %v194_v56, %v195_v55  ;;  %v224_v6 = vrot.slane %v216_v62, 2  ;;  %v218_v7 = vmul.f32 -0.022134703, %v4155_v0  ;;  %v28_v14 = vmul.f32 0.083441734, %v4157_v1 }
  0x20   :  { %119 = vrot.lane.b32.xlu1 %v112_v17, %s4131_s16  ;;  %117 = vrot.lane.b32.xlu0 %v113_v27, %s4131_s16  ;;  %v199_v3 = vsel %vm171_vm1, %v197_v61, %v198_v60  ;;  %v228_v9 = vrot.slane %v219_v63, 2  ;;  %v30_v17 = vmul.f32 0.083441734, %v4155_v0  ;;  %v29_v37 = vmul.f32 0.083441734, %v4163_v5 }
  0x21   :  { %v226_v8 = vsel %vm171_vm1, %v224_v6, %v225_v4  ;;  %v227_v10 = vrot.slane %v218_v7, 2  ;;  %v31_v39 = vmul.f32 0.083441734, %v4159_v2  ;;  %vm254_vm3 = vcmask 113664  }
  0x22   :  { %vm4062_vm4 = vcmask 1040384   ;;  %vm4065_vm5 = vcmask 1043456   ;;  %vm4070_vm6 = vcmask 1041408   ;;  %vm4075_vm7 = vcmask 93184  }
  0x23   :  { %v229_v11 = vsel %vm171_vm1, %v227_v10, %v228_v9  ;;  %vm4073_vm8 = vcmask 97280   ;;  %vm4024_vm9 = vcmask 7168   ;;  %vm4029_vm10 = vcmask 31744  }
  0x24   :  { %123 = vrot.lane.b32.xlu1 %v115_v20, %s4131_s16  ;;  %121 = vrot.lane.b32.xlu0 %v116_v43, %s4131_s16  ;;  %vm4034_vm11 = vcmask 56320   ;;  %vm4039_vm12 = vcmask 80896  }
  0x28   :  { %149 = vrot.lane.b32.xlu1 %v142_v22, %s4132_s0  ;;  %147 = vrot.lane.b32.xlu0 %v143_v49, %s4132_s0 }
  0x2c   :  { %153 = vrot.lane.b32.xlu1 %v145_v48, %s4132_s0  ;;  %151 = vrot.lane.b32.xlu0 %v146_v54, %s4132_s0 }
  0x30   :  { %202 = vrot.lane.b32.xlu1 %v195_v55, %s4131_s16  ;;  %200 = vrot.lane.b32.xlu0 %v196_v59, %s4131_s16 }
  0x34   :  { %206 = vrot.lane.b32.xlu1 %v198_v60, %s4131_s16  ;;  %204 = vrot.lane.b32.xlu0 %v199_v3, %s4131_s16 }
  0x38   :  { %232 = vrot.lane.b32.xlu1 %v225_v4, %s4132_s0  ;;  %230 = vrot.lane.b32.xlu0 %v226_v8, %s4132_s0 }
  0x3c   :  { %236 = vrot.lane.b32.xlu1 %v228_v9, %s4132_s0  ;;  %234 = vrot.lane.b32.xlu0 %v229_v11, %s4132_s0 }
  0x82   :  { %v45_v12 = vpop.permute.xlu1 %44  ;;  %v41_v13 = vpop.permute.xlu0 %40 }
  0x83   :  { %v52_v18 = vadd.f32 %v41_v13, %v28_v14  ;;  %v54_v22 = vadd.f32 %v45_v12, %v30_v17 }
  0x86   :  { %v47_v15 = vpop.permute.xlu1 %46  ;;  %v43_v16 = vpop.permute.xlu0 %42 }
  0x87   :  { %v53_v40 = vadd.f32 %v43_v16, %v29_v37  ;;  %v55_v50 = vadd.f32 %v47_v15, %v31_v39 }
  0x8a   :  { %v67_v19 = vpop.permute.xlu1 %66  ;;  %v65_v20 = vpop.permute.xlu0 %64 }
  0x8b   :  { %v76_v21 = vadd.f32 %v65_v20, %v52_v18  ;;  %v77_v48 = vadd.f32 %v67_v19, %v53_v40 }
  0x8d   :  { %v99_v23 = vadd.f32 %v91_v41, %v76_v21  ;;  %v100_v5 = vadd.f32 %v90_v31, %v77_v48 }
  0x8e   :  { %v71_v25 = vpop.permute.xlu1 %70  ;;  %v69_v27 = vpop.permute.xlu0 %68 }
  0x8f   :  { %v78_v28 = vadd.f32 %v69_v27, %v54_v22  ;;  %v79_v53 = vadd.f32 %v71_v25, %v55_v50 }
  0x91   :  { %v101_v30 = vadd.f32 %v94_v44, %v78_v28  ;;  %v102_v58 = vadd.f32 %v93_v33, %v79_v53 }
  0x92   :  { %v120_v32 = vpop.permute.xlu1 %119  ;;  %v118_v35 = vpop.permute.xlu0 %117 }
  0x93   :  { %v129_v0 = vadd.f32 %v118_v35, %v99_v23  ;;  %v130_v55 = vadd.f32 %v120_v32, %v100_v5 }
  0x96   :  { %v124_v38 = vpop.permute.xlu1 %123  ;;  %v122_v1 = vpop.permute.xlu0 %121 }
  0x97   :  { %v131_v41 = vadd.f32 %v122_v1, %v101_v30  ;;  %v132_v60 = vadd.f32 %v124_v38, %v102_v58 }
  0x9a   :  { %v150_v43 = vpop.permute.xlu1 %149  ;;  %v148_v46 = vpop.permute.xlu0 %147 }
  0x9b   :  { %v159_v49 = vadd.f32 %v148_v46, %v129_v0  ;;  %v160_v59 = vadd.f32 %v150_v43, %v130_v55 }
  0x9d   :  { %v182_v51 = vadd.f32 %v4220_v45, %v159_v49  ;;  %v183_v63 = vadd.f32 %v173_v36, %v160_v59 }
  0x9e   :  { %v154_v52 = vpop.permute.xlu1 %153  ;;  %v152_v44 = vpop.permute.xlu0 %151 }
  0x9f   :  { %v161_v54 = vadd.f32 %v152_v44, %v131_v41  ;;  %v162_v45 = vadd.f32 %v154_v52, %v132_v60 }
  0xa1   :  { %v184_v2 = vadd.f32 %v4225_v47, %v161_v54  ;;  %v185_v47 = vadd.f32 %v176_v42, %v162_v45 }
  0xa2   :  { %v203_v56 = vpop.permute.xlu1 %202  ;;  %v201_v57 = vpop.permute.xlu0 %200 }
  0xa3   :  { %v213_v3 = vadd.f32 %v203_v56, %v183_v63  ;;  %v212_v24 = vadd.f32 %v201_v57, %v182_v51 }
  0xa6   :  { %v207_v61 = vpop.permute.xlu1 %206  ;;  %v205_v62 = vpop.permute.xlu0 %204 }
  0xa7   :  { %v215_v8 = vadd.f32 %v207_v61, %v185_v47  ;;  %v214_v26 = vadd.f32 %v205_v62, %v184_v2 }
  0xaa   :  { %v233_v31 = vpop.permute.xlu1 %232  ;;  %v231_v4 = vpop.permute.xlu0 %230 }
  0xab   :  { %v243_v6 = vadd.f32 %v233_v31, %v213_v3  ;;  %v242_v7 = vadd.f32 %v231_v4, %v212_v24 }
  0xad   :  { %v247_v33 = vadd.f32 0.14089641, %v243_v6  ;;  %v246_v9 = vadd.f32 0.14089641, %v242_v7 }
  0xae   :  { %v237_v10 = vpop.permute.xlu1 %236  ;;  %v235_v11 = vpop.permute.xlu0 %234 }
  0xaf   :  { %v4269_v12 = vmax.f32 %v247_v33, 0.0  ;;  %v4271_v29 = vmax.f32 %v246_v9, 0.0  ;;  %v245_v36 = vadd.f32 %v237_v10, %v215_v8  ;;  %v244_v13 = vadd.f32 %v235_v11, %v214_v26 }
  0xb1   :  { %257 = vst.msk [vmem:[%s7325_s2 + $0x8] sm:$0x3f] %vm256_vm2, %v4269_v12  ;;  %v249_v34 = vadd.f32 0.14089641, %v245_v36  ;;  %v248_v42 = vadd.f32 0.14089641, %v244_v13 }
  0xb2   :  { %255 = vst.msk [vmem:[%s7325_s2] sm:$0xff] %vm254_vm3, %v4271_v29  ;;  %v277_v14 = vmul.f32 0.38592476, %v4269_v12  ;;  %v276_v15 = vmul.f32 0.38592476, %v4271_v29 }
  0xb3   :  { %v4285_v16 = vmax.f32 %v249_v34, 0.0  ;;  %v4287_v17 = vmax.f32 %v248_v42, 0.0  ;;  %v301_v20 = vmul.f32 -0.018078674, %v4269_v12  ;;  %v300_v21 = vmul.f32 -0.018078674, %v4271_v29 }
  0xb4   :  { %286 = vrot.lane.b32.xlu1 %v277_v14, %s4131_s16  ;;  %284 = vrot.lane.b32.xlu0 %v276_v15, %s4131_s16  ;;  %v325_v25 = vmul.f32 0.35521686, %v4269_v12  ;;  %v324_v27 = vmul.f32 0.35521686, %v4271_v29  ;;  %v349_v28 = vmul.f32 -0.30634278, %v4269_v12 }
  0xb5   :  { %259 = vst.msk [vmem:[%s7325_s2 + $0x18] sm:$0x3f] %vm256_vm2, %v4285_v16  ;;  %v279_v18 = vmul.f32 0.38592476, %v4285_v16  ;;  %v278_v19 = vmul.f32 0.38592476, %v4287_v17 }
  0xb6   :  { %258 = vst.msk [vmem:[%s7325_s2 + $0x10] sm:$0xff] %vm254_vm3, %v4287_v17  ;;  %v303_v22 = vmul.f32 -0.018078674, %v4285_v16  ;;  %v302_v23 = vmul.f32 -0.018078674, %v4287_v17  ;;  %s4133_s2 = smov 1  }
  0xb7   :  { %v327_v30 = vmul.f32 0.35521686, %v4285_v16  ;;  %v326_v32 = vmul.f32 0.35521686, %v4287_v17  ;;  %v348_v35 = vmul.f32 -0.30634278, %v4271_v29 }
  0xb8   :  { %290 = vrot.lane.b32.xlu1 %v279_v18, %s4131_s16  ;;  %288 = vrot.lane.b32.xlu0 %v278_v19, %s4131_s16  ;;  %v2292_v37 = vmul.f32 -0.019444723, %v4271_v29  ;;  %v2296_v38 = vmul.f32 0.053099986, %v4271_v29  ;;  %v2308_v1 = vmul.f32 0.017543761, %v4271_v29 }
  0xb9   :  { %v4325_v39 = vmul.f32 0.017543761, %v4269_v12  ;;  %v2330_v40 = vmul.f32 -0.5228049, %v4271_v29  ;;  %v4329_v0 = vmul.f32 -0.5228049, %v4269_v12 }
  0xba   :  { %v2316_v43 = vrot.slane %v2308_v1, 1  ;;  %v2352_v46 = vmul.f32 -0.4532836, %v4271_v29  ;;  %v4333_v48 = vmul.f32 -0.4532836, %v4269_v12 }
  0xbb   :  { %v2317_v49 = vrot.slane %v4325_v39, 1  ;;  %v2338_v50 = vrot.slane %v2330_v40, 1  ;;  %v7340_v41 = vrot.slane %v4329_v0, 1  ;;  %v2374_v51 = vmul.f32 -0.10031098, %v4271_v29 }
  0xbc   :  { %310 = vrot.lane.b32.xlu1 %v301_v20, %s4131_s16  ;;  %308 = vrot.lane.b32.xlu0 %v300_v21, %s4131_s16  ;;  %v2360_v52 = vrot.slane %v2352_v46, 1  ;;  %v7339_v44 = vrot.slane %v4333_v48, 1  ;;  %v4342_v53 = vmul.f32 -0.10031098, %v4269_v12  ;;  %v2396_v5 = vmul.f32 -0.34003508, %v4271_v29 }
  0xbd   :  { %v351_v54 = vmul.f32 -0.30634278, %v4285_v16  ;;  %v2300_v55 = vmul.f32 -0.20626552, %v4271_v29  ;;  %v2318_v2 = vsel %vm88_vm0, %v2316_v43, %v2317_v49  ;;  %v2340_v56 = vsel %vm88_vm0, %v2338_v50, %v7340_v41 }
  0xbe   :  { %v2304_v57 = vmul.f32 -0.39008293, %v4271_v29  ;;  %v2326_v58 = vadd.f32 %v2318_v2, %v2292_v37  ;;  %v2348_v59 = vadd.f32 %v2340_v56, %v2296_v38  ;;  %v2362_v60 = vsel %vm88_vm0, %v2360_v52, %v7339_v44 }
  0xbf   :  { %v2370_v61 = vadd.f32 %v2362_v60, %v2300_v55  ;;  %v2382_v62 = vrot.slane %v2374_v51, 1  ;;  %v7338_v45 = vrot.slane %v4342_v53, 1  ;;  %v4360_v63 = vmul.f32 -0.34003508, %v4269_v12 }
  0xc0   :  { %314 = vrot.lane.b32.xlu1 %v303_v22, %s4131_s16  ;;  %312 = vrot.lane.b32.xlu0 %v302_v23, %s4131_s16  ;;  %v2404_v3 = vrot.slane %v2396_v5, 2  ;;  %v2418_v24 = vmul.f32 0.2130173, %v4271_v29  ;;  %v4365_v31 = vmul.f32 0.2130173, %v4269_v12 }
  0xc1   :  { %v350_v4 = vmul.f32 -0.30634278, %v4287_v17  ;;  %v2384_v47 = vsel %vm88_vm0, %v2382_v62, %v7338_v45  ;;  %v7337_v6 = vrot.slane %v4360_v63, 2  ;;  %v2440_v7 = vmul.f32 0.424529, %v4271_v29 }
  0xc2   :  { %v2392_v8 = vadd.f32 %v2384_v47, %v2304_v57  ;;  %v2426_v26 = vrot.slane %v2418_v24, 2  ;;  %v7336_v33 = vrot.slane %v4365_v31, 2  ;;  %v4375_v9 = vmul.f32 0.424529, %v4269_v12 }
  0xc3   :  { %v2406_v10 = vsel %vm171_vm1, %v2404_v3, %v7337_v6  ;;  %v2448_v11 = vrot.slane %v2440_v7, 2  ;;  %v2462_v36 = vmul.f32 0.42081738, %v4271_v29  ;;  %v373_v14 = vmul.f32 0.1853266, %v4269_v12 }
  0xc4   :  { %334 = vrot.lane.b32.xlu1 %v325_v25, %s4131_s16  ;;  %332 = vrot.lane.b32.xlu0 %v324_v27, %s4131_s16  ;;  %v4383_v13 = vadd.f32 %v2406_v10, %v2326_v58  ;;  %v2428_v34 = vsel %vm171_vm1, %v2426_v26, %v7336_v33  ;;  %v7335_v42 = vrot.slane %v4375_v9, 2  ;;  %v4393_v18 = vmul.f32 0.42081738, %v4269_v12 }
  0xc5   :  { %v4390_v15 = vadd.f32 %v2428_v34, %v2348_v59  ;;  %v2470_v19 = vrot.slane %v2462_v36, 2  ;;  %v372_v20 = vmul.f32 0.1853266, %v4271_v29  ;;  %v375_v25 = vmul.f32 0.1853266, %v4285_v16 }
  0xc6   :  { %v2450_v21 = vsel %vm171_vm1, %v2448_v11, %v7335_v42  ;;  %v7334_v23 = vrot.slane %v4393_v18, 2  ;;  %v399_v37 = vmul.f32 0.13930091, %v4285_v16  ;;  %v398_v38 = vmul.f32 0.13930091, %v4287_v17 }
  0xc7   :  { %v4400_v22 = vadd.f32 %v2450_v21, %v2370_v61  ;;  %v421_v1 = vmul.f32 -0.5198438, %v4269_v12  ;;  %v420_v40 = vmul.f32 -0.5198438, %v4271_v29  ;;  %v423_v43 = vmul.f32 -0.5198438, %v4285_v16 }
  0xc8   :  { %338 = vrot.lane.b32.xlu1 %v327_v30, %s4131_s16  ;;  %336 = vrot.lane.b32.xlu0 %v326_v32, %s4131_s16  ;;  %v2472_v27 = vsel %vm171_vm1, %v2470_v19, %v7334_v23  ;;  %v397_v32 = vmul.f32 0.13930091, %v4269_v12  ;;  %v422_v46 = vmul.f32 -0.5198438, %v4287_v17  ;;  %v445_v50 = vmul.f32 -0.07393072, %v4269_v12 }
  0xc9   :  { %v4409_v30 = vadd.f32 %v2472_v27, %v2392_v8  ;;  %v444_v51 = vmul.f32 -0.07393072, %v4271_v29  ;;  %v2294_v52 = vmul.f32 -0.019444723, %v4287_v17  ;;  %v2310_v5 = vmul.f32 0.017543761, %v4287_v17 }
  0xca   :  { %v2332_v55 = vmul.f32 -0.5228049, %v4287_v17  ;;  %v4437_v2 = vmul.f32 -0.5228049, %v4285_v16  ;;  %v2354_v57 = vmul.f32 -0.4532836, %v4287_v17 }
  0xcb   :  { %v2319_v56 = vrot.slane %v2310_v5, 1  ;;  %v4442_v58 = vmul.f32 -0.4532836, %v4285_v16  ;;  %v2376_v62 = vmul.f32 -0.10031098, %v4287_v17 }
  0xcc   :  { %358 = vrot.lane.b32.xlu1 %v349_v28, %s4131_s16  ;;  %356 = vrot.lane.b32.xlu0 %v348_v35, %s4131_s16  ;;  %v374_v28 = vmul.f32 0.1853266, %v4287_v17  ;;  %v396_v35 = vmul.f32 0.13930091, %v4271_v29  ;;  %v2341_v60 = vrot.slane %v2332_v55, 1  ;;  %v7332_v61 = vrot.slane %v4437_v2, 1 }
  0xcd   :  { %v2298_v3 = vmul.f32 0.053099986, %v4287_v17  ;;  %v2363_v24 = vrot.slane %v2354_v57, 1  ;;  %v4450_v47 = vmul.f32 -0.10031098, %v4285_v16  ;;  %v2385_v21 = vrot.slane %v2376_v62, 1 }
  0xce   :  { %v447_v7 = vmul.f32 -0.07393072, %v4285_v16  ;;  %v2302_v8 = vmul.f32 -0.20626552, %v4287_v17  ;;  %v2343_v10 = vsel %vm88_vm0, %v2341_v60, %v7332_v61  ;;  %v446_v11 = vmul.f32 -0.07393072, %v4287_v17 }
  0xcf   :  { %v2350_v34 = vadd.f32 %v2343_v10, %v2298_v3  ;;  %v2306_v19 = vmul.f32 -0.39008293, %v4287_v17  ;;  %v2398_v27 = vmul.f32 -0.34003508, %v4287_v17  ;;  %v2464_v55 = vmul.f32 0.42081738, %v4287_v17 }
  0xd0   :  { %362 = vrot.lane.b32.xlu1 %v351_v54, %s4131_s16  ;;  %360 = vrot.lane.b32.xlu0 %v350_v4, %s4131_s16  ;;  %v4433_v54 = vmul.f32 0.017543761, %v4285_v16  ;;  %v7331_v4 = vrot.slane %v4442_v58, 1  ;;  %v4500_v3 = vmul.f32 0.42081738, %v4285_v16 }
  0xd2   :  { %v7333_v59 = vrot.slane %v4433_v54, 1 }
  0xd4   :  { %382 = vrot.lane.b32.xlu1 %v373_v14, %s4132_s0  ;;  %380 = vrot.lane.b32.xlu0 %v372_v20, %s4132_s0  ;;  %v2321_v26 = vsel %vm88_vm0, %v2319_v56, %v7333_v59  ;;  %v2365_v14 = vsel %vm88_vm0, %v2363_v24, %v7331_v4  ;;  %v2473_v24 = vrot.slane %v2464_v55, 2  ;;  %v261_v55 = vmul.f32 0.32615957, %v4269_v12 }
  0xd5   :  { %v2328_v36 = vadd.f32 %v2321_v26, %v2294_v52  ;;  %v2372_v20 = vadd.f32 %v2365_v14, %v2302_v8  ;;  %v7326_v26 = vrot.slane %v4500_v3, 2 }
  0xd7   :  { %v2475_v10 = vsel %vm171_vm1, %v2473_v24, %v7326_v26  ;;  %v260_v24 = vmul.f32 0.32615957, %v4271_v29 }
  0xd8   :  { %386 = vrot.lane.b32.xlu1 %v375_v25, %s4132_s0  ;;  %384 = vrot.lane.b32.xlu0 %v374_v28, %s4132_s0  ;;  %v7329_v25 = vrot.slane %v4450_v47, 1  ;;  %v4470_v28 = vmul.f32 -0.34003508, %v4285_v16 }
  0xdc   :  { %406 = vrot.lane.b32.xlu1 %v397_v32, %s4132_s0  ;;  %404 = vrot.lane.b32.xlu0 %v396_v35, %s4132_s0  ;;  %v2420_v32 = vmul.f32 0.2130173, %v4287_v17  ;;  %v2387_v35 = vsel %vm88_vm0, %v2385_v21, %v7329_v25 }
  0xe0   :  { %410 = vrot.lane.b32.xlu1 %v399_v37, %s4132_s0  ;;  %408 = vrot.lane.b32.xlu0 %v398_v38, %s4132_s0  ;;  %v4478_v37 = vmul.f32 0.2130173, %v4285_v16  ;;  %v2442_v38 = vmul.f32 0.424529, %v4287_v17 }
  0xe2   :  { %v2451_v52 = vrot.slane %v2442_v38, 2 }
  0xe4   :  { %430 = vrot.lane.b32.xlu1 %v421_v1, %s4132_s0  ;;  %428 = vrot.lane.b32.xlu0 %v420_v40, %s4132_s0  ;;  %v2394_v1 = vadd.f32 %v2387_v35, %v2306_v19  ;;  %v2407_v40 = vrot.slane %v2398_v27, 2 }
  0xe8   :  { %434 = vrot.lane.b32.xlu1 %v423_v43, %s4132_s0  ;;  %432 = vrot.lane.b32.xlu0 %v422_v46, %s4132_s0  ;;  %v7330_v43 = vrot.slane %v4470_v28, 2  ;;  %v2429_v46 = vrot.slane %v2420_v32, 2 }
  0xea   :  { %v2409_v5 = vsel %vm171_vm1, %v2407_v40, %v7330_v43  ;;  %v262_v43 = vmul.f32 0.32615957, %v4287_v17 }
  0xeb   :  { %v4491_v56 = vadd.f32 %v2409_v5, %v2328_v36 }
  0xec   :  { %454 = vrot.lane.b32.xlu1 %v445_v50, %s4132_s0  ;;  %452 = vrot.lane.b32.xlu0 %v444_v51, %s4132_s0  ;;  %v7328_v50 = vrot.slane %v4478_v37, 2  ;;  %v4485_v51 = vmul.f32 0.424529, %v4285_v16 }
  0xee   :  { %v2431_v57 = vsel %vm171_vm1, %v2429_v46, %v7328_v50  ;;  %v7327_v60 = vrot.slane %v4485_v51, 2 }
  0xef   :  { %v4497_v62 = vadd.f32 %v2431_v57, %v2350_v34 }
  0xf0   :  { %458 = vrot.lane.b32.xlu1 %v447_v7, %s4132_s0  ;;  %456 = vrot.lane.b32.xlu0 %v446_v11, %s4132_s0  ;;  %v2453_v7 = vsel %vm171_vm1, %v2451_v52, %v7327_v60  ;;  %v4511_v11 = vadd.f32 %v2475_v10, %v2394_v1  ;;  %v263_v60 = vmul.f32 0.32615957, %v4285_v16 }
  0xf1   :  { %v4505_v8 = vadd.f32 %v2453_v7, %v2372_v20 }
 0x126   :  { %v287_v36 = vpop.permute.xlu1 %286  ;;  %v285_v34 = vpop.permute.xlu0 %284 }
 0x127   :  { %v297_v7 = vadd.f32 %v287_v36, %v261_v55  ;;  %v296_v10 = vadd.f32 %v285_v34, %v260_v24 }
 0x12a   :  { %v291_v14 = vpop.permute.xlu1 %290  ;;  %v289_v19 = vpop.permute.xlu0 %288 }
 0x12b   :  { %v299_v61 = vadd.f32 %v291_v14, %v263_v60  ;;  %v298_v23 = vadd.f32 %v289_v19, %v262_v43 }
 0x12e   :  { %v4513_v21 = vpop.permute.xlu1 %310  ;;  %v4515_v27 = vpop.permute.xlu0 %308 }
 0x132   :  { %v4517_v32 = vpop.permute.xlu1 %314  ;;  %v4519_v20 = vpop.permute.xlu0 %312 }
 0x136   :  { %v4521_v35 = vpop.permute.xlu1 %334  ;;  %v4523_v38 = vpop.permute.xlu0 %332 }
 0x13a   :  { %v4525_v40 = vpop.permute.xlu1 %338  ;;  %v4527_v1 = vpop.permute.xlu0 %336 }
 0x13e   :  { %v4529_v46 = vpop.permute.xlu1 %358  ;;  %v4531_v52 = vpop.permute.xlu0 %356 }
 0x142   :  { %v4533_v5 = vpop.permute.xlu1 %362  ;;  %v4536_v57 = vpop.permute.xlu0 %360 }
 0x143   :  { %7489 = vst [vmem:[#allocation5_spill] sm:$0xff] %v4536_v57 }
 0x146   :  { %v383_v26 = vpop.permute.xlu1 %382  ;;  %v381_v25 = vpop.permute.xlu0 %380 }
 0x147   :  { %v393_v50 = vadd.f32 %v383_v26, %v297_v7  ;;  %v392_v4 = vadd.f32 %v381_v25, %v296_v10 }
 0x149   :  { %v469_v59 = vadd.f32 -0.14020859, %v393_v50  ;;  %v468_v42 = vadd.f32 -0.14020859, %v392_v4 }
 0x14a   :  { %v387_v33 = vpop.permute.xlu1 %386  ;;  %v385_v44 = vpop.permute.xlu0 %384 }
 0x14b   :  { %v4541_v6 = vmax.f32 %v469_v59, 0.0  ;;  %v395_v45 = vadd.f32 %v387_v33, %v299_v61  ;;  %v4543_v41 = vmax.f32 %v468_v42, 0.0  ;;  %v394_v36 = vadd.f32 %v385_v44, %v298_v23 }
 0x14d   :  { %v471_v34 = vadd.f32 -0.14020859, %v395_v45  ;;  %v517_v55 = vmul.f32 0.035164677, %v4541_v6  ;;  %v470_v26 = vadd.f32 -0.14020859, %v394_v36 }
 0x14e   :  { %v516_v24 = vmul.f32 0.035164677, %v4543_v41  ;;  %v541_v44 = vmul.f32 -0.0967759, %v4541_v6  ;;  %v540_v45 = vmul.f32 -0.0967759, %v4543_v41 }
 0x14f   :  { %v4547_v7 = vmax.f32 %v471_v34, 0.0  ;;  %526 = vrot.lane.b32.xlu1 %v517_v55, %s4131_s16  ;;  %v4550_v25 = vmax.f32 %v470_v26, 0.0  ;;  %v565_v61 = vmul.f32 -0.07900088, %v4541_v6  ;;  %v564_v4 = vmul.f32 -0.07900088, %v4543_v41 }
 0x150   :  { %524 = vrot.lane.b32.xlu0 %v516_v24, %s4131_s16  ;;  %v589_v60 = vmul.f32 0.022550335, %v4541_v6  ;;  %v588_v14 = vmul.f32 0.022550335, %v4543_v41  ;;  %v613_v36 = vmul.f32 0.11439034, %v4541_v6 }
 0x151   :  { %v519_v33 = vmul.f32 0.035164677, %v4547_v7  ;;  %v518_v42 = vmul.f32 0.035164677, %v4550_v25  ;;  %v543_v23 = vmul.f32 -0.0967759, %v4547_v7 }
 0x152   :  { %v542_v59 = vmul.f32 -0.0967759, %v4550_v25  ;;  %v567_v43 = vmul.f32 -0.07900088, %v4547_v7  ;;  %v566_v50 = vmul.f32 -0.07900088, %v4550_v25 }
 0x153   :  { %530 = vrot.lane.b32.xlu1 %v519_v33, %s4131_s16  ;;  %v591_v19 = vmul.f32 0.022550335, %v4547_v7  ;;  %v590_v10 = vmul.f32 0.022550335, %v4550_v25  ;;  %v612_v34 = vmul.f32 0.11439034, %v4543_v41 }
 0x154   :  { %528 = vrot.lane.b32.xlu0 %v518_v42, %s4131_s16  ;;  %v615_v55 = vmul.f32 0.11439034, %v4547_v7  ;;  %v614_v26 = vmul.f32 0.11439034, %v4550_v25  ;;  %v637_v24 = vmul.f32 0.06582114, %v4541_v6 }
 0x155   :  { %v636_v33 = vmul.f32 0.06582114, %v4543_v41  ;;  %v639_v42 = vmul.f32 0.06582114, %v4547_v7 }
 0x157   :  { %550 = vrot.lane.b32.xlu1 %v541_v44, %s4131_s16  ;;  %v638_v44 = vmul.f32 0.06582114, %v4550_v25 }
 0x158   :  { %548 = vrot.lane.b32.xlu0 %v540_v45, %s4131_s16  ;;  %v407_v45 = vpop.permute.xlu1 %406 }
 0x15b   :  { %554 = vrot.lane.b32.xlu1 %v543_v23, %s4131_s16  ;;  %v265_v23 = vmul.f32 0.19285142, %v4269_v12 }
 0x15c   :  { %552 = vrot.lane.b32.xlu0 %v542_v59, %s4131_s16  ;;  %v405_v59 = vpop.permute.xlu0 %404 }
 0x15f   :  { %574 = vrot.lane.b32.xlu1 %v565_v61, %s4131_s16  ;;  %v661_v61 = vmul.f32 -0.057372466, %v4541_v6 }
 0x160   :  { %572 = vrot.lane.b32.xlu0 %v564_v4, %s4131_s16  ;;  %v264_v4 = vmul.f32 0.19285142, %v4271_v29 }
 0x163   :  { %578 = vrot.lane.b32.xlu1 %v567_v43, %s4131_s16  ;;  %v660_v43 = vmul.f32 -0.057372466, %v4543_v41 }
 0x164   :  { %576 = vrot.lane.b32.xlu0 %v566_v50, %s4131_s16  ;;  %v321_v50 = vadd.f32 %v4513_v21, %v265_v23  ;;  %v409_v21 = vpop.permute.xlu0 %408 }
 0x167   :  { %598 = vrot.lane.b32.xlu1 %v589_v60, %s4131_s16  ;;  %v320_v60 = vadd.f32 %v4515_v27, %v264_v4  ;;  %v687_v4 = vmul.f32 -0.1804236, %v4547_v7 }
 0x168   :  { %596 = vrot.lane.b32.xlu0 %v588_v14, %s4131_s16  ;;  %v267_v14 = vmul.f32 0.19285142, %v4285_v16 }
 0x16b   :  { %602 = vrot.lane.b32.xlu1 %v591_v19, %s4131_s16  ;;  %v417_v19 = vadd.f32 %v407_v45, %v321_v50  ;;  %v686_v50 = vmul.f32 -0.1804236, %v4550_v25 }
 0x16c   :  { %600 = vrot.lane.b32.xlu0 %v590_v10, %s4131_s16  ;;  %v663_v10 = vmul.f32 -0.057372466, %v4547_v7 }
 0x16f   :  { %622 = vrot.lane.b32.xlu1 %v613_v36, %s4132_s0  ;;  %v266_v36 = vmul.f32 0.19285142, %v4287_v17 }
 0x170   :  { %620 = vrot.lane.b32.xlu0 %v612_v34, %s4132_s0  ;;  %v416_v34 = vadd.f32 %v405_v59, %v320_v60  ;;  %v684_v59 = vmul.f32 -0.1804236, %v4543_v41 }
 0x171   :  { %v322_v27 = vadd.f32 %v4519_v20, %v266_v36 }
 0x172   :  { %v476_v45 = vadd.f32 -0.19934332, %v416_v34 }
 0x173   :  { %626 = vrot.lane.b32.xlu1 %v615_v55, %s4132_s0  ;;  %v411_v55 = vpop.permute.xlu1 %410  ;;  %v418_v23 = vadd.f32 %v409_v21, %v322_v27 }
 0x174   :  { %624 = vrot.lane.b32.xlu0 %v614_v26, %s4132_s0  ;;  %v662_v26 = vmul.f32 -0.057372466, %v4550_v25  ;;  %v4620_v20 = vmax.f32 %v476_v45, 0.0 }
 0x177   :  { %646 = vrot.lane.b32.xlu1 %v637_v24, %s4132_s0  ;;  %v323_v24 = vadd.f32 %v4517_v32, %v267_v14 }
 0x178   :  { %644 = vrot.lane.b32.xlu0 %v636_v33, %s4132_s0  ;;  %v477_v33 = vadd.f32 -0.19934332, %v417_v19 }
 0x17a   :  { %v4617_v32 = vmax.f32 %v477_v33, 0.0  ;;  %v788_v33 = vmul.f32 -0.2766938, %v4620_v20 }
 0x17b   :  { %650 = vrot.lane.b32.xlu1 %v639_v42, %s4132_s0  ;;  %v419_v42 = vadd.f32 %v411_v55, %v323_v24 }
 0x17c   :  { %648 = vrot.lane.b32.xlu0 %v638_v44, %s4132_s0  ;;  %v685_v44 = vmul.f32 -0.1804236, %v4541_v6  ;;  %v741_v14 = vmul.f32 -0.22539812, %v4617_v32  ;;  %v765_v55 = vmul.f32 0.085392505, %v4617_v32 }
 0x17d   :  { %v789_v27 = vmul.f32 -0.2766938, %v4617_v32  ;;  %v813_v45 = vmul.f32 -0.27126813, %v4617_v32 }
 0x17f   :  { %670 = vrot.lane.b32.xlu1 %v661_v61, %s4132_s0  ;;  %v479_v61 = vadd.f32 -0.19934332, %v419_v42 }
 0x180   :  { %668 = vrot.lane.b32.xlu0 %v660_v43, %s4132_s0  ;;  %v478_v43 = vadd.f32 -0.19934332, %v418_v23  ;;  %v812_v23 = vmul.f32 -0.27126813, %v4620_v20 }
 0x181   :  { %v4625_v60 = vmax.f32 %v479_v61, 0.0 }
 0x182   :  { %v4628_v19 = vmax.f32 %v478_v43, 0.0  ;;  %v2293_v43 = vmul.f32 -0.019444723, %v4269_v12 }
 0x183   :  { %674 = vrot.lane.b32.xlu1 %v663_v10, %s4132_s0  ;;  %v740_v10 = vmul.f32 -0.22539812, %v4620_v20  ;;  %v743_v36 = vmul.f32 -0.22539812, %v4625_v60  ;;  %v767_v24 = vmul.f32 0.085392505, %v4625_v60 }
 0x184   :  { %672 = vrot.lane.b32.xlu0 %v662_v26, %s4132_s0  ;;  %7490 = vst [vmem:[#allocation6_spill] sm:$0xff] %v4628_v19  ;;  %v742_v34 = vmul.f32 -0.22539812, %v4628_v19  ;;  %v764_v26 = vmul.f32 0.085392505, %v4620_v20 }
 0x185   :  { %v766_v21 = vmul.f32 0.085392505, %v4628_v19  ;;  %v791_v42 = vmul.f32 -0.2766938, %v4625_v60  ;;  %v814_v61 = vmul.f32 -0.27126813, %v4628_v19 }
 0x186   :  { %v839_v39 = vmul.f32 -0.17796984, %v4625_v60 }
 0x187   :  { %694 = vrot.lane.b32.xlu1 %v685_v44, %s4132_s0  ;;  %v790_v44 = vmul.f32 -0.2766938, %v4628_v19 }
 0x188   :  { %692 = vrot.lane.b32.xlu0 %v684_v59, %s4132_s0  ;;  %v815_v59 = vmul.f32 -0.27126813, %v4625_v60 }
 0x18b   :  { %698 = vrot.lane.b32.xlu1 %v687_v4, %s4132_s0  ;;  %v4659_v4 = vpop.permute.xlu1 %430 }
 0x18c   :  { %696 = vrot.lane.b32.xlu0 %v686_v50, %s4132_s0  ;;  %v4663_v50 = vpop.permute.xlu0 %428 }
 0x18f   :  { %750 = vrot.lane.b32.xlu1 %v741_v14, %s4131_s16  ;;  %v2297_v14 = vmul.f32 0.053099986, %v4269_v12 }
 0x190   :  { %748 = vrot.lane.b32.xlu0 %v740_v10, %s4131_s16  ;;  %v837_v10 = vmul.f32 -0.17796984, %v4617_v32 }
 0x193   :  { %754 = vrot.lane.b32.xlu1 %v743_v36, %s4131_s16  ;;  %v2301_v36 = vmul.f32 -0.20626552, %v4269_v12 }
 0x194   :  { %752 = vrot.lane.b32.xlu0 %v742_v34, %s4131_s16  ;;  %v2327_v34 = vadd.f32 %v2317_v49, %v2293_v43  ;;  %v7494_v49 = vrot.slane %v4360_v63, 2  ;;  %v7495_v43 = vrot.slane %v4365_v31, 2  ;;  %v7496_v63 = vrot.slane %v4375_v9, 2 }
 0x195   :  { %v7497_v31 = vrot.slane %v4393_v18, 2  ;;  %v860_v9 = vmul.f32 0.045010302, %v4620_v20 }
 0x197   :  { %774 = vrot.lane.b32.xlu1 %v765_v55, %s4131_s16  ;;  %v836_v55 = vmul.f32 -0.17796984, %v4620_v20 }
 0x198   :  { %772 = vrot.lane.b32.xlu0 %v764_v26, %s4131_s16  ;;  %v2305_v26 = vmul.f32 -0.39008293, %v4269_v12 }
 0x19b   :  { %778 = vrot.lane.b32.xlu1 %v767_v24, %s4131_s16  ;;  %v7491_v24 = vrot.slane %v4329_v0, 1  ;;  %v269_v0 = vmul.f32 0.29763195, %v4269_v12 }
 0x19c   :  { %776 = vrot.lane.b32.xlu0 %v766_v21, %s4131_s16 }
 0x19d   :  { %v2349_v21 = vadd.f32 %v7491_v24, %v2297_v14 }
 0x19f   :  { %798 = vrot.lane.b32.xlu1 %v789_v27, %s4131_s16  ;;  %v7492_v27 = vrot.slane %v4333_v48, 1  ;;  %v838_v48 = vmul.f32 -0.17796984, %v4628_v19  ;;  %v2437_v14 = vadd.f32 %v7495_v43, %v2349_v21  ;;  %v2295_v21 = vmul.f32 -0.019444723, %v4285_v16 }
 0x1a0   :  { %796 = vrot.lane.b32.xlu0 %v788_v33, %s4131_s16 }
 0x1a1   :  { %v2371_v33 = vadd.f32 %v7492_v27, %v2301_v36  ;;  %v273_v36 = vmul.f32 0.46250167, %v4269_v12  ;;  %v861_v27 = vmul.f32 0.045010302, %v4617_v32  ;;  %v2484_v12 = vadd.f32 0.12665588, %v4383_v13 }
 0x1a2   :  { %v2500_v13 = vadd.f32 -0.41828197, %v4400_v22  ;;  %v7502_v22 = vrot.slane %v4470_v28, 2 }
 0x1a3   :  { %802 = vrot.lane.b32.xlu1 %v791_v42, %s4131_s16  ;;  %v7493_v42 = vrot.slane %v4342_v53, 1  ;;  %v271_v53 = vmul.f32 0.29763195, %v4285_v16 }
 0x1a4   :  { %800 = vrot.lane.b32.xlu0 %v790_v44, %s4131_s16 }
 0x1a5   :  { %v2393_v44 = vadd.f32 %v7493_v42, %v2305_v26  ;;  %v4701_v26 = vmul.f32 0.46250167, %v4285_v16 }
 0x1a7   :  { %822 = vrot.lane.b32.xlu1 %v813_v45, %s4131_s16  ;;  %v4681_v45 = vpop.permute.xlu1 %434  ;;  %v2481_v24 = vadd.f32 %v7497_v31, %v2393_v44  ;;  %v2299_v44 = vmul.f32 0.053099986, %v4285_v16  ;;  %v7499_v31 = vrot.slane %v4437_v2, 1  ;;  %v7505_v2 = vrot.slane %v4450_v47, 1 }
 0x1a8   :  { %820 = vrot.lane.b32.xlu0 %v812_v23, %s4131_s16  ;;  %v2415_v23 = vadd.f32 %v7494_v49, %v2327_v34  ;;  %v2459_v34 = vadd.f32 %v7496_v63, %v2371_v33  ;;  %v2492_v33 = vadd.f32 -0.21261343, %v4390_v15  ;;  %v7511_v47 = vrot.slane %v4478_v37, 2 }
 0x1a9   :  { %v2509_v15 = vadd.f32 0.42924643, %v2481_v24  ;;  %v4734_v24 = vmax.f32 %v2484_v12, 0.0  ;;  %v885_v12 = vmul.f32 0.05161294, %v4617_v32  ;;  %v7514_v37 = vrot.slane %v4500_v3, 2 }
 0x1aa   :  { %v2485_v42 = vadd.f32 0.12665588, %v2415_v23  ;;  %v2501_v18 = vadd.f32 -0.41828197, %v2459_v34  ;;  %v2508_v23 = vadd.f32 0.42924643, %v4409_v30 }
 0x1ab   :  { %826 = vrot.lane.b32.xlu1 %v815_v59, %s4131_s16  ;;  %v268_v59 = vmul.f32 0.29763195, %v4271_v29  ;;  %v455_v43 = vpop.permute.xlu1 %454  ;;  %v7500_v34 = vrot.slane %v4442_v58, 1  ;;  %7503 = vst [vmem:[#allocation8_spill] sm:$0xff] %v4734_v24  ;;  %v4748_v28 = vmax.f32 %v2509_v15, 0.0 }
 0x1ac   :  { %824 = vrot.lane.b32.xlu0 %v814_v61, %s4131_s16  ;;  %v4688_v61 = vpop.permute.xlu0 %432  ;;  %v4729_v57 = vmax.f32 %v2485_v42, 0.0  ;;  %v4744_v42 = vmax.f32 %v2500_v13, 0.0  ;;  %v884_v15 = vmul.f32 0.05161294, %v4620_v20  ;;  %v887_v3 = vmul.f32 0.05161294, %v4625_v60 }
 0x1ad   :  { %7509 = vst [vmem:[#allocation13_spill] sm:$0xff] %v4748_v28  ;;  %v344_v13 = vadd.f32 %v4523_v38, %v268_v59 }
 0x1ae   :  { %7501 = vst [vmem:[#allocation7_spill] sm:$0xff] %v4729_v57  ;;  %7507 = vst [vmem:[#allocation11_spill] sm:$0xff] %v4744_v42 }
 0x1af   :  { %846 = vrot.lane.b32.xlu1 %v837_v10, %s4132_s0  ;;  %v270_v10 = vmul.f32 0.29763195, %v4287_v17  ;;  %v440_v59 = vadd.f32 %v4663_v50, %v344_v13  ;;  %v2502_v50 = vadd.f32 -0.41828197, %v4505_v8  ;;  %v908_v8 = vmul.f32 0.13332026, %v4620_v20 }
 0x1b0   :  { %844 = vrot.lane.b32.xlu0 %v836_v55, %s4132_s0  ;;  %v272_v55 = vmul.f32 0.46250167, %v4271_v29  ;;  %v2493_v29 = vadd.f32 -0.21261343, %v2437_v14  ;;  %v453_v63 = vpop.permute.xlu0 %452  ;;  %v863_v14 = vmul.f32 0.045010302, %v4625_v60 }
 0x1b2   :  { %v368_v38 = vadd.f32 %v4531_v52, %v272_v55  ;;  %v886_v52 = vmul.f32 0.05161294, %v4628_v19 }
 0x1b3   :  { %850 = vrot.lane.b32.xlu1 %v839_v39, %s4132_s0  ;;  %v7498_v39 = vrot.slane %v4433_v54, 1  ;;  %v2307_v54 = vmul.f32 -0.39008293, %v4285_v16 }
 0x1b4   :  { %848 = vrot.lane.b32.xlu0 %v838_v48, %s4132_s0  ;;  %v2303_v48 = vmul.f32 -0.20626552, %v4285_v16  ;;  %v4736_v16 = vmax.f32 %v2493_v29, 0.0  ;;  %v4753_v29 = vmax.f32 %v2508_v23, 0.0  ;;  %v346_v23 = vadd.f32 %v4527_v1, %v270_v10 }
 0x1b5   :  { %v2329_v49 = vadd.f32 %v7498_v39, %v2295_v21  ;;  %v2351_v21 = vadd.f32 %v7499_v31, %v2299_v44  ;;  %v4726_v39 = vmul.f32 0.46250167, %v4287_v17  ;;  %v2395_v58 = vadd.f32 %v7505_v2, %v2307_v54 }
 0x1b6   :  { %7504 = vst [vmem:[#allocation9_spill] sm:$0xff] %v4736_v16  ;;  %v2486_v44 = vadd.f32 0.12665588, %v4491_v56  ;;  %v4742_v17 = vmax.f32 %v2492_v33, 0.0  ;;  %7510 = vst [vmem:[#allocation14_spill] sm:$0xff] %v4753_v29  ;;  %v7512_v56 = vrot.slane %v4485_v51, 2  ;;  %v345_v33 = vadd.f32 %v4521_v35, %v269_v0 }
 0x1b7   :  { %870 = vrot.lane.b32.xlu1 %v861_v27, %s4132_s0  ;;  %v2373_v27 = vadd.f32 %v7500_v34, %v2303_v48  ;;  %v2417_v30 = vadd.f32 %v7502_v22, %v2329_v49  ;;  %v4746_v48 = vmax.f32 %v2501_v18, 0.0  ;;  %v4750_v49 = vpop.permute.xlu1 %458  ;;  %v4761_v18 = vpop.permute.xlu0 %456  ;;  %v347_v34 = vadd.f32 %v4525_v40, %v271_v53 }
 0x1b8   :  { %868 = vrot.lane.b32.xlu0 %v860_v9, %s4132_s0  ;;  %v862_v9 = vmul.f32 0.045010302, %v4628_v19  ;;  %7506 = vst [vmem:[#allocation10_spill] sm:$0xff] %v4742_v17  ;;  %7513 = vst [vmem:[#allocation15_spill] sm:$0xff] %v4761_v18  ;;  %v4769_v51 = vmax.f32 %v2486_v44, 0.0  ;;  %v369_v35 = vadd.f32 %v4529_v46, %v273_v36  ;;  %v441_v0 = vadd.f32 %v4659_v4, %v345_v33 }
 0x1b9   :  { %7508 = vst [vmem:[#allocation12_spill] sm:$0xff] %v4746_v48  ;;  %v2461_v54 = vadd.f32 %v7512_v56, %v2373_v27  ;;  %v2487_v31 = vadd.f32 0.12665588, %v2417_v30  ;;  %v443_v40 = vadd.f32 %v4681_v45, %v347_v34  ;;  %v442_v1 = vadd.f32 %v4688_v61, %v346_v23 }
 0x1ba   :  { %7515 = vst [vmem:[#allocation16_spill] sm:$0xff] %v4769_v51  ;;  %v2494_v10 = vadd.f32 -0.21261343, %v4497_v62  ;;  %v465_v27 = vadd.f32 %v455_v43, %v369_v35  ;;  %v464_v46 = vadd.f32 %v453_v63, %v368_v38  ;;  %v485_v61 = vadd.f32 0.31559086, %v441_v0 }
 0x1bb   :  { %874 = vrot.lane.b32.xlu1 %v863_v14, %s4132_s0  ;;  %v2439_v14 = vadd.f32 %v7511_v47, %v2351_v21  ;;  %v2483_v21 = vadd.f32 %v7514_v37, %v2395_v58  ;;  %v2503_v45 = vadd.f32 -0.41828197, %v2461_v54  ;;  %v2510_v22 = vadd.f32 0.42924643, %v4511_v11 }
 0x1bc   :  { %872 = vrot.lane.b32.xlu0 %v862_v9, %s4132_s0  ;;  %v484_v9 = vadd.f32 0.31559086, %v440_v59  ;;  %v487_v62 = vadd.f32 0.31559086, %v443_v40  ;;  %v486_v43 = vadd.f32 0.31559086, %v442_v1 }
 0x1bd   :  { %v2495_v4 = vadd.f32 -0.21261343, %v2439_v14  ;;  %v2511_v55 = vadd.f32 0.42924643, %v2483_v21  ;;  %v909_v30 = vmul.f32 0.13332026, %v4617_v32 }
 0x1be   :  { %v493_v2 = vadd.f32 -0.00463471, %v465_v27  ;;  %v492_v58 = vadd.f32 -0.00463471, %v464_v46  ;;  %v4798_v47 = vmax.f32 %v2494_v10, 0.0  ;;  %v4802_v11 = vmax.f32 %v2502_v50, 0.0 }
 0x1bf   :  { %894 = vrot.lane.b32.xlu1 %v885_v12, %s4132_s0  ;;  %v4796_v12 = vmax.f32 %v2487_v31, 0.0  ;;  %v4800_v14 = vmax.f32 %v2495_v4, 0.0  ;;  %v4804_v56 = vmax.f32 %v485_v61, 0.0  ;;  %v4807_v54 = vmax.f32 %v2503_v45, 0.0 }
 0x1c0   :  { %892 = vrot.lane.b32.xlu0 %v884_v15, %s4132_s0  ;;  %7517 = vst [vmem:[#allocation18_spill] sm:$0xff] %v4798_v47  ;;  %7519 = vst [vmem:[#allocation20_spill] sm:$0xff] %v4802_v11  ;;  %v4809_v33 = vmax.f32 %v2510_v22, 0.0  ;;  %v4811_v13 = vmax.f32 %v2511_v55, 0.0  ;;  %v4813_v15 = vmax.f32 %v484_v9, 0.0  ;;  %v4815_v31 = vmax.f32 %v487_v62, 0.0 }
 0x1c1   :  { %v4778_v53 = vpop.permute.xlu1 %526  ;;  %7516 = vst [vmem:[#allocation17_spill] sm:$0xff] %v4796_v12  ;;  %7518 = vst [vmem:[#allocation19_spill] sm:$0xff] %v4800_v14  ;;  %v4817_v34 = vmax.f32 %v486_v43, 0.0  ;;  %v911_v37 = vmul.f32 0.13332026, %v4625_v60  ;;  %v4822_v21 = vmax.f32 %v493_v2, 0.0 }
 0x1c2   :  { %v4782_v36 = vpop.permute.xlu0 %524  ;;  %7520 = vst [vmem:[#allocation21_spill] sm:$0xff] %v4804_v56  ;;  %7521 = vst [vmem:[#allocation22_spill] sm:$0xff] %v4807_v54  ;;  %v4824_v35 = vmax.f32 %v492_v58, 0.0  ;;  %v4827_v38 = vmul.f32 0.24637449, %v4541_v6 }
 0x1c3   :  { %898 = vrot.lane.b32.xlu1 %v887_v3, %s4132_s0  ;;  %7522 = vst [vmem:[#allocation23_spill] sm:$0xff] %v4809_v33  ;;  %7523 = vst [vmem:[#allocation24_spill] sm:$0xff] %v4811_v13  ;;  %v910_v59 = vmul.f32 0.13332026, %v4628_v19  ;;  %v4833_v40 = vmul.f32 0.24637449, %v4543_v41 }
 0x1c4   :  { %896 = vrot.lane.b32.xlu0 %v886_v52, %s4132_s0  ;;  %7524 = vst [vmem:[#allocation25_spill] sm:$0xff] %v4813_v15  ;;  %7525 = vst [vmem:[#allocation26_spill] sm:$0xff] %v4815_v31  ;;  %v4836_v1 = vmul.f32 0.24637449, %v4547_v7  ;;  %v4839_v3 = vmul.f32 0.24637449, %v4550_v25 }
 0x1c5   :  { %v4789_v63 = vpop.permute.xlu1 %530  ;;  %7526 = vst [vmem:[#allocation27_spill] sm:$0xff] %v4817_v34  ;;  %7527 = vst [vmem:[#allocation28_spill] sm:$0xff] %v4822_v21  ;;  %v4843_v10 = vmul.f32 -0.1711279, %v4541_v6  ;;  %v4846_v27 = vmul.f32 -0.1711279, %v4543_v41 }
 0x1c6   :  { %v4792_v44 = vpop.permute.xlu0 %528  ;;  %7528 = vst [vmem:[#allocation29_spill] sm:$0xff] %v4824_v35  ;;  %v4850_v46 = vmul.f32 -0.1711279, %v4547_v7  ;;  %v4855_v4 = vmul.f32 -0.1711279, %v4550_v25 }
 0x1c7   :  { %918 = vrot.lane.b32.xlu1 %v909_v30, %s4132_s0  ;;  %v965_v50 = vmul.f32 0.27999553, %v4804_v56  ;;  %v964_v45 = vmul.f32 0.27999553, %v4813_v15  ;;  %v4862_v61 = vmul.f32 -0.1159765, %v4541_v6 }
 0x1c8   :  { %916 = vrot.lane.b32.xlu0 %v908_v8, %s4132_s0  ;;  %v4865_v9 = vmul.f32 -0.1159765, %v4543_v41  ;;  %v967_v22 = vmul.f32 0.27999553, %v4815_v31  ;;  %v966_v62 = vmul.f32 0.27999553, %v4817_v34 }
 0x1c9   :  { %v4819_v23 = vpop.permute.xlu1 %550  ;;  %v4871_v43 = vmul.f32 -0.1159765, %v4547_v7  ;;  %v4874_v30 = vmul.f32 -0.1159765, %v4550_v25  ;;  %v989_v2 = vmul.f32 0.009669503, %v4804_v56 }
 0x1ca   :  { %v4829_v0 = vpop.permute.xlu0 %548  ;;  %v988_v58 = vmul.f32 0.009669503, %v4813_v15  ;;  %v4880_v8 = vmul.f32 -0.06127611, %v4541_v6  ;;  %v990_v35 = vmul.f32 0.009669503, %v4817_v34 }
 0x1cb   :  { %922 = vrot.lane.b32.xlu1 %v911_v37, %s4132_s0  ;;  %7529 = vst [vmem:[#allocation30_spill] sm:$0xff] %v4871_v43  ;;  %7530 = vst [vmem:[#allocation31_spill] sm:$0xff] %v4874_v30  ;;  %v2600_v28 = vmul.f32 0.21983853, %v4769_v51  ;;  %v4896_v29 = vmul.f32 0.21983853, %v4796_v12 }
 0x1cc   :  { %920 = vrot.lane.b32.xlu0 %v910_v59, %s4132_s0  ;;  %7531 = vst [vmem:[#allocation32_spill] sm:$0xff] %v4880_v8  ;;  %v4885_v59 = vmul.f32 -0.06127611, %v4543_v41  ;;  %v4900_v6 = vmul.f32 -0.06127611, %v4550_v25 }
 0x1cd   :  { %v4852_v52 = vpop.permute.xlu1 %554  ;;  %v1013_v41 = vmul.f32 -0.05039666, %v4804_v56  ;;  %v1012_v18 = vmul.f32 -0.05039666, %v4813_v15  ;;  %v4906_v13 = vmul.f32 -0.05039666, %v4815_v31 }
 0x1ce   :  { %v4859_v55 = vpop.permute.xlu0 %552  ;;  %7532 = vst [vmem:[#allocation33_spill] sm:$0xff] %v4885_v59  ;;  %7534 = vst [vmem:[#allocation35_spill] sm:$0xff] %v4900_v6  ;;  %v4912_v33 = vmul.f32 0.22748409, %v4804_v56  ;;  %v4917_v25 = vmul.f32 0.22748409, %v4813_v15 }
 0x1cf   :  { %974 = vrot.lane.b32.xlu1 %v965_v50, %s4131_s16  ;;  %v991_v50 = vmul.f32 0.009669503, %v4815_v31  ;;  %v4923_v6 = vmul.f32 0.22748409, %v4817_v34  ;;  %v4931_v59 = vmul.f32 0.16683877, %v4813_v15 }
 0x1d0   :  { %972 = vrot.lane.b32.xlu0 %v964_v45, %s4131_s16  ;;  %v4892_v45 = vmul.f32 -0.06127611, %v4547_v7  ;;  %v4909_v7 = vmul.f32 -0.05039666, %v4817_v34  ;;  %v2609_v42 = vrot.slane %v2600_v28, 1 }
 0x1d1   :  { %v4882_v37 = vpop.permute.xlu1 %574  ;;  %7538 = vst [vmem:[#allocation39_spill] sm:$0xff] %v4931_v59  ;;  %v4936_v30 = vmul.f32 0.16683877, %v4815_v31  ;;  %v4942_v43 = vmul.f32 -0.27748907, %v4804_v56 }
 0x1d2   :  { %v4889_v21 = vpop.permute.xlu0 %572  ;;  %7533 = vst [vmem:[#allocation34_spill] sm:$0xff] %v4892_v45  ;;  %v4928_v45 = vmul.f32 0.16683877, %v4804_v56  ;;  %v2688_v28 = vmul.f32 -0.13016199, %v4769_v51 }
 0x1d3   :  { %978 = vrot.lane.b32.xlu1 %v967_v22, %s4131_s16  ;;  %v4920_v22 = vmul.f32 0.22748409, %v4815_v31  ;;  %7539 = vst [vmem:[#allocation40_spill] sm:$0xff] %v4936_v30  ;;  %7541 = vst [vmem:[#allocation42_spill] sm:$0xff] %v4942_v43  ;;  %v4950_v8 = vmul.f32 -0.13016199, %v4796_v12 }
 0x1d4   :  { %976 = vrot.lane.b32.xlu0 %v966_v62, %s4131_s16  ;;  %7537 = vst [vmem:[#allocation38_spill] sm:$0xff] %v4928_v45  ;;  %v4955_v30 = vmul.f32 -0.27748907, %v4815_v31  ;;  %v4961_v43 = vmul.f32 0.023853134, %v4804_v56 }
 0x1d5   :  { %v4914_v48 = vpop.permute.xlu1 %578  ;;  %7543 = vst [vmem:[#allocation44_spill] sm:$0xff] %v4950_v8  ;;  %v709_v59 = vmul.f32 0.08760139, %v4617_v32  ;;  %v708_v12 = vmul.f32 0.08760139, %v4620_v20 }
 0x1d6   :  { %7535 = vst [vmem:[#allocation36_spill] sm:$0xff] %v4914_v48  ;;  %v4925_v62 = vpop.permute.xlu0 %576  ;;  %v4939_v48 = vmul.f32 0.16683877, %v4817_v34  ;;  %7545 = vst [vmem:[#allocation46_spill] sm:$0xff] %v4955_v30  ;;  %v4977_v56 = vmul.f32 0.023853134, %v4815_v31 }
 0x1d7   :  { %7536 = vst [vmem:[#allocation37_spill] sm:$0xff] %v4925_v62  ;;  %998 = vrot.lane.b32.xlu1 %v989_v2, %s4131_s16  ;;  %v4946_v62 = vmul.f32 -0.27748907, %v4813_v15  ;;  %7547 = vst [vmem:[#allocation48_spill] sm:$0xff] %v4961_v43  ;;  %v4980_v43 = vmul.f32 0.08760139, %v4625_v60 }
 0x1d8   :  { %7540 = vst [vmem:[#allocation41_spill] sm:$0xff] %v4939_v48  ;;  %996 = vrot.lane.b32.xlu0 %v988_v58, %s4131_s16  ;;  %v4958_v48 = vmul.f32 -0.27748907, %v4817_v34  ;;  %v371_v34 = vadd.f32 %v4533_v5, %v4701_v26  ;;  %7551 = vst [vmem:[#allocation51_spill] sm:$0xff] %v4977_v56  ;;  %v4997_v31 = vmul.f32 0.14168324, %v4625_v60 }
 0x1d9   :  { %7542 = vst [vmem:[#allocation43_spill] sm:$0xff] %v4946_v62  ;;  %v4952_v2 = vpop.permute.xlu1 %598  ;;  %v4966_v62 = vmul.f32 0.023853134, %v4813_v15  ;;  %v2530_v15 = vmul.f32 -0.08829191, %v4769_v51  ;;  %v7553_v56 = vld [vmem:[#allocation5_spill] sm:$0xff] }
 0x1da   :  { %7544 = vst [vmem:[#allocation45_spill] sm:$0xff] %v4952_v2  ;;  %7546 = vst [vmem:[#allocation47_spill] sm:$0xff] %v4958_v48  ;;  %v4963_v58 = vpop.permute.xlu0 %596  ;;  %v7550_v2 = vrot.slane %v4896_v29, 1  ;;  %v5000_v51 = vmul.f32 0.14168324, %v4628_v19  ;;  %v5004_v48 = vadd.f32 %v7553_v56, %v4726_v39 }
 0x1db   :  { %7548 = vst [vmem:[#allocation49_spill] sm:$0xff] %v4963_v58  ;;  %7549 = vst [vmem:[#allocation50_spill] sm:$0xff] %v4966_v62  ;;  %1002 = vrot.lane.b32.xlu1 %v991_v50, %s4131_s16  ;;  %v4985_v62 = vmul.f32 0.08760139, %v4628_v19  ;;  %v4994_v50 = vmul.f32 0.14168324, %v4620_v20  ;;  %v5016_v58 = vadd.f32 %v4750_v49, %v371_v34 }
 0x1dc   :  { %v2611_v45 = vsel %vm88_vm0, %v2609_v42, %v7550_v2  ;;  %1000 = vrot.lane.b32.xlu0 %v990_v35, %s4131_s16  ;;  %v4988_v42 = vmul.f32 0.14168324, %v4617_v32  ;;  %v2697_v2 = vrot.slane %v2688_v28, 2  ;;  %7554 = vst [vmem:[#allocation5_spill] sm:$0xff] %v5004_v48  ;;  %v5009_v28 = vmul.f32 -0.18229428, %v4617_v32 }
 0x1dd   :  { %v4991_v26 = vpop.permute.xlu1 %602  ;;  %v2618_v35 = vadd.f32 %v2611_v45, %v2530_v15  ;;  %v2808_v5 = vmul.f32 0.1494566, %v4798_v47  ;;  %7557 = vst [vmem:[#allocation55_spill] sm:$0xff] %v5016_v58  ;;  %v5020_v15 = vmul.f32 -0.18229428, %v4620_v20  ;;  %v537_v45 = vadd.f32 %v4778_v53, %v4827_v38 }
 0x1de   :  { %7552 = vst [vmem:[#allocation52_spill] sm:$0xff] %v4991_v26  ;;  %v5006_v30 = vpop.permute.xlu0 %600  ;;  %7556 = vst [vmem:[#allocation54_spill] sm:$0xff] %v5009_v28  ;;  %v5013_v26 = vmul.f32 0.1494566, %v4800_v14  ;;  %v2598_v39 = vmul.f32 0.21983853, %v4734_v24  ;;  %v536_v58 = vadd.f32 %v4782_v36, %v4833_v40 }
 0x1df   :  { %7555 = vst [vmem:[#allocation53_spill] sm:$0xff] %v5006_v30  ;;  %1022 = vrot.lane.b32.xlu1 %v1013_v41, %s4131_s16  ;;  %7558 = vst [vmem:[#allocation56_spill] sm:$0xff] %v5020_v15  ;;  %v5024_v56 = vmul.f32 0.21983853, %v4729_v57  ;;  %v5030_v48 = vmul.f32 -0.18229428, %v4625_v60 }
 0x1e0   :  { %1020 = vrot.lane.b32.xlu0 %v1012_v18, %s4131_s16  ;;  %v5033_v49 = vmul.f32 -0.18229428, %v4628_v19  ;;  %v7561_v34 = vrot.slane %v4950_v8, 2  ;;  %v5041_v15 = vmul.f32 -0.27119434, %v4617_v32  ;;  %v2818_v28 = vrot.slane %v5013_v26, 1 }
 0x1e1   :  { %7559 = vst [vmem:[#allocation57_spill] sm:$0xff] %v5030_v48  ;;  %v623_v30 = vpop.permute.xlu1 %622  ;;  %v5044_v53 = vmul.f32 -0.27119434, %v4620_v20  ;;  %v2734_v19 = vmul.f32 0.16387258, %v4798_v47  ;;  %v2606_v40 = vrot.slane %v2598_v39, 1  ;;  %v539_v20 = vadd.f32 %v4789_v63, %v4836_v1 }
 0x1e2   :  { %7560 = vst [vmem:[#allocation58_spill] sm:$0xff] %v5033_v49  ;;  %v2699_v41 = vsel %vm171_vm1, %v2697_v2, %v7561_v34  ;;  %v633_v38 = vadd.f32 %v623_v30, %v537_v45  ;;  %v621_v48 = vpop.permute.xlu0 %620  ;;  %v2817_v49 = vrot.slane %v2808_v5, 1  ;;  %v2896_v36 = vmul.f32 0.25975567, %v4798_v47 }
 0x1e3   :  { %v2706_v18 = vadd.f32 %v2699_v41, %v2618_v35  ;;  %v632_v8 = vadd.f32 %v621_v48, %v536_v58  ;;  %1026 = vrot.lane.b32.xlu1 %v4906_v13, %s4131_s16  ;;  %v2607_v32 = vrot.slane %v5024_v56, 1  ;;  %v538_v30 = vadd.f32 %v4792_v44, %v4839_v3 }
 0x1e4   :  { %1024 = vrot.lane.b32.xlu0 %v4909_v7, %s4131_s16  ;;  %v5058_v2 = vadd.f32 %v709_v59, %v633_v38  ;;  %v5061_v48 = vmul.f32 0.25975567, %v4800_v14  ;;  %v2686_v35 = vmul.f32 -0.13016199, %v4734_v24  ;;  %v5067_v39 = vmul.f32 -0.13016199, %v4729_v57 }
 0x1e5   :  { %v627_v13 = vpop.permute.xlu1 %626  ;;  %v5063_v58 = vadd.f32 %v708_v12, %v632_v8  ;;  %v2738_v5 = vadd.f32 %v2734_v19, %v2706_v18  ;;  %v561_v63 = vadd.f32 %v4819_v23, %v4843_v10  ;;  %v5072_v3 = vmul.f32 -0.27119434, %v4625_v60 }
 0x1e6   :  { %v635_v44 = vadd.f32 %v627_v13, %v539_v20  ;;  %v625_v1 = vpop.permute.xlu0 %624  ;;  %v2819_v59 = vsel %vm88_vm0, %v2817_v49, %v2818_v28  ;;  %v560_v19 = vadd.f32 %v4829_v0, %v4846_v27  ;;  %v2905_v8 = vrot.slane %v2896_v36, 2 }
 0x1e7   :  { %v634_v12 = vadd.f32 %v625_v1, %v538_v30  ;;  %1046 = vrot.lane.b32.xlu1 %v4912_v33, %s4131_s16  ;;  %v2608_v23 = vsel %vm88_vm0, %v2606_v40, %v2607_v32  ;;  %v2906_v10 = vrot.slane %v5061_v48, 2  ;;  %v5091_v7 = vmul.f32 -0.23166963, %v4802_v11 }
 0x1e8   :  { %1044 = vrot.lane.b32.xlu0 %v4917_v25, %s4131_s16  ;;  %v5087_v60 = vadd.f32 %v4980_v43, %v635_v44  ;;  %v2528_v0 = vmul.f32 -0.08829191, %v4734_v24  ;;  %v2826_v45 = vadd.f32 %v2819_v59, %v2738_v5  ;;  %v2694_v49 = vrot.slane %v2686_v35, 2 }
 0x1e9   :  { %v647_v27 = vpop.permute.xlu1 %646  ;;  %v5095_v33 = vadd.f32 %v4985_v62, %v634_v12  ;;  %v2695_v34 = vrot.slane %v5067_v39, 2  ;;  %v2942_v43 = vmul.f32 -0.055673026, %v4802_v11  ;;  %v5100_v18 = vmul.f32 -0.23166963, %v4807_v54  ;;  %v7562_v12 = vld [vmem:[#allocation38_spill] sm:$0xff] }
 0x1ea   :  { %v657_v41 = vadd.f32 %v647_v27, %v561_v63  ;;  %v645_v25 = vpop.permute.xlu0 %644  ;;  %v2616_v38 = vadd.f32 %v2608_v23, %v2528_v0  ;;  %v563_v36 = vadd.f32 %v4852_v52, %v4850_v46  ;;  %v562_v40 = vadd.f32 %v4859_v55, %v4855_v4  ;;  %v7564_v0 = vld [vmem:[#allocation39_spill] sm:$0xff]  ;;  %v7583_v39 = vld [vmem:[#allocation52_spill] sm:$0xff] }
 0x1eb   :  { %v656_v62 = vadd.f32 %v645_v25, %v560_v19  ;;  %1050 = vrot.lane.b32.xlu1 %v4920_v22, %s4131_s16  ;;  %v5109_v20 = vmul.f32 -0.08776471, %v4802_v11  ;;  %v2907_v46 = vsel %vm171_vm1, %v2905_v8, %v2906_v10  ;;  %v3025_v52 = vrot.slane %v5091_v7, 1  ;;  %v7563_v8 = vld [vmem:[#allocation17_spill] sm:$0xff] }
 0x1ec   :  { %1048 = vrot.lane.b32.xlu0 %v4923_v6, %s4131_s16  ;;  %v5114_v30 = vadd.f32 %v4988_v42, %v657_v41  ;;  %v2806_v4 = vmul.f32 0.1494566, %v4742_v17  ;;  %v2914_v13 = vadd.f32 %v2907_v46, %v2826_v45  ;;  %v2696_v6 = vsel %vm171_vm1, %v2694_v49, %v2695_v34 }
 0x1ed   :  { %v651_v55 = vpop.permute.xlu1 %650  ;;  %v5122_v22 = vadd.f32 %v4994_v50, %v656_v62  ;;  %v5128_v42 = vmul.f32 0.1494566, %v4736_v16  ;;  %v3026_v63 = vrot.slane %v5100_v18, 1  ;;  %v5132_v44 = vmul.f32 -0.08776471, %v4807_v54 }
 0x1ee   :  { %v659_v5 = vadd.f32 %v651_v55, %v563_v36  ;;  %v649_v35 = vpop.permute.xlu0 %648  ;;  %v2704_v1 = vadd.f32 %v2696_v6, %v2616_v38  ;;  %v585_v50 = vadd.f32 %v4882_v37, %v4862_v61  ;;  %v584_v59 = vadd.f32 %v4889_v21, %v4865_v9  ;;  %v7567_v55 = vld [vmem:[#allocation36_spill] sm:$0xff] }
 0x1ef   :  { %v658_v19 = vadd.f32 %v649_v35, %v562_v40  ;;  %1070 = vrot.lane.b32.xlu1 %v7562_v12, %s4132_s0  ;;  %v2531_v23 = vmul.f32 -0.08829191, %v7563_v8  ;;  %v2732_v45 = vmul.f32 0.16387258, %v4742_v17  ;;  %v2814_v49 = vrot.slane %v2806_v4, 1  ;;  %v7566_v4 = vld [vmem:[#allocation30_spill] sm:$0xff] }
 0x1f0   :  { %1068 = vrot.lane.b32.xlu0 %v7564_v0, %s4132_s0  ;;  %v5144_v27 = vadd.f32 %v4997_v31, %v659_v5  ;;  %v2894_v61 = vmul.f32 0.25975567, %v4742_v17  ;;  %v2815_v9 = vrot.slane %v5128_v42, 1  ;;  %v2895_v41 = vmul.f32 0.25975567, %v4736_v16  ;;  %v7569_v42 = vld [vmem:[#allocation44_spill] sm:$0xff] }
 0x1f1   :  { %v671_v37 = vpop.permute.xlu1 %670  ;;  %v5149_v21 = vadd.f32 %v5000_v51, %v658_v19  ;;  %v7565_v25 = vrot.slane %v4896_v29, 1  ;;  %v5155_v31 = vadd.f32 %v2942_v43, %v2914_v13  ;;  %v2736_v62 = vadd.f32 %v2732_v45, %v2704_v1  ;;  %v7568_v51 = vld [vmem:[#allocation40_spill] sm:$0xff]  ;;  %v7571_v12 = vld [vmem:[#allocation31_spill] sm:$0xff]  ;;  %v7573_v43 = vld [vmem:[#allocation41_spill] sm:$0xff] }
 0x1f2   :  { %v681_v36 = vadd.f32 %v671_v37, %v585_v50  ;;  %v669_v40 = vpop.permute.xlu0 %668  ;;  %v2529_v46 = vmul.f32 -0.08829191, %v4729_v57  ;;  %v587_v6 = vadd.f32 %v7567_v55, %v7566_v4  ;;  %v7570_v35 = vrot.slane %v7569_v42, 2  ;;  %v7572_v50 = vld [vmem:[#allocation37_spill] sm:$0xff]  ;;  %v7574_v13 = vld [vmem:[#allocation54_spill] sm:$0xff]  ;;  %v7575_v37 = vld [vmem:[#allocation56_spill] sm:$0xff] }
 0x1f3   :  { %v2619_v38 = vadd.f32 %v7565_v25, %v2531_v23  ;;  %v680_v5 = vadd.f32 %v669_v40, %v584_v59  ;;  %1074 = vrot.lane.b32.xlu1 %v7568_v51, %s4132_s0  ;;  %v2735_v29 = vmul.f32 0.16387258, %v4800_v14  ;;  %v586_v23 = vadd.f32 %v7572_v50, %v7571_v12  ;;  %v7577_v12 = vld [vmem:[#allocation45_spill] sm:$0xff] }
 0x1f4   :  { %1072 = vrot.lane.b32.xlu0 %v7573_v43, %s4132_s0  ;;  %v5170_v1 = vadd.f32 %v7574_v13, %v681_v36  ;;  %v2902_v0 = vrot.slane %v2894_v61, 2  ;;  %v2617_v59 = vadd.f32 %v2607_v32, %v2529_v46  ;;  %v2903_v40 = vrot.slane %v2895_v41, 2  ;;  %v7576_v61 = vld [vmem:[#allocation32_spill] sm:$0xff]  ;;  %v7578_v46 = vld [vmem:[#allocation42_spill] sm:$0xff]  ;;  %v7580_v41 = vld [vmem:[#allocation33_spill] sm:$0xff] }
 0x1f5   :  { %v2707_v19 = vadd.f32 %v7570_v35, %v2619_v38  ;;  %v675_v45 = vpop.permute.xlu1 %674  ;;  %v5175_v25 = vadd.f32 %v7575_v37, %v680_v5  ;;  %v2816_v38 = vsel %vm88_vm0, %v2814_v49, %v2815_v9  ;;  %v2733_v36 = vmul.f32 0.16387258, %v4736_v16  ;;  %v7579_v5 = vld [vmem:[#allocation11_spill] sm:$0xff]  ;;  %v7585_v43 = vld [vmem:[#allocation57_spill] sm:$0xff] }
 0x1f6   :  { %v683_v55 = vadd.f32 %v675_v45, %v587_v6  ;;  %v673_v51 = vpop.permute.xlu0 %672  ;;  %v2824_v42 = vadd.f32 %v2816_v38, %v2736_v62  ;;  %v2705_v35 = vadd.f32 %v2695_v34, %v2617_v59  ;;  %v609_v56 = vadd.f32 %v7577_v12, %v7576_v61  ;;  %v7581_v6 = vld [vmem:[#allocation49_spill] sm:$0xff]  ;;  %v7586_v45 = vld [vmem:[#allocation58_spill] sm:$0xff] }
 0x1f7   :  { %v2739_v4 = vadd.f32 %v2735_v29, %v2707_v19  ;;  %v682_v32 = vadd.f32 %v673_v51, %v586_v23  ;;  %1094 = vrot.lane.b32.xlu1 %v7578_v46, %s4132_s0  ;;  %v3014_v50 = vmul.f32 -0.23166963, %v7579_v5  ;;  %v608_v62 = vadd.f32 %v7581_v6, %v7580_v41  ;;  %v7582_v19 = vld [vmem:[#allocation34_spill] sm:$0xff]  ;;  %v7584_v29 = vld [vmem:[#allocation43_spill] sm:$0xff]  ;;  %v7589_v61 = vld [vmem:[#allocation53_spill] sm:$0xff] }
 0x1f8   :  { %v611_v34 = vadd.f32 %v7583_v39, %v7582_v19  ;;  %1092 = vrot.lane.b32.xlu0 %v7584_v29, %s4132_s0  ;;  %v5195_v13 = vadd.f32 %v7585_v43, %v683_v55  ;;  %v2737_v23 = vadd.f32 %v2733_v36, %v2705_v35  ;;  %v2904_v26 = vsel %vm171_vm1, %v2902_v0, %v2903_v40  ;;  %v7588_v51 = vld [vmem:[#allocation35_spill] sm:$0xff]  ;;  %v7590_v35 = vld [vmem:[#allocation46_spill] sm:$0xff] }
 0x1f9   :  { %v2827_v49 = vadd.f32 %v2818_v28, %v2739_v4  ;;  %v695_v59 = vpop.permute.xlu1 %694  ;;  %v5198_v37 = vadd.f32 %v7586_v45, %v682_v32  ;;  %v7587_v28 = vld [vmem:[#allocation12_spill] sm:$0xff]  ;;  %v610_v12 = vadd.f32 %v7589_v61, %v7588_v51  ;;  %v2912_v6 = vadd.f32 %v2904_v26, %v2824_v42  ;;  %v7591_v39 = vld [vmem:[#allocation47_spill] sm:$0xff] }
 0x1fa   :  { %v3015_v38 = vmul.f32 -0.23166963, %v7587_v28  ;;  %v705_v46 = vadd.f32 %v695_v59, %v609_v56  ;;  %v693_v41 = vpop.permute.xlu0 %692  ;;  %v2825_v55 = vadd.f32 %v2815_v9, %v2737_v23  ;;  %v2940_v36 = vmul.f32 -0.055673026, %v7579_v5  ;;  %v7592_v59 = vld [vmem:[#allocation6_spill] sm:$0xff]  ;;  %v7593_v61 = vld [vmem:[#allocation48_spill] sm:$0xff] }
 0x1fb   :  { %v2915_v4 = vadd.f32 %v2906_v10, %v2827_v49  ;;  %v704_v19 = vadd.f32 %v693_v41, %v608_v62  ;;  %1098 = vrot.lane.b32.xlu1 %v7590_v35, %s4132_s0  ;;  %v3022_v32 = vrot.slane %v3014_v50, 1  ;;  %v2943_v0 = vmul.f32 -0.055673026, %v4807_v54  ;;  %v7596_v35 = vld [vmem:[#allocation23_spill] sm:$0xff] }
 0x1fc   :  { %1096 = vrot.lane.b32.xlu0 %v7591_v39, %s4132_s0  ;;  %v5213_v48 = vadd.f32 %v5041_v15, %v705_v46  ;;  %v3102_v10 = vmul.f32 -0.08776471, %v7579_v5  ;;  %v2913_v56 = vadd.f32 %v2903_v40, %v2825_v55  ;;  %v2941_v9 = vmul.f32 -0.055673026, %v7587_v28 }
 0x1fd   :  { %v699_v42 = vpop.permute.xlu1 %698  ;;  %v5218_v49 = vadd.f32 %v5044_v53, %v704_v19  ;;  %v3023_v62 = vrot.slane %v3015_v38, 1  ;;  %v3103_v50 = vmul.f32 -0.08776471, %v7587_v28  ;;  %v2947_v29 = vadd.f32 %v2943_v0, %v2915_v4  ;;  %v7595_v4 = vld [vmem:[#allocation27_spill] sm:$0xff]  ;;  %v7597_v0 = vld [vmem:[#allocation24_spill] sm:$0xff] }
 0x1fe   :  { %v707_v43 = vadd.f32 %v699_v42, %v611_v34  ;;  %v697_v23 = vpop.permute.xlu0 %696  ;;  %v734_v45 = vmul.f32 -0.27119434, %v7592_v59  ;;  %v2944_v26 = vadd.f32 %v2940_v36, %v2912_v6  ;;  %v2945_v15 = vadd.f32 %v2941_v9, %v2913_v56  ;;  %v7594_v34 = vld [vmem:[#allocation50_spill] sm:$0xff]  ;;  %v7599_v9 = vld [vmem:[#allocation5_spill] sm:$0xff]  ;;  %v7600_v42 = vld [vmem:[#allocation15_spill] sm:$0xff] }
 0x1ff   :  { %v706_v51 = vadd.f32 %v697_v23, %v610_v12  ;;  %1118 = vrot.lane.b32.xlu1 %v7593_v61, %s4132_s0  ;;  %v3027_v53 = vsel %vm88_vm0, %v3025_v52, %v3026_v63  ;;  %v3113_v40 = vrot.slane %v5109_v20, 2  ;;  %v3114_v38 = vrot.slane %v5132_v44, 2  ;;  %v7601_v23 = vld [vmem:[#allocation51_spill] sm:$0xff]  ;;  %v7604_v59 = vld [vmem:[#allocation26_spill] sm:$0xff] }
 0x200   :  { %1116 = vrot.lane.b32.xlu0 %v7594_v34, %s4132_s0  ;;  %v1110_v46 = vmul.f32 0.023853134, %v7595_v4  ;;  %v5235_v12 = vadd.f32 %v5072_v3, %v707_v43  ;;  %v3034_v41 = vadd.f32 %v3027_v53, %v5155_v31  ;;  %v3110_v6 = vrot.slane %v3102_v10, 2  ;;  %v7598_v31 = vld [vmem:[#allocation55_spill] sm:$0xff]  ;;  %v7606_v34 = vld [vmem:[#allocation13_spill] sm:$0xff] }
 0x201   :  { %v5238_v55 = vpop.permute.xlu1 %750  ;;  %v5240_v7 = vadd.f32 %v734_v45, %v706_v51  ;;  %v3024_v52 = vsel %vm88_vm0, %v3022_v32, %v3023_v62  ;;  %v3111_v20 = vrot.slane %v3103_v50, 2  ;;  %v3035_v44 = vadd.f32 %v3026_v63, %v2947_v29  ;;  %v7602_v32 = vld [vmem:[#allocation21_spill] sm:$0xff] }
 0x202   :  { %v5245_v19 = vpop.permute.xlu0 %748  ;;  %v3224_v36 = vmul.f32 -0.17263049, %v7596_v35  ;;  %v3225_v3 = vmul.f32 -0.17263049, %v7597_v0  ;;  %v3032_v39 = vadd.f32 %v3024_v52, %v2944_v26  ;;  %v3033_v56 = vadd.f32 %v3023_v62, %v2945_v15  ;;  %v7603_v63 = vld [vmem:[#allocation25_spill] sm:$0xff]  ;;  %v7605_v62 = vld [vmem:[#allocation14_spill] sm:$0xff] }
 0x203   :  { %v495_v10 = vadd.f32 -0.00463471, %v7598_v31  ;;  %v466_v43 = vadd.f32 %v7600_v42, %v7599_v9  ;;  %1122 = vrot.lane.b32.xlu1 %v7601_v23, %s4132_s0  ;;  %v1133_v50 = vmul.f32 -0.22459576, %v7602_v32  ;;  %v3115_v18 = vsel %vm171_vm1, %v3113_v40, %v3114_v38 }
 0x204   :  { %1120 = vrot.lane.b32.xlu0 %v1110_v46, %s4132_s0  ;;  %v1132_v29 = vmul.f32 -0.22459576, %v7603_v63  ;;  %v1135_v45 = vmul.f32 -0.22459576, %v7604_v59  ;;  %v3122_v26 = vadd.f32 %v3115_v18, %v3034_v41  ;;  %v3222_v15 = vmul.f32 -0.17263049, %v7605_v62 }
 0x205   :  { %v5260_v51 = vpop.permute.xlu1 %754  ;;  %v3150_v61 = vmul.f32 0.25560838, %v7596_v35  ;;  %v3112_v53 = vsel %vm171_vm1, %v3110_v6, %v3111_v20  ;;  %v3223_v52 = vmul.f32 -0.17263049, %v7606_v34  ;;  %v3123_v31 = vadd.f32 %v3114_v38, %v3035_v44 }
 0x206   :  { %v5265_v9 = vpop.permute.xlu0 %752  ;;  %v3233_v40 = vrot.slane %v3224_v36, 1  ;;  %v3234_v46 = vrot.slane %v3225_v3, 1  ;;  %v3120_v42 = vadd.f32 %v3112_v53, %v3032_v39  ;;  %v3121_v23 = vadd.f32 %v3111_v20, %v3033_v56 }
 0x207   :  { %1142 = vrot.lane.b32.xlu1 %v1133_v50, %s4132_s0  ;;  %v3312_v41 = vmul.f32 -0.13244678, %v7596_v35  ;;  %v3313_v18 = vmul.f32 -0.13244678, %v7597_v0  ;;  %v3151_v54 = vmul.f32 0.25560838, %v7597_v0  ;;  %v3154_v6 = vadd.f32 %v3150_v61, %v3122_v26 }
 0x208   :  { %1140 = vrot.lane.b32.xlu0 %v1132_v29, %s4132_s0  ;;  %v3148_v11 = vmul.f32 0.25560838, %v7605_v62  ;;  %v3230_v38 = vrot.slane %v3222_v15, 1  ;;  %v3149_v44 = vmul.f32 0.25560838, %v7606_v34  ;;  %v3231_v3 = vrot.slane %v3223_v52, 1 }
 0x209   :  { %v5274_v36 = vpop.permute.xlu1 %774  ;;  %v3310_v20 = vmul.f32 -0.13244678, %v7605_v62  ;;  %v3311_v39 = vmul.f32 -0.13244678, %v7606_v34  ;;  %v3155_v56 = vadd.f32 %v3151_v54, %v3123_v31  ;;  %v494_v50 = vadd.f32 -0.00463471, %v466_v43 }
 0x20a   :  { %v5278_v53 = vpop.permute.xlu0 %772  ;;  %v1134_v0 = vmul.f32 -0.22459576, %v7595_v4  ;;  %v3152_v29 = vadd.f32 %v3148_v11, %v3120_v42  ;;  %v3153_v26 = vadd.f32 %v3149_v44, %v3121_v23  ;;  %v5281_v61 = vmax.f32 %v495_v10, 0.0  ;;  %v7607_v52 = vld [vmem:[#allocation28_spill] sm:$0xff] }
 0x20b   :  { %1146 = vrot.lane.b32.xlu1 %v1135_v45, %s4132_s0  ;;  %v3235_v15 = vsel %vm88_vm0, %v3233_v40, %v3234_v46  ;;  %v1189_v35 = vmul.f32 -0.19621597, %v7607_v52  ;;  %v3321_v34 = vrot.slane %v3312_v41, 2  ;;  %v3322_v54 = vrot.slane %v3313_v18, 2  ;;  %v7608_v45 = vld [vmem:[#allocation29_spill] sm:$0xff] }
 0x20c   :  { %1144 = vrot.lane.b32.xlu0 %v1134_v0, %s4132_s0  ;;  %v3242_v62 = vadd.f32 %v3235_v15, %v3154_v6  ;;  %v3232_v31 = vsel %vm88_vm0, %v3230_v38, %v3231_v3  ;;  %v3318_v14 = vrot.slane %v3310_v20, 2  ;;  %v3319_v11 = vrot.slane %v3311_v39, 2 }
 0x20d   :  { %v5287_v43 = vpop.permute.xlu1 %778  ;;  %v3243_v42 = vadd.f32 %v3234_v46, %v3155_v56  ;;  %v5290_v10 = vmax.f32 %v494_v50, 0.0  ;;  %v1188_v40 = vmul.f32 -0.19621597, %v7608_v45  ;;  %v3240_v44 = vadd.f32 %v3232_v31, %v3152_v29 }
 0x20e   :  { %v5292_v23 = vpop.permute.xlu0 %776  ;;  %v3241_v0 = vadd.f32 %v3231_v3, %v3153_v26  ;;  %v3323_v41 = vsel %vm171_vm1, %v3321_v34, %v3322_v54  ;;  %v1191_v6 = vmul.f32 -0.19621597, %v5281_v61  ;;  %v3320_v46 = vsel %vm171_vm1, %v3318_v14, %v3319_v11 }
 0x20f   :  { %1198 = vrot.lane.b32.xlu1 %v1189_v35, %s4131_s16  ;;  %v3330_v38 = vadd.f32 %v3323_v41, %v3242_v62  ;;  %v3331_v20 = vadd.f32 %v3322_v54, %v3243_v42  ;;  %v1190_v56 = vmul.f32 -0.19621597, %v5290_v10  ;;  %v3328_v50 = vadd.f32 %v3320_v46, %v3240_v44 }
 0x210   :  { %1196 = vrot.lane.b32.xlu0 %v1188_v40, %s4131_s16  ;;  %v3329_v3 = vadd.f32 %v3319_v11, %v3241_v0  ;;  %v1213_v34 = vmul.f32 0.09244051, %v7607_v52  ;;  %v1212_v14 = vmul.f32 0.09244051, %v7608_v45  ;;  %v1215_v11 = vmul.f32 0.09244051, %v5281_v61 }
 0x211   :  { %v5298_v18 = vpop.permute.xlu1 %798  ;;  %v3358_v29 = vadd.f32 0.12873971, %v3330_v38  ;;  %v3359_v26 = vadd.f32 0.12873971, %v3331_v20  ;;  %v3356_v15 = vadd.f32 0.12873971, %v3328_v50  ;;  %v760_v47 = vadd.f32 %v5245_v19, %v5063_v58 }
 0x212   :  { %v5302_v39 = vpop.permute.xlu0 %796  ;;  %v3357_v54 = vadd.f32 0.12873971, %v3329_v3  ;;  %v1214_v0 = vmul.f32 0.09244051, %v5290_v10  ;;  %v1237_v38 = vmul.f32 -0.16237749, %v7607_v52 }
 0x213   :  { %1202 = vrot.lane.b32.xlu1 %v1191_v6, %s4131_s16  ;;  %v5318_v42 = vmax.f32 %v3358_v29, 0.0  ;;  %v5320_v40 = vmax.f32 %v3359_v26, 0.0  ;;  %v5325_v41 = vmax.f32 %v3356_v15, 0.0  ;;  %v1236_v46 = vmul.f32 -0.16237749, %v7608_v45 }
 0x214   :  { %1200 = vrot.lane.b32.xlu0 %v1190_v56, %s4131_s16  ;;  %v5327_v6 = vmax.f32 %v3357_v54, 0.0  ;;  %v1239_v56 = vmul.f32 -0.16237749, %v5281_v61  ;;  %v1238_v29 = vmul.f32 -0.16237749, %v5290_v10  ;;  %v761_v15 = vadd.f32 %v5238_v55, %v5058_v2 }
 0x215   :  { %v5307_v35 = vpop.permute.xlu1 %802  ;;  %7609 = vst [vmem:[#allocation38_spill] sm:$0xff] %v5318_v42  ;;  %7610 = vst [vmem:[#allocation39_spill] sm:$0xff] %v5320_v40  ;;  %v3848_v50 = vmul.f32 -0.150617, %v5318_v42  ;;  %v3849_v3 = vmul.f32 -0.150617, %v5320_v40 }
 0x216   :  { %v5310_v62 = vpop.permute.xlu0 %800  ;;  %7611 = vst [vmem:[#allocation30_spill] sm:$0xff] %v5325_v41  ;;  %7612 = vst [vmem:[#allocation36_spill] sm:$0xff] %v5327_v6  ;;  %v3846_v26 = vmul.f32 -0.150617, %v5325_v41  ;;  %v3911_v8 = vmul.f32 0.15554655, %v5320_v40 }
 0x217   :  { %1222 = vrot.lane.b32.xlu1 %v1213_v34, %s4131_s16  ;;  %v3857_v54 = vrot.slane %v3848_v50, 1  ;;  %v3908_v55 = vmul.f32 0.15554655, %v5325_v41 }
 0x218   :  { %1220 = vrot.lane.b32.xlu0 %v1212_v14, %s4131_s16  ;;  %v3847_v14 = vmul.f32 -0.150617, %v5327_v6  ;;  %v3854_v28 = vrot.slane %v3846_v26, 1  ;;  %v3920_v19 = vrot.slane %v3911_v8, 2  ;;  %v932_v26 = vmul.f32 -0.10071947, %v7603_v63 }
 0x219   :  { %v5315_v31 = vpop.permute.xlu1 %822  ;;  %v762_v8 = vadd.f32 %v5265_v9, %v5095_v33  ;;  %v785_v33 = vadd.f32 %v5274_v36, %v5114_v30  ;;  %v940_v30 = vmul.f32 -0.23430985, %v7603_v63  ;;  %v787_v36 = vadd.f32 %v5287_v43, %v5144_v27 }
 0x21a   :  { %v5322_v44 = vpop.permute.xlu0 %820  ;;  %v3855_v5 = vrot.slane %v3847_v14, 1  ;;  %v3916_v14 = vrot.slane %v3908_v55, 2  ;;  %v784_v55 = vadd.f32 %v5278_v53, %v5122_v22  ;;  %v786_v53 = vadd.f32 %v5292_v23, %v5149_v21 }
 0x21b   :  { %1226 = vrot.lane.b32.xlu1 %v1215_v11, %s4131_s16  ;;  %v3858_v11 = vrot.slane %v3849_v3, 1  ;;  %v942_v27 = vmul.f32 -0.23430985, %v7595_v4  ;;  %v809_v43 = vadd.f32 %v5298_v18, %v5170_v1  ;;  %v808_v23 = vadd.f32 %v5302_v39, %v5175_v25 }
 0x21c   :  { %1224 = vrot.lane.b32.xlu0 %v1214_v0, %s4131_s16  ;;  %v3910_v0 = vmul.f32 0.15554655, %v5318_v42  ;;  %v933_v42 = vmul.f32 -0.10071947, %v7602_v32  ;;  %v5358_v58 = vsel %vm88_vm0, %v3854_v28, %v3855_v5  ;;  %v1261_v5 = vmul.f32 -0.14358482, %v7607_v52 }
 0x21d   :  { %v5333_v20 = vpop.permute.xlu1 %826  ;;  %v5352_v17 = vsel %vm88_vm0, %v3857_v54, %v3858_v11  ;;  %7614 = vst [vmem:[#allocation44_spill] sm:$0xff] %v5358_v58  ;;  %v763_v11 = vadd.f32 %v5260_v51, %v5087_v60  ;;  %v1260_v51 = vmul.f32 -0.14358482, %v7608_v45  ;;  %v948_v1 = vmul.f32 0.13359335, %v7603_v63 }
 0x21e   :  { %v5338_v34 = vpop.permute.xlu0 %824  ;;  %7613 = vst [vmem:[#allocation40_spill] sm:$0xff] %v5352_v17  ;;  %v3919_v2 = vrot.slane %v3910_v0, 2  ;;  %v811_v18 = vadd.f32 %v5307_v35, %v5195_v13  ;;  %v810_v39 = vadd.f32 %v5310_v62, %v5198_v37  ;;  %v950_v13 = vmul.f32 0.13359335, %v7595_v4 }
 0x21f   :  { %1246 = vrot.lane.b32.xlu1 %v1237_v38, %s4131_s16  ;;  %v3909_v38 = vmul.f32 0.15554655, %v5327_v6  ;;  %v833_v35 = vadd.f32 %v5315_v31, %v5213_v48  ;;  %v832_v62 = vadd.f32 %v5322_v44, %v5218_v49  ;;  %v956_v48 = vmul.f32 -0.160851, %v7603_v63 }
 0x220   :  { %1244 = vrot.lane.b32.xlu0 %v1236_v46, %s4131_s16  ;;  %v835_v31 = vadd.f32 %v5333_v20, %v5235_v12  ;;  %v834_v44 = vadd.f32 %v5338_v34, %v5240_v7  ;;  %v959_v63 = vmul.f32 -0.160851, %v7604_v59  ;;  %v958_v12 = vmul.f32 -0.160851, %v7595_v4 }
 0x221   :  { %v847_v16 = vpop.permute.xlu1 %846  ;;  %v3917_v54 = vrot.slane %v3909_v38, 2  ;;  %v1335_v34 = vmul.f32 0.14373761, %v5281_v61 }
 0x222   :  { %v857_v50 = vadd.f32 %v847_v16, %v761_v15  ;;  %v845_v3 = vpop.permute.xlu0 %844  ;;  %v5368_v15 = vsel %vm171_vm1, %v3919_v2, %v3920_v19  ;;  %v934_v2 = vmul.f32 -0.10071947, %v7595_v4 }
 0x223   :  { %v856_v46 = vadd.f32 %v845_v3, %v760_v47  ;;  %1250 = vrot.lane.b32.xlu1 %v1239_v56, %s4131_s16  ;;  %7615 = vst [vmem:[#allocation31_spill] sm:$0xff] %v5368_v15  ;;  %v5376_v56 = vsel %vm171_vm1, %v3916_v14, %v3917_v54  ;;  %v941_v14 = vmul.f32 -0.23430985, %v7602_v32 }
 0x224   :  { %1248 = vrot.lane.b32.xlu0 %v1238_v29, %s4131_s16  ;;  %v5365_v16 = vadd.f32 %v933_v42, %v857_v50  ;;  %7616 = vst [vmem:[#allocation37_spill] sm:$0xff] %v5376_v56  ;;  %v935_v42 = vmul.f32 -0.10071947, %v7604_v59  ;;  %v1263_v50 = vmul.f32 -0.14358482, %v5281_v61 }
 0x225   :  { %v851_v47 = vpop.permute.xlu1 %850  ;;  %v5373_v28 = vadd.f32 %v932_v26, %v856_v46  ;;  %v1262_v26 = vmul.f32 -0.14358482, %v5290_v10 }
 0x226   :  { %v859_v0 = vadd.f32 %v851_v47, %v763_v11  ;;  %v849_v60 = vpop.permute.xlu0 %848 }
 0x227   :  { %v858_v29 = vadd.f32 %v849_v60, %v762_v8  ;;  %1270 = vrot.lane.b32.xlu1 %v1261_v5, %s4131_s16  ;;  %v1285_v8 = vmul.f32 0.2506922, %v7607_v52  ;;  %v1284_v60 = vmul.f32 0.2506922, %v7608_v45 }
 0x228   :  { %1268 = vrot.lane.b32.xlu0 %v1260_v51, %s4131_s16  ;;  %v5385_v9 = vadd.f32 %v935_v42, %v859_v0  ;;  %v943_v51 = vmul.f32 -0.23430985, %v7604_v59 }
 0x229   :  { %v871_v38 = vpop.permute.xlu1 %870  ;;  %v5390_v3 = vadd.f32 %v934_v2, %v858_v29  ;;  %v1287_v2 = vmul.f32 0.2506922, %v5281_v61 }
 0x22a   :  { %v881_v19 = vadd.f32 %v871_v38, %v785_v33  ;;  %v869_v46 = vpop.permute.xlu0 %868 }
 0x22b   :  { %v880_v54 = vadd.f32 %v869_v46, %v784_v55  ;;  %1274 = vrot.lane.b32.xlu1 %v1263_v50, %s4131_s16  ;;  %v1286_v50 = vmul.f32 0.2506922, %v5290_v10 }
 0x22c   :  { %1272 = vrot.lane.b32.xlu0 %v1262_v26, %s4131_s16  ;;  %v5399_v22 = vadd.f32 %v941_v14, %v881_v19  ;;  %v949_v19 = vmul.f32 0.13359335, %v7602_v32  ;;  %v1309_v14 = vmul.f32 0.28318208, %v7607_v52 }
 0x22d   :  { %v875_v11 = vpop.permute.xlu1 %874  ;;  %v5404_v47 = vadd.f32 %v940_v30, %v880_v54 }
 0x22e   :  { %v883_v5 = vadd.f32 %v875_v11, %v787_v36  ;;  %v873_v0 = vpop.permute.xlu0 %872  ;;  %v951_v11 = vmul.f32 0.13359335, %v7604_v59 }
 0x22f   :  { %v882_v42 = vadd.f32 %v873_v0, %v786_v53  ;;  %1294 = vrot.lane.b32.xlu1 %v1285_v8, %s4132_s0  ;;  %v1308_v53 = vmul.f32 0.28318208, %v7608_v45  ;;  %v1311_v0 = vmul.f32 0.28318208, %v5281_v61 }
 0x230   :  { %1292 = vrot.lane.b32.xlu0 %v1284_v60, %s4132_s0  ;;  %v5413_v21 = vadd.f32 %v943_v51, %v883_v5 }
 0x231   :  { %v895_v29 = vpop.permute.xlu1 %894  ;;  %v5418_v33 = vadd.f32 %v942_v27, %v882_v42  ;;  %v1310_v27 = vmul.f32 0.28318208, %v5290_v10 }
 0x232   :  { %v905_v55 = vadd.f32 %v895_v29, %v809_v43  ;;  %v893_v38 = vpop.permute.xlu0 %892  ;;  %v957_v43 = vmul.f32 -0.160851, %v7602_v32 }
 0x233   :  { %v904_v46 = vadd.f32 %v893_v38, %v808_v23  ;;  %1298 = vrot.lane.b32.xlu1 %v1287_v2, %s4132_s0  ;;  %v1333_v2 = vmul.f32 0.14373761, %v7607_v52 }
 0x234   :  { %1296 = vrot.lane.b32.xlu0 %v1286_v50, %s4132_s0  ;;  %v5427_v25 = vadd.f32 %v949_v19, %v905_v55  ;;  %v1332_v50 = vmul.f32 0.14373761, %v7608_v45 }
 0x235   :  { %v899_v26 = vpop.permute.xlu1 %898  ;;  %v5432_v54 = vadd.f32 %v948_v1, %v904_v46 }
 0x236   :  { %v907_v30 = vadd.f32 %v899_v26, %v811_v18  ;;  %v897_v36 = vpop.permute.xlu0 %896  ;;  %v1334_v18 = vmul.f32 0.14373761, %v5290_v10  ;;  %v1356_v26 = vmul.f32 0.041934147, %v7608_v45 }
 0x237   :  { %v906_v8 = vadd.f32 %v897_v36, %v810_v39  ;;  %1318 = vrot.lane.b32.xlu1 %v1309_v14, %s4132_s0  ;;  %v1357_v39 = vmul.f32 0.041934147, %v7607_v52 }
 0x238   :  { %1316 = vrot.lane.b32.xlu0 %v1308_v53, %s4132_s0  ;;  %v5441_v37 = vadd.f32 %v951_v11, %v907_v30  ;;  %v1359_v30 = vmul.f32 0.041934147, %v5281_v61  ;;  %v1358_v53 = vmul.f32 0.041934147, %v5290_v10 }
 0x239   :  { %v919_v5 = vpop.permute.xlu1 %918  ;;  %v5446_v60 = vadd.f32 %v950_v13, %v906_v8 }
 0x23a   :  { %v929_v51 = vadd.f32 %v919_v5, %v833_v35  ;;  %v917_v42 = vpop.permute.xlu0 %916 }
 0x23b   :  { %v928_v23 = vadd.f32 %v917_v42, %v832_v62  ;;  %1322 = vrot.lane.b32.xlu1 %v1311_v0, %s4132_s0 }
 0x23c   :  { %1320 = vrot.lane.b32.xlu0 %v1310_v27, %s4132_s0  ;;  %v5455_v49 = vadd.f32 %v957_v43, %v929_v51 }
 0x23d   :  { %v923_v29 = vpop.permute.xlu1 %922  ;;  %v5460_v55 = vadd.f32 %v956_v48, %v928_v23 }
 0x23e   :  { %v931_v32 = vadd.f32 %v923_v29, %v835_v31  ;;  %v921_v38 = vpop.permute.xlu0 %920  ;;  %v1157_v29 = vmul.f32 -0.163074, %v7607_v52 }
 0x23f   :  { %v930_v19 = vadd.f32 %v921_v38, %v834_v44  ;;  %1342 = vrot.lane.b32.xlu1 %v1333_v2, %s4132_s0 }
 0x240   :  { %1340 = vrot.lane.b32.xlu0 %v1332_v50, %s4132_s0  ;;  %v5467_v20 = vadd.f32 %v959_v63, %v931_v32  ;;  %v1156_v32 = vmul.f32 -0.163074, %v7608_v45 }
 0x241   :  { %v975_v7 = vpop.permute.xlu1 %974  ;;  %v5470_v46 = vadd.f32 %v958_v12, %v930_v19 }
 0x242   :  { %v973_v1 = vpop.permute.xlu0 %972  ;;  %v985_v43 = vadd.f32 %v975_v7, %v5365_v16 }
 0x243   :  { %1346 = vrot.lane.b32.xlu1 %v1335_v34, %s4132_s0  ;;  %v984_v23 = vadd.f32 %v973_v1, %v5373_v28  ;;  %v1159_v28 = vmul.f32 -0.163074, %v5281_v61  ;;  %v1158_v1 = vmul.f32 -0.163074, %v5290_v10 }
 0x244   :  { %1344 = vrot.lane.b32.xlu0 %v1334_v18, %s4132_s0 }
 0x245   :  { %v979_v59 = vpop.permute.xlu1 %978 }
 0x246   :  { %v977_v4 = vpop.permute.xlu0 %976  ;;  %v987_v38 = vadd.f32 %v979_v59, %v5385_v9 }
 0x247   :  { %1366 = vrot.lane.b32.xlu1 %v1357_v39, %s4132_s0  ;;  %v986_v63 = vadd.f32 %v977_v4, %v5390_v3 }
 0x248   :  { %1364 = vrot.lane.b32.xlu0 %v1356_v26, %s4132_s0 }
 0x249   :  { %v999_v14 = vpop.permute.xlu1 %998 }
 0x24a   :  { %v997_v36 = vpop.permute.xlu0 %996  ;;  %v1009_v18 = vadd.f32 %v999_v14, %v5399_v22 }
 0x24b   :  { %1370 = vrot.lane.b32.xlu1 %v1359_v30, %s4132_s0  ;;  %v1008_v9 = vadd.f32 %v997_v36, %v5404_v47  ;;  %v1165_v30 = vmul.f32 -0.053050086, %v7607_v52 }
 0x24c   :  { %1368 = vrot.lane.b32.xlu0 %v1358_v53, %s4132_s0 }
 0x24d   :  { %v1003_v11 = vpop.permute.xlu1 %1002 }
 0x24e   :  { %v1001_v8 = vpop.permute.xlu0 %1000 }
 0x24f   :  { %v1010_v22 = vadd.f32 %v1001_v8, %v5418_v33 }
 0x251   :  { %v1023_v13 = vpop.permute.xlu1 %1022 }
 0x252   :  { %v1021_v35 = vpop.permute.xlu0 %1020 }
 0x255   :  { %v1027_v62 = vpop.permute.xlu1 %1026 }
 0x256   :  { %v1025_v5 = vpop.permute.xlu0 %1024 }
 0x259   :  { %v1047_v0 = vpop.permute.xlu1 %1046 }
 0x25a   :  { %v5483_v51 = vpop.permute.xlu0 %1044 }
 0x25d   :  { %v5485_v42 = vpop.permute.xlu1 %1050 }
 0x25e   :  { %v5487_v27 = vpop.permute.xlu0 %1048 }
 0x261   :  { %v1071_v48 = vpop.permute.xlu1 %1070 }
 0x262   :  { %v1081_v31 = vadd.f32 %v1071_v48, %v985_v43  ;;  %v1069_v44 = vpop.permute.xlu0 %1068  ;;  %v1164_v43 = vmul.f32 -0.053050086, %v7608_v45 }
 0x263   :  { %v1080_v2 = vadd.f32 %v1069_v44, %v984_v23  ;;  %v1011_v23 = vadd.f32 %v1003_v11, %v5413_v21  ;;  %v1167_v44 = vmul.f32 -0.053050086, %v5281_v61  ;;  %v1032_v21 = vadd.f32 %v1021_v35, %v5432_v54 }
 0x264   :  { %v5494_v50 = vadd.f32 %v1157_v29, %v1081_v31 }
 0x265   :  { %v1075_v19 = vpop.permute.xlu1 %1074  ;;  %v5497_v12 = vadd.f32 %v1156_v32, %v1080_v2  ;;  %v1166_v2 = vmul.f32 -0.053050086, %v5290_v10  ;;  %v1033_v32 = vadd.f32 %v1023_v13, %v5427_v25  ;;  %v1034_v25 = vadd.f32 %v1025_v5, %v5446_v60 }
 0x266   :  { %v1083_v16 = vadd.f32 %v1075_v19, %v987_v38  ;;  %v1073_v7 = vpop.permute.xlu0 %1072  ;;  %v1173_v19 = vmul.f32 -0.018924952, %v7607_v52 }
 0x267   :  { %v1082_v34 = vadd.f32 %v1073_v7, %v986_v63  ;;  %v1172_v7 = vmul.f32 -0.018924952, %v7608_v45 }
 0x268   :  { %v5502_v39 = vadd.f32 %v1159_v28, %v1083_v16  ;;  %v1035_v28 = vadd.f32 %v1027_v62, %v5441_v37  ;;  %v1056_v37 = vadd.f32 %v5483_v51, %v5460_v55 }
 0x269   :  { %v1095_v59 = vpop.permute.xlu1 %1094  ;;  %v5505_v26 = vadd.f32 %v1158_v1, %v1082_v34 }
 0x26a   :  { %v1105_v3 = vadd.f32 %v1095_v59, %v1009_v18  ;;  %v1093_v4 = vpop.permute.xlu0 %1092  ;;  %v1175_v18 = vmul.f32 -0.018924952, %v5281_v61  ;;  %v1174_v59 = vmul.f32 -0.018924952, %v5290_v10 }
 0x26b   :  { %v1104_v53 = vadd.f32 %v1093_v4, %v1008_v9 }
 0x26c   :  { %v5510_v48 = vadd.f32 %v1165_v30, %v1105_v3  ;;  %v1057_v3 = vadd.f32 %v1047_v0, %v5455_v49  ;;  %v1058_v49 = vadd.f32 %v5487_v27, %v5470_v46 }
 0x26d   :  { %v1099_v14 = vpop.permute.xlu1 %1098  ;;  %v5513_v31 = vadd.f32 %v1164_v43, %v1104_v53  ;;  %v1181_v53 = vmul.f32 0.16547093, %v7607_v52  ;;  %v1182_v52 = vmul.f32 0.16547093, %v5290_v10 }
 0x26e   :  { %v1107_v47 = vadd.f32 %v1099_v14, %v1011_v23  ;;  %v1097_v36 = vpop.permute.xlu0 %1096  ;;  %v1180_v23 = vmul.f32 0.16547093, %v7608_v45 }
 0x26f   :  { %v1106_v29 = vadd.f32 %v1097_v36, %v1010_v22  ;;  %v1059_v22 = vadd.f32 %v5485_v42, %v5467_v20  ;;  %v1183_v36 = vmul.f32 0.16547093, %v5281_v61 }
 0x270   :  { %v5518_v38 = vadd.f32 %v1167_v44, %v1107_v47 }
 0x271   :  { %v1119_v11 = vpop.permute.xlu1 %1118  ;;  %v5521_v63 = vadd.f32 %v1166_v2, %v1106_v29 }
 0x272   :  { %v1129_v33 = vadd.f32 %v1119_v11, %v1033_v32  ;;  %v1117_v8 = vpop.permute.xlu0 %1116 }
 0x273   :  { %v1128_v16 = vadd.f32 %v1117_v8, %v1032_v21 }
 0x274   :  { %v5526_v34 = vadd.f32 %v1173_v19, %v1129_v33 }
 0x275   :  { %v1123_v13 = vpop.permute.xlu1 %1122  ;;  %v5529_v1 = vadd.f32 %v1172_v7, %v1128_v16 }
 0x276   :  { %v1131_v54 = vadd.f32 %v1123_v13, %v1035_v28  ;;  %v1121_v35 = vpop.permute.xlu0 %1120 }
 0x277   :  { %v1130_v9 = vadd.f32 %v1121_v35, %v1034_v25 }
 0x278   :  { %v5534_v4 = vadd.f32 %v1175_v18, %v1131_v54 }
 0x279   :  { %v1143_v62 = vpop.permute.xlu1 %1142  ;;  %v5538_v30 = vadd.f32 %v1174_v59, %v1130_v9 }
 0x27a   :  { %v1153_v60 = vadd.f32 %v1143_v62, %v1057_v3  ;;  %v1141_v5 = vpop.permute.xlu0 %1140 }
 0x27b   :  { %v1152_v43 = vadd.f32 %v1141_v5, %v1056_v37 }
 0x27c   :  { %v5544_v14 = vadd.f32 %v1181_v53, %v1153_v60 }
 0x27d   :  { %v1147_v0 = vpop.permute.xlu1 %1146  ;;  %v5548_v55 = vadd.f32 %v1180_v23, %v1152_v43 }
 0x27e   :  { %7617 = vst [vmem:[#allocation41_spill] sm:$0xff] %v5544_v14  ;;  %v1155_v51 = vadd.f32 %v1147_v0, %v1059_v22  ;;  %v1145_v47 = vpop.permute.xlu0 %1144 }
 0x27f   :  { %7618 = vst [vmem:[#allocation54_spill] sm:$0xff] %v5548_v55  ;;  %v1154_v44 = vadd.f32 %v1145_v47, %v1058_v49 }
 0x280   :  { %v5552_v29 = vadd.f32 %v1183_v36, %v1155_v51 }
 0x281   :  { %v1199_v45 = vpop.permute.xlu1 %1198  ;;  %v5554_v2 = vadd.f32 %v1182_v52, %v1154_v44 }
 0x282   :  { %7619 = vst [vmem:[#allocation56_spill] sm:$0xff] %v5552_v29  ;;  %v1197_v20 = vpop.permute.xlu0 %1196  ;;  %v1209_v25 = vadd.f32 %v1199_v45, %v5494_v50 }
 0x283   :  { %7620 = vst [vmem:[#allocation32_spill] sm:$0xff] %v5554_v2  ;;  %v1208_v13 = vadd.f32 %v1197_v20, %v5497_v12 }
 0x285   :  { %v1203_v42 = vpop.permute.xlu1 %1202 }
 0x286   :  { %v1201_v32 = vpop.permute.xlu0 %1200  ;;  %v1211_v59 = vadd.f32 %v1203_v42, %v5502_v39 }
 0x287   :  { %v1210_v37 = vadd.f32 %v1201_v32, %v5505_v26 }
 0x289   :  { %v1223_v21 = vpop.permute.xlu1 %1222 }
 0x28a   :  { %v1221_v46 = vpop.permute.xlu0 %1220  ;;  %v1233_v39 = vadd.f32 %v1223_v21, %v5510_v48 }
 0x28b   :  { %v1232_v52 = vadd.f32 %v1221_v46, %v5513_v31 }
 0x28d   :  { %v1227_v27 = vpop.permute.xlu1 %1226 }
 0x28e   :  { %v1225_v11 = vpop.permute.xlu0 %1224  ;;  %v1235_v46 = vadd.f32 %v1227_v27, %v5518_v38 }
 0x291   :  { %v5556_v33 = vpop.permute.xlu1 %1246 }
 0x292   :  { %v5558_v8 = vpop.permute.xlu0 %1244 }
 0x295   :  { %v5560_v61 = vpop.permute.xlu1 %1250 }
 0x296   :  { %v5562_v19 = vpop.permute.xlu0 %1248 }
 0x299   :  { %v5564_v10 = vpop.permute.xlu1 %1270 }
 0x29a   :  { %7621 = vst [vmem:[#allocation45_spill] sm:$0xff] %v5564_v10  ;;  %v5566_v16 = vpop.permute.xlu0 %1268 }
 0x29b   :  { %7622 = vst [vmem:[#allocation42_spill] sm:$0xff] %v5566_v16 }
 0x29d   :  { %v5568_v7 = vpop.permute.xlu1 %1274 }
 0x29e   :  { %7623 = vst [vmem:[#allocation33_spill] sm:$0xff] %v5568_v7  ;;  %v5570_v28 = vpop.permute.xlu0 %1272 }
 0x29f   :  { %7624 = vst [vmem:[#allocation49_spill] sm:$0xff] %v5570_v28 }
 0x2a1   :  { %v1295_v54 = vpop.permute.xlu1 %1294 }
 0x2a2   :  { %v1305_v35 = vadd.f32 %v1295_v54, %v1209_v25  ;;  %v1293_v18 = vpop.permute.xlu0 %1292 }
 0x2a3   :  { %v1304_v9 = vadd.f32 %v1293_v18, %v1208_v13 }
 0x2a4   :  { %v1381_v3 = vadd.f32 -0.25523996, %v1305_v35 }
 0x2a5   :  { %v1380_v62 = vadd.f32 -0.25523996, %v1304_v9  ;;  %v1299_v60 = vpop.permute.xlu1 %1298 }
 0x2a6   :  { %v5576_v5 = vmax.f32 %v1381_v3, 0.0  ;;  %v1307_v53 = vadd.f32 %v1299_v60, %v1211_v59  ;;  %v1297_v43 = vpop.permute.xlu0 %1296 }
 0x2a7   :  { %v5578_v23 = vmax.f32 %v1380_v62, 0.0  ;;  %v1306_v50 = vadd.f32 %v1297_v43, %v1210_v37 }
 0x2a8   :  { %7625 = vst [vmem:[#allocation34_spill] sm:$0xff] %v5576_v5  ;;  %v1383_v22 = vadd.f32 -0.25523996, %v1307_v53  ;;  %v1417_v12 = vmul.f32 0.09678924, %v5576_v5  ;;  %v1234_v53 = vadd.f32 %v1225_v11, %v5521_v63 }
 0x2a9   :  { %7626 = vst [vmem:[#allocation52_spill] sm:$0xff] %v5578_v23  ;;  %v1382_v49 = vadd.f32 -0.25523996, %v1306_v50  ;;  %v1319_v0 = vpop.permute.xlu1 %1318  ;;  %v1416_v51 = vmul.f32 0.09678924, %v5578_v23 }
 0x2aa   :  { %v5583_v47 = vmax.f32 %v1383_v22, 0.0  ;;  %v1317_v26 = vpop.permute.xlu0 %1316  ;;  %1426 = vrot.lane.b32.xlu1 %v1417_v12, %s4131_s16  ;;  %v5587_v36 = vmul.f32 -0.047834396, %v5576_v5  ;;  %v1486_v44 = vmul.f32 -0.047834396, %v5578_v23  ;;  %v1329_v20 = vadd.f32 %v1319_v0, %v1233_v39 }
 0x2ab   :  { %v5591_v45 = vmax.f32 %v1382_v49, 0.0  ;;  %1424 = vrot.lane.b32.xlu0 %v1416_v51, %s4131_s16  ;;  %v5596_v48 = vmul.f32 0.019065063, %v5576_v5  ;;  %v1328_v32 = vadd.f32 %v1317_v26, %v1232_v52  ;;  %v1516_v31 = vmul.f32 0.019065063, %v5578_v23 }
 0x2ac   :  { %7627 = vst [vmem:[#allocation43_spill] sm:$0xff] %v5583_v47  ;;  %v1419_v42 = vmul.f32 0.09678924, %v5583_v47  ;;  %v1495_v25 = vrot.slane %v5587_v36, 1  ;;  %v1494_v13 = vrot.slane %v1486_v44, 1 }
 0x2ad   :  { %7628 = vst [vmem:[#allocation57_spill] sm:$0xff] %v5591_v45  ;;  %v1418_v21 = vmul.f32 0.09678924, %v5591_v45  ;;  %v5605_v54 = vmul.f32 -0.047834396, %v5583_v47  ;;  %v1323_v9 = vpop.permute.xlu1 %1322  ;;  %v7388_v37 = vrot.slane %v5596_v48, 1 }
 0x2ae   :  { %1430 = vrot.lane.b32.xlu1 %v1419_v42, %s4131_s16  ;;  %v1488_v35 = vmul.f32 -0.047834396, %v5591_v45  ;;  %v1389_v18 = vadd.f32 -0.02325855, %v1329_v20  ;;  %v1441_v59 = vmul.f32 0.08331089, %v5576_v5  ;;  %v1496_v3 = vsel %vm88_vm0, %v1494_v13, %v1495_v25  ;;  %v1321_v12 = vpop.permute.xlu0 %1320 }
 0x2af   :  { %1428 = vrot.lane.b32.xlu0 %v1418_v21, %s4131_s16  ;;  %v1388_v62 = vadd.f32 -0.02325855, %v1328_v32  ;;  %v1440_v38 = vmul.f32 0.08331089, %v5578_v23  ;;  %v1498_v27 = vrot.slane %v5605_v54, 1  ;;  %v1524_v43 = vrot.slane %v1516_v31, 1 }
 0x2b0   :  { %v1497_v60 = vrot.slane %v1488_v35, 1  ;;  %v5618_v50 = vmul.f32 0.019065063, %v5583_v47  ;;  %v1331_v22 = vadd.f32 %v1323_v9, %v1235_v46  ;;  %v1443_v49 = vmul.f32 0.08331089, %v5583_v47 }
 0x2b1   :  { %v1518_v51 = vmul.f32 0.019065063, %v5591_v45  ;;  %v5624_v39 = vmax.f32 %v1389_v18, 0.0  ;;  %v5629_v63 = vsel %vm88_vm0, %v1524_v43, %v7388_v37  ;;  %v5633_v26 = vmul.f32 -0.13327193, %v5576_v5 }
 0x2b2   :  { %1450 = vrot.lane.b32.xlu1 %v1441_v59, %s4132_s0  ;;  %v1499_v0 = vsel %vm88_vm0, %v1497_v60, %v1498_v27  ;;  %v7387_v11 = vrot.slane %v5618_v50, 1  ;;  %v5635_v44 = vmax.f32 %v1388_v62, 0.0  ;;  %v1442_v52 = vmul.f32 0.08331089, %v5591_v45 }
 0x2b3   :  { %1448 = vrot.lane.b32.xlu0 %v1440_v38, %s4132_s0  ;;  %v1527_v20 = vrot.slane %v1518_v51, 1  ;;  %v1568_v42 = vmul.f32 -0.13327193, %v5578_v23  ;;  %v1330_v32 = vadd.f32 %v1321_v12, %v1234_v53  ;;  %v7386_v21 = vrot.slane %v5633_v26, 2 }
 0x2b4   :  { %v5642_v13 = vmul.f32 -0.13327193, %v5583_v47  ;;  %v1391_v31 = vadd.f32 -0.02325855, %v1331_v22  ;;  %v1637_v35 = vmul.f32 -0.09213309, %v5624_v39 }
 0x2b5   :  { %v5648_v46 = vsel %vm88_vm0, %v1527_v20, %v7387_v11  ;;  %v1576_v54 = vrot.slane %v1568_v42, 2  ;;  %v1570_v9 = vmul.f32 -0.13327193, %v5591_v45  ;;  %v1636_v59 = vmul.f32 -0.09213309, %v5635_v44 }
 0x2b6   :  { %1454 = vrot.lane.b32.xlu1 %v1443_v49, %s4132_s0  ;;  %v7385_v18 = vrot.slane %v5642_v13, 2  ;;  %v5660_v38 = vmul.f32 0.10991578, %v5576_v5  ;;  %v1598_v60 = vmul.f32 0.10991578, %v5578_v23 }
 0x2b7   :  { %1452 = vrot.lane.b32.xlu0 %v1442_v52, %s4132_s0  ;;  %v5657_v62 = vsel %vm171_vm1, %v1576_v54, %v7386_v21  ;;  %v1390_v53 = vadd.f32 -0.02325855, %v1330_v32  ;;  %v1579_v43 = vrot.slane %v1570_v9, 2  ;;  %v5665_v22 = vmul.f32 0.10991578, %v5583_v47 }
 0x2b8   :  { %v7384_v12 = vrot.slane %v5660_v38, 2  ;;  %v1606_v49 = vrot.slane %v1598_v60, 2  ;;  %v1600_v20 = vmul.f32 0.10991578, %v5591_v45  ;;  %v2532_v42 = vmul.f32 -0.0046404917, %v4734_v24 }
 0x2b9   :  { %v5672_v51 = vsel %vm171_vm1, %v1579_v43, %v7385_v18  ;;  %v7383_v52 = vrot.slane %v5665_v22, 2  ;;  %v5677_v32 = vmax.f32 %v1391_v31, 0.0  ;;  %v5699_v60 = vmul.f32 -0.06918963, %v5624_v39 }
 0x2ba   :  { %1646 = vrot.lane.b32.xlu1 %v1637_v35, %s4131_s16  ;;  %v5682_v54 = vsel %vm171_vm1, %v1606_v49, %v7384_v12  ;;  %v5684_v35 = vmax.f32 %v1390_v53, 0.0  ;;  %v1609_v9 = vrot.slane %v1600_v20, 2  ;;  %v2540_v53 = vrot.slane %v2532_v42, 1 }
 0x2bb   :  { %1644 = vrot.lane.b32.xlu0 %v1636_v59, %s4131_s16  ;;  %v5690_v59 = vmul.f32 -0.0046404917, %v4729_v57  ;;  %v1706_v43 = vmul.f32 -0.06918963, %v5635_v44  ;;  %v5703_v36 = vmul.f32 -0.06918963, %v5677_v32 }
 0x2bc   :  { %v5696_v31 = vsel %vm171_vm1, %v1609_v9, %v7383_v52  ;;  %v1708_v49 = vmul.f32 -0.06918963, %v5684_v35  ;;  %v5710_v20 = vmul.f32 -0.14068203, %v5624_v39  ;;  %v1736_v12 = vmul.f32 -0.14068203, %v5635_v44 }
 0x2bd   :  { %v1714_v42 = vrot.slane %v1706_v43, 1  ;;  %v5717_v18 = vmul.f32 -0.05331424, %v4729_v57  ;;  %v5721_v11 = vmul.f32 -0.14068203, %v5677_v32  ;;  %v7630_v21 = vrot.slane %v5703_v36, 1 }
 0x2be   :  { %1502 = vrot.lane.b32.xlu1 %v1495_v25, %s4131_s16  ;;  %v2620_v25 = vmul.f32 -0.05331424, %v4734_v24  ;;  %v1738_v37 = vmul.f32 -0.14068203, %v5684_v35  ;;  %v1744_v43 = vrot.slane %v1736_v12, 1  ;;  %v7631_v12 = vrot.slane %v5710_v20, 1 }
 0x2bf   :  { %1500 = vrot.lane.b32.xlu0 %v1496_v3, %s4131_s16  ;;  %v7389_v3 = vrot.slane %v5699_v60, 1  ;;  %v5730_v9 = vmul.f32 0.13611023, %v5624_v39  ;;  %v1788_v52 = vmul.f32 0.13611023, %v5635_v44  ;;  %v7392_v15 = vrot.slane %v5721_v11, 1 }
 0x2c0   :  { %v1747_v58 = vrot.slane %v1738_v37, 1  ;;  %v5761_v17 = vmul.f32 -0.14316368, %v5624_v39  ;;  %v1820_v6 = vmul.f32 -0.14316368, %v5684_v35  ;;  %v7635_v40 = vrot.slane %v5690_v59, 1 }
 0x2c1   :  { %v5832_v55 = vmul.f32 0.029190859, %v5576_v5 }
 0x2c2   :  { %1506 = vrot.lane.b32.xlu1 %v1498_v27, %s4131_s16  ;;  %v1717_v27 = vrot.slane %v1708_v49, 1  ;;  %v7629_v49 = vrot.slane %v5596_v48, 1  ;;  %v7397_v48 = vrot.slane %v5730_v9, 2  ;;  %v5757_v37 = vsel %vm88_vm0, %v1747_v58, %v7392_v15  ;;  %7632 = vst [vmem:[#allocation58_spill] sm:$0xff] %v5761_v17 }
 0x2c3   :  { %1504 = vrot.lane.b32.xlu0 %v1499_v0, %s4131_s16  ;;  %v5727_v0 = vsel %vm88_vm0, %v1714_v42, %v7389_v3  ;;  %v5743_v42 = vmul.f32 0.13611023, %v5677_v32  ;;  %v5750_v3 = vsel %vm88_vm0, %v1744_v43, %v7631_v12  ;;  %v5770_v12 = vmul.f32 -0.14316368, %v5677_v32  ;;  %7647 = vst [vmem:[#allocation6_spill] sm:$0xff] %v5832_v55 }
 0x2c4   :  { %v5739_v56 = vsel %vm88_vm0, %v1717_v27, %v7630_v21  ;;  %v1790_v21 = vmul.f32 0.13611023, %v5684_v35  ;;  %v7634_v58 = vrot.slane %v5618_v50, 1  ;;  %v7398_v15 = vrot.slane %v5761_v17, 2 }
 0x2c5   :  { %7633 = vst [vmem:[#allocation35_spill] sm:$0xff] %v5770_v12  ;;  %v2542_v41 = vsel %vm88_vm0, %v2540_v53, %v7635_v40  ;;  %v1829_v28 = vrot.slane %v1820_v6, 2  ;;  %v2516_v50 = vmul.f32 0.036101047, %v4734_v24  ;;  %v7400_v40 = vrot.slane %v5717_v18, 2  ;;  %v7641_v6 = vld [vmem:[#allocation10_spill] sm:$0xff] }
 0x2c6   :  { %1532 = vrot.lane.b32.xlu1 %v7629_v49, %s4132_s0  ;;  %v1796_v49 = vrot.slane %v1788_v52, 2  ;;  %v1799_v52 = vrot.slane %v1790_v21, 2  ;;  %v7655_v17 = vrot.slane %v5832_v55, 1  ;;  %v7661_v55 = vld [vmem:[#allocation18_spill] sm:$0xff] }
 0x2c7   :  { %1530 = vrot.lane.b32.xlu0 %v5629_v63, %s4132_s0  ;;  %v1818_v63 = vmul.f32 -0.14316368, %v5635_v44  ;;  %v2550_v53 = vadd.f32 %v2542_v41, %v2516_v50 }
 0x2c8   :  { %v5767_v43 = vsel %vm171_vm1, %v1796_v49, %v7397_v48  ;;  %v7636_v49 = vrot.slane %v5743_v42, 2  ;;  %v7399_v48 = vrot.slane %v5770_v12, 2 }
 0x2c9   :  { %v1826_v27 = vrot.slane %v1818_v63, 2 }
 0x2ca   :  { %1536 = vrot.lane.b32.xlu1 %v7634_v58, %s4132_s0  ;;  %v5785_v21 = vsel %vm171_vm1, %v1799_v52, %v7636_v49  ;;  %v2628_v58 = vrot.slane %v2620_v25, 2  ;;  %v7640_v52 = vrot.slane %v5633_v26, 2  ;;  %v2740_v49 = vmul.f32 0.10816349, %v7641_v6  ;;  %v7643_v26 = vld [vmem:[#allocation16_spill] sm:$0xff] }
 0x2cb   :  { %1534 = vrot.lane.b32.xlu0 %v5648_v46, %s4132_s0  ;;  %7637 = vst [vmem:[#allocation53_spill] sm:$0xff] %v5785_v21  ;;  %v5792_v63 = vsel %vm171_vm1, %v1826_v27, %v7398_v15  ;;  %v5798_v46 = vsel %vm171_vm1, %v1829_v28, %v7399_v48  ;;  %v7642_v27 = vld [vmem:[#allocation9_spill] sm:$0xff]  ;;  %v2828_v28 = vmul.f32 -0.0927324, %v7641_v6 }
 0x2cc   :  { %7638 = vst [vmem:[#allocation46_spill] sm:$0xff] %v5792_v63  ;;  %7639 = vst [vmem:[#allocation47_spill] sm:$0xff] %v5798_v46  ;;  %v2630_v25 = vsel %vm171_vm1, %v2628_v58, %v7400_v40  ;;  %v5810_v15 = vmul.f32 0.10816349, %v7642_v27  ;;  %v5814_v41 = vmul.f32 -0.0927324, %v7642_v27 }
 0x2cd   :  { %v2638_v50 = vadd.f32 %v2630_v25, %v2550_v53  ;;  %v7644_v48 = vld [vmem:[#allocation17_spill] sm:$0xff]  ;;  %v2708_v58 = vmul.f32 0.013995668, %v7641_v6  ;;  %v2748_v40 = vrot.slane %v2740_v49, 1  ;;  %v2836_v29 = vrot.slane %v2828_v28, 2  ;;  %v7646_v25 = vld [vmem:[#allocation11_spill] sm:$0xff] }
 0x2ce   :  { %1584 = vrot.lane.b32.xlu1 %v7640_v52, %s4131_s16  ;;  %v2534_v52 = vmul.f32 -0.0046404917, %v7643_v26  ;;  %v5818_v2 = vmul.f32 -0.0046404917, %v7644_v48  ;;  %v5829_v16 = vmul.f32 0.14187822, %v7646_v25 }
 0x2cf   :  { %1582 = vrot.lane.b32.xlu0 %v5657_v62, %s4131_s16  ;;  %v7645_v62 = vrot.slane %v5642_v13, 2  ;;  %v2712_v10 = vadd.f32 %v2708_v58, %v2638_v50  ;;  %v1464_v49 = vmul.f32 0.029190859, %v5578_v23  ;;  %v5840_v28 = vmul.f32 0.10752521, %v7646_v25  ;;  %v7649_v53 = vld [vmem:[#allocation12_spill] sm:$0xff] }
 0x2d0   :  { %v2543_v13 = vrot.slane %v2534_v52, 1  ;;  %v5843_v7 = vmul.f32 0.10752521, %v7649_v53  ;;  %v2622_v52 = vmul.f32 -0.05331424, %v7643_v26  ;;  %v7651_v6 = vrot.slane %v5810_v15, 1 }
 0x2d1   :  { %v5850_v58 = vmul.f32 -0.05331424, %v7644_v48  ;;  %v3036_v46 = vmul.f32 -0.14753361, %v7646_v25  ;;  %v7653_v12 = vrot.slane %v5818_v2, 1  ;;  %v7654_v63 = vrot.slane %v5665_v22, 2 }
 0x2d2   :  { %1588 = vrot.lane.b32.xlu1 %v7645_v62, %s4131_s16  ;;  %v1466_v62 = vmul.f32 0.029190859, %v5591_v45  ;;  %v2750_v14 = vsel %vm88_vm0, %v2748_v40, %v7651_v6  ;;  %v2956_v40 = vrot.slane %v5840_v28, 1  ;;  %v2631_v22 = vrot.slane %v2622_v52, 2 }
 0x2d3   :  { %1586 = vrot.lane.b32.xlu0 %v5672_v51, %s4131_s16  ;;  %v7648_v51 = vrot.slane %v5660_v38, 2  ;;  %v1472_v38 = vrot.slane %v1464_v49, 1  ;;  %v2758_v24 = vadd.f32 %v2750_v14, %v2712_v10  ;;  %v2545_v49 = vsel %vm88_vm0, %v2543_v13, %v7653_v12 }
 0x2d4   :  { %v1475_v10 = vrot.slane %v1466_v62, 1  ;;  %v5880_v12 = vmul.f32 -0.14753361, %v7649_v53  ;;  %v1639_v6 = vmul.f32 -0.09213309, %v5677_v32  ;;  %v3044_v52 = vrot.slane %v3036_v46, 2 }
 0x2d5   :  { %v5872_v21 = vsel %vm88_vm0, %v1472_v38, %v7655_v17  ;;  %v5890_v13 = vmul.f32 -0.116691075, %v5576_v5  ;;  %v1546_v28 = vmul.f32 -0.116691075, %v5578_v23  ;;  %v2742_v38 = vmul.f32 0.10816349, %v7661_v55 }
 0x2d6   :  { %1614 = vrot.lane.b32.xlu1 %v7648_v51, %s4132_s0  ;;  %v5853_v51 = vmul.f32 0.029190859, %v5583_v47  ;;  %7656 = vst [vmem:[#allocation50_spill] sm:$0xff] %v5872_v21  ;;  %v7662_v46 = vld [vmem:[#allocation19_spill] sm:$0xff] }
 0x2d7   :  { %1612 = vrot.lane.b32.xlu0 %v5682_v54, %s4132_s0  ;;  %v7652_v54 = vrot.slane %v5814_v41, 2  ;;  %7658 = vst [vmem:[#allocation55_spill] sm:$0xff] %v5890_v13  ;;  %v5907_v25 = vmul.f32 0.10816349, %v7662_v46 }
 0x2d8   :  { %7650 = vst [vmem:[#allocation48_spill] sm:$0xff] %v5853_v51  ;;  %v7406_v14 = vrot.slane %v5853_v51, 1 }
 0x2d9   :  { %v2838_v50 = vsel %vm171_vm1, %v2836_v29, %v7652_v54  ;;  %v2518_v29 = vmul.f32 0.036101047, %v7643_v26 }
 0x2da   :  { %1618 = vrot.lane.b32.xlu1 %v7654_v63, %s4132_s0  ;;  %v5887_v17 = vsel %vm88_vm0, %v1475_v10, %v7406_v14  ;;  %v5898_v63 = vmul.f32 -0.116691075, %v5583_v47  ;;  %v1548_v10 = vmul.f32 -0.116691075, %v5591_v45  ;;  %v2846_v14 = vadd.f32 %v2838_v50, %v2758_v24 }
 0x2db   :  { %1616 = vrot.lane.b32.xlu0 %v5696_v31, %s4132_s0  ;;  %7657 = vst [vmem:[#allocation27_spill] sm:$0xff] %v5887_v17  ;;  %v2552_v62 = vadd.f32 %v2545_v49, %v2518_v29  ;;  %v1638_v31 = vmul.f32 -0.09213309, %v5684_v35  ;;  %v1554_v49 = vrot.slane %v1546_v28, 2  ;;  %v7660_v29 = vrot.slane %v5850_v58, 2  ;;  %v7668_v17 = vld [vmem:[#allocation13_spill] sm:$0xff] }
 0x2dc   :  { %7659 = vst [vmem:[#allocation5_spill] sm:$0xff] %v5898_v63  ;;  %v7413_v54 = vrot.slane %v5898_v63, 2  ;;  %v1557_v47 = vrot.slane %v1548_v10, 2  ;;  %v1660_v24 = vmul.f32 -0.055506468, %v5635_v44  ;;  %v7663_v50 = vrot.slane %v5890_v13, 2 }
 0x2dd   :  { %v2633_v51 = vsel %vm171_vm1, %v2631_v22, %v7660_v29  ;;  %v2710_v28 = vmul.f32 0.013995668, %v7661_v55  ;;  %v2517_v10 = vmul.f32 0.036101047, %v4729_v57  ;;  %v7418_v22 = vrot.slane %v5907_v25, 1 }
 0x2de   :  { %1650 = vrot.lane.b32.xlu1 %v1639_v6, %s4131_s16  ;;  %v1661_v6 = vmul.f32 -0.055506468, %v5624_v39  ;;  %v2640_v5 = vadd.f32 %v2633_v51, %v2552_v62  ;;  %v5923_v29 = vsel %vm171_vm1, %v1557_v47, %v7413_v54  ;;  %v2830_v51 = vmul.f32 -0.0927324, %v7661_v55 }
 0x2df   :  { %1648 = vrot.lane.b32.xlu0 %v1638_v31, %s4131_s16  ;;  %v5915_v31 = vsel %vm171_vm1, %v1554_v49, %v7663_v50  ;;  %7665 = vst [vmem:[#allocation51_spill] sm:$0xff] %v5923_v29  ;;  %v5927_v62 = vmul.f32 -0.0927324, %v7662_v46  ;;  %v2920_v49 = vadd.f32 %v5829_v16, %v2846_v14  ;;  %v2751_v50 = vrot.slane %v2742_v38, 1  ;;  %v7667_v29 = vld [vmem:[#allocation14_spill] sm:$0xff] }
 0x2e0   :  { %7664 = vst [vmem:[#allocation15_spill] sm:$0xff] %v5915_v31  ;;  %v2714_v63 = vadd.f32 %v2710_v28, %v2640_v5  ;;  %v7666_v47 = vrot.slane %v5690_v59, 1  ;;  %v1662_v13 = vmul.f32 -0.055506468, %v5684_v35  ;;  %v5938_v31 = vmul.f32 0.06835543, %v7667_v29 }
 0x2e1   :  { %v5941_v21 = vmul.f32 0.06835543, %v7668_v17  ;;  %v7669_v16 = vrot.slane %v5843_v7, 1  ;;  %v7670_v38 = vrot.slane %v5880_v12, 2  ;;  %v2839_v59 = vrot.slane %v2830_v51, 2 }
 0x2e2   :  { %1670 = vrot.lane.b32.xlu1 %v1661_v6, %s4132_s0  ;;  %v1663_v6 = vmul.f32 -0.055506468, %v5677_v32  ;;  %v2551_v54 = vadd.f32 %v7666_v47, %v2517_v10  ;;  %v5953_v28 = vmul.f32 -0.14563398, %v5624_v39  ;;  %v1684_v10 = vmul.f32 -0.14563398, %v5635_v44 }
 0x2e3   :  { %1668 = vrot.lane.b32.xlu0 %v1660_v24, %s4132_s0  ;;  %v2958_v14 = vsel %vm88_vm0, %v2956_v40, %v7669_v16  ;;  %v3046_v5 = vsel %vm171_vm1, %v3044_v52, %v7670_v38  ;;  %v7672_v16 = vld [vmem:[#allocation20_spill] sm:$0xff]  ;;  %v7673_v51 = vrot.slane %v5717_v18, 2  ;;  %v5965_v45 = vmul.f32 -0.14563398, %v5677_v32  ;;  %v7677_v18 = vld [vmem:[#allocation22_spill] sm:$0xff] }
 0x2e4   :  { %7671 = vst [vmem:[#allocation21_spill] sm:$0xff] %v5953_v28  ;;  %v2966_v47 = vadd.f32 %v2958_v14, %v2920_v49  ;;  %v2918_v57 = vmul.f32 0.14187822, %v7672_v16  ;;  %v2950_v52 = vmul.f32 0.10752521, %v7672_v16  ;;  %v1692_v24 = vrot.slane %v1684_v10, 1 }
 0x2e5   :  { %v2639_v38 = vadd.f32 %v7673_v51, %v2551_v54  ;;  %7674 = vst [vmem:[#allocation25_spill] sm:$0xff] %v5965_v45  ;;  %v2519_v49 = vmul.f32 0.036101047, %v7644_v48  ;;  %v7675_v14 = vrot.slane %v5699_v60, 1  ;;  %v5976_v54 = vmul.f32 0.10752521, %v7677_v18 }
 0x2e6   :  { %1674 = vrot.lane.b32.xlu1 %v1663_v6, %s4132_s0  ;;  %v2753_v6 = vsel %vm88_vm0, %v2751_v50, %v7418_v22  ;;  %v7676_v50 = vrot.slane %v5927_v62, 2  ;;  %v3038_v10 = vmul.f32 -0.14753361, %v7672_v16  ;;  %v7425_v60 = vrot.slane %v5965_v45, 1 }
 0x2e7   :  { %1672 = vrot.lane.b32.xlu0 %v1662_v13, %s4132_s0  ;;  %v2760_v40 = vadd.f32 %v2753_v6, %v2714_v63  ;;  %v7423_v13 = vrot.slane %v5953_v28, 1  ;;  %v1686_v63 = vmul.f32 -0.14563398, %v5684_v35  ;;  %v7679_v22 = vrot.slane %v5818_v2, 1 }
 0x2e8   :  { %v2841_v6 = vsel %vm171_vm1, %v2839_v59, %v7676_v50  ;;  %v5991_v55 = vmul.f32 -0.10622617, %v5624_v39  ;;  %v1766_v16 = vmul.f32 -0.10622617, %v5635_v44  ;;  %v7682_v2 = vrot.slane %v5703_v36, 1 }
 0x2e9   :  { %v5984_v51 = vsel %vm88_vm0, %v1692_v24, %v7423_v13  ;;  %v2553_v59 = vadd.f32 %v7679_v22, %v2519_v49  ;;  %v1695_v50 = vrot.slane %v1686_v63, 1  ;;  %v2848_v23 = vadd.f32 %v2841_v6, %v2760_v40 }
 0x2ea   :  { %1722 = vrot.lane.b32.xlu1 %v7675_v14, %s4131_s16  ;;  %7678 = vst [vmem:[#allocation26_spill] sm:$0xff] %v5984_v51  ;;  %v2709_v14 = vmul.f32 0.013995668, %v7642_v27  ;;  %7680 = vst [vmem:[#allocation28_spill] sm:$0xff] %v5991_v55  ;;  %v5998_v24 = vmul.f32 -0.10622617, %v5677_v32  ;;  %v3054_v51 = vadd.f32 %v3046_v5, %v2966_v47 }
 0x2eb   :  { %1720 = vrot.lane.b32.xlu0 %v5727_v0, %s4131_s16  ;;  %v5995_v0 = vmul.f32 -0.14753361, %v7677_v18  ;;  %v1768_v13 = vmul.f32 -0.10622617, %v5684_v35  ;;  %v6007_v22 = vsel %vm88_vm0, %v1695_v50, %v7425_v60  ;;  %v2959_v40 = vrot.slane %v2950_v52, 1 }
 0x2ec   :  { %v2713_v28 = vadd.f32 %v2709_v14, %v2639_v38  ;;  %7681 = vst [vmem:[#allocation29_spill] sm:$0xff] %v5998_v24  ;;  %7683 = vst [vmem:[#allocation9_spill] sm:$0xff] %v6007_v22  ;;  %v7427_v49 = vrot.slane %v5991_v55, 2  ;;  %v1774_v63 = vrot.slane %v1766_v16, 2  ;;  %v7428_v38 = vrot.slane %v5976_v54, 1 }
 0x2ed   :  { %v7684_v6 = vrot.slane %v5850_v58, 2  ;;  %v7426_v36 = vrot.slane %v5998_v24, 2  ;;  %v3244_v45 = vmul.f32 -0.22395699, %v7667_v29  ;;  %v2922_v50 = vadd.f32 %v2918_v57, %v2848_v23 }
 0x2ee   :  { %1726 = vrot.lane.b32.xlu1 %v7682_v2, %s4131_s16  ;;  %v1777_v2 = vrot.slane %v1768_v13, 2  ;;  %v6020_v52 = vsel %vm171_vm1, %v1774_v63, %v7427_v49  ;;  %v6023_v16 = vmul.f32 -0.22395699, %v7668_v17  ;;  %v2711_v58 = vmul.f32 0.013995668, %v7662_v46  ;;  %v7692_v13 = vld [vmem:[#allocation24_spill] sm:$0xff] }
 0x2ef   :  { %1724 = vrot.lane.b32.xlu0 %v5739_v56, %s4131_s16  ;;  %v2641_v14 = vadd.f32 %v7684_v6, %v2553_v59  ;;  %7685 = vst [vmem:[#allocation16_spill] sm:$0xff] %v6020_v52  ;;  %v7686_v56 = vrot.slane %v5810_v15, 1  ;;  %v7688_v57 = vrot.slane %v5710_v20, 1  ;;  %v3124_v23 = vmul.f32 -0.07870067, %v7667_v29 }
 0x2f0   :  { %v6031_v5 = vsel %vm171_vm1, %v1777_v2, %v7426_v36  ;;  %v3164_v47 = vrot.slane %v5938_v31, 1  ;;  %v2961_v15 = vsel %vm88_vm0, %v2959_v40, %v7428_v38  ;;  %v7429_v59 = vrot.slane %v5995_v0, 2 }
 0x2f1   :  { %v2759_v60 = vadd.f32 %v7686_v56, %v2713_v28  ;;  %7687 = vst [vmem:[#allocation17_spill] sm:$0xff] %v6031_v5  ;;  %v3047_v28 = vrot.slane %v3038_v10, 2  ;;  %v2715_v63 = vadd.f32 %v2711_v58, %v2641_v14  ;;  %v3128_v6 = vadd.f32 %v3124_v23, %v3054_v51  ;;  %v1341_v58 = vpop.permute.xlu0 %1340 }
 0x2f2   :  { %1752 = vrot.lane.b32.xlu1 %v7688_v57, %s4132_s0  ;;  %v2968_v20 = vadd.f32 %v2961_v15, %v2922_v50  ;;  %v3252_v2 = vrot.slane %v3244_v45, 2  ;;  %v7689_v57 = vld [vmem:[#allocation23_spill] sm:$0xff]  ;;  %v7690_v36 = vrot.slane %v5814_v41, 2  ;;  %v6053_v40 = vmul.f32 0.06835543, %v7692_v13  ;;  %v1343_v45 = vpop.permute.xlu1 %1342 }
 0x2f3   :  { %1750 = vrot.lane.b32.xlu0 %v5750_v3, %s4132_s0  ;;  %v3158_v31 = vmul.f32 0.06835543, %v7689_v57  ;;  %v7691_v3 = vrot.slane %v5721_v11, 1  ;;  %v2556_v10 = vmul.f32 -0.12198373, %v7643_v26  ;;  %v7693_v14 = vrot.slane %v5941_v21, 1 }
 0x2f4   :  { %v2847_v49 = vadd.f32 %v7690_v36, %v2759_v60  ;;  %v6057_v51 = vmul.f32 -0.12198373, %v7644_v48  ;;  %v3049_v11 = vsel %vm171_vm1, %v3047_v28, %v7429_v59  ;;  %v2917_v60 = vmul.f32 0.14187822, %v7649_v53 }
 0x2f5   :  { %v3166_v41 = vsel %vm88_vm0, %v3164_v47, %v7693_v14  ;;  %v7694_v36 = vrot.slane %v5907_v25, 1  ;;  %v3056_v15 = vadd.f32 %v3049_v11, %v2968_v20  ;;  %v3167_v38 = vrot.slane %v3158_v31, 1 }
 0x2f6   :  { %1756 = vrot.lane.b32.xlu1 %v7691_v3, %s4132_s0  ;;  %v3174_v23 = vadd.f32 %v3166_v41, %v3128_v6  ;;  %v3126_v3 = vmul.f32 -0.07870067, %v7689_v57  ;;  %v6073_v56 = vmul.f32 -0.22395699, %v7692_v13  ;;  %v2921_v47 = vadd.f32 %v2917_v60, %v2847_v49 }
 0x2f7   :  { %1754 = vrot.lane.b32.xlu0 %v5757_v37, %s4132_s0  ;;  %v2761_v50 = vadd.f32 %v7694_v36, %v2715_v63  ;;  %v3246_v37 = vmul.f32 -0.22395699, %v7689_v57  ;;  %v1257_v28 = vadd.f32 %v5556_v33, %v5526_v34  ;;  %v7695_v14 = vrot.slane %v5730_v9, 2 }
 0x2f8   :  { %v3168_v25 = vrot.slane %v6053_v40, 1  ;;  %v2565_v63 = vrot.slane %v2556_v10, 1  ;;  %v7433_v6 = vrot.slane %v6057_v51, 1  ;;  %v1256_v20 = vadd.f32 %v5558_v8, %v5529_v1  ;;  %v1347_v1 = vpop.permute.xlu1 %1346 }
 0x2f9   :  { %v7696_v49 = vrot.slane %v6023_v16, 2  ;;  %v7697_v34 = vrot.slane %v5927_v62, 2  ;;  %v2644_v9 = vmul.f32 -0.030051352, %v7643_v26  ;;  %v1353_v41 = vadd.f32 %v1343_v45, %v1257_v28 }
 0x2fa   :  { %1804 = vrot.lane.b32.xlu1 %v7695_v14, %s4131_s16  ;;  %v3130_v10 = vadd.f32 %v3126_v3, %v3056_v15  ;;  %v6093_v60 = vmul.f32 -0.030051352, %v7644_v48  ;;  %v1352_v36 = vadd.f32 %v1341_v58, %v1256_v20  ;;  %v3255_v8 = vrot.slane %v3246_v37, 2 }
 0x2fb   :  { %1802 = vrot.lane.b32.xlu0 %v5767_v43, %s4131_s16  ;;  %v3254_v31 = vsel %vm171_vm1, %v3252_v2, %v7696_v49  ;;  %v2849_v33 = vadd.f32 %v7697_v34, %v2761_v50  ;;  %v7698_v43 = vrot.slane %v5843_v7, 1  ;;  %v2919_v59 = vmul.f32 0.14187822, %v7677_v18  ;;  %v1345_v2 = vpop.permute.xlu0 %1344 }
 0x2fc   :  { %v3262_v11 = vadd.f32 %v3254_v31, %v3174_v23  ;;  %v1259_v62 = vadd.f32 %v5560_v61, %v5534_v4  ;;  %v7699_v45 = vrot.slane %v5743_v42, 2  ;;  %v3169_v50 = vsel %vm88_vm0, %v3167_v38, %v3168_v25  ;;  %v7700_v4 = vld [vmem:[#allocation53_spill] sm:$0xff] }
 0x2fd   :  { %v2967_v14 = vadd.f32 %v7698_v43, %v2921_v47  ;;  %v3256_v58 = vrot.slane %v6073_v56, 2  ;;  %v2567_v7 = vsel %vm88_vm0, %v2565_v63, %v7433_v6  ;;  %v1258_v23 = vadd.f32 %v5562_v19, %v5538_v30  ;;  %v7702_v30 = vld [vmem:[#allocation58_spill] sm:$0xff] }
 0x2fe   :  { %1808 = vrot.lane.b32.xlu1 %v7699_v45, %s4131_s16  ;;  %v2923_v61 = vadd.f32 %v2919_v59, %v2849_v33  ;;  %v2522_v42 = vmul.f32 0.24072729, %v7643_v26  ;;  %v2653_v15 = vrot.slane %v2644_v9, 2  ;;  %v1397_v3 = vadd.f32 -0.08843604, %v1353_v41  ;;  %v7704_v33 = vld [vmem:[#allocation46_spill] sm:$0xff] }
 0x2ff   :  { %1806 = vrot.lane.b32.xlu0 %v7700_v4, %s4131_s16  ;;  %v1355_v37 = vadd.f32 %v1347_v1, %v1259_v62  ;;  %v3176_v47 = vadd.f32 %v3169_v50, %v3130_v10  ;;  %v7432_v38 = vrot.slane %v6093_v60, 2  ;;  %v1396_v28 = vadd.f32 -0.08843604, %v1352_v36 }
 0x300   :  { %v1354_v20 = vadd.f32 %v1345_v2, %v1258_v23  ;;  %v7701_v49 = vrot.slane %v5880_v12, 2  ;;  %v2574_v31 = vadd.f32 %v2567_v7, %v2522_v42  ;;  %v7703_v19 = vrot.slane %v7702_v30, 2  ;;  %v7706_v12 = vld [vmem:[#allocation18_spill] sm:$0xff]  ;;  %v7712_v42 = vld [vmem:[#allocation47_spill] sm:$0xff] }
 0x301   :  { %v3332_v34 = vadd.f32 0.16410556, %v3262_v11  ;;  %v3125_v59 = vmul.f32 -0.07870067, %v7668_v17  ;;  %v3257_v9 = vsel %vm171_vm1, %v3255_v8, %v3256_v58  ;;  %v7705_v41 = vrot.slane %v5976_v54, 1  ;;  %v7709_v54 = vld [vmem:[#allocation35_spill] sm:$0xff] }
 0x302   :  { %v3055_v63 = vadd.f32 %v7701_v49, %v2967_v14  ;;  %1834 = vrot.lane.b32.xlu1 %v7703_v19, %s4132_s0  ;;  %v2764_v36 = vmul.f32 0.20564933, %v7706_v12  ;;  %v6131_v1 = vmul.f32 0.20564933, %v7662_v46  ;;  %v6133_v43 = vmax.f32 %v1397_v3, 0.0 }
 0x303   :  { %1832 = vrot.lane.b32.xlu0 %v7704_v33, %s4132_s0  ;;  %v2969_v10 = vadd.f32 %v7705_v41, %v2923_v61  ;;  %v1399_v11 = vadd.f32 -0.08843604, %v1355_v37  ;;  %v3264_v14 = vadd.f32 %v3257_v9, %v3176_v47  ;;  %v2655_v62 = vsel %vm171_vm1, %v2653_v15, %v7432_v38 }
 0x304   :  { %7707 = vst [vmem:[#allocation12_spill] sm:$0xff] %v6133_v43  ;;  %v6138_v2 = vmax.f32 %v1396_v28, 0.0  ;;  %v1398_v45 = vadd.f32 -0.08843604, %v1354_v20  ;;  %v3129_v8 = vadd.f32 %v3125_v59, %v3055_v63  ;;  %v2662_v50 = vadd.f32 %v2655_v62, %v2574_v31 }
 0x305   :  { %v7710_v7 = vrot.slane %v7709_v54, 2  ;;  %v6143_v23 = vmax.f32 %v3332_v34, 0.0  ;;  %v3127_v4 = vmul.f32 -0.07870067, %v7692_v13  ;;  %v2718_v61 = vmul.f32 -0.22825252, %v7706_v12 }
 0x306   :  { %7708 = vst [vmem:[#allocation19_spill] sm:$0xff] %v6138_v2  ;;  %v7713_v15 = vrot.slane %v5995_v0, 2  ;;  %v2773_v37 = vrot.slane %v2764_v36, 1  ;;  %v2852_v47 = vmul.f32 0.1075771, %v7706_v12  ;;  %v6155_v20 = vmax.f32 %v1399_v11, 0.0 }
 0x307   :  { %1838 = vrot.lane.b32.xlu1 %v7710_v7, %s4132_s0  ;;  %7711 = vst [vmem:[#allocation22_spill] sm:$0xff] %v6143_v23  ;;  %1836 = vrot.lane.b32.xlu0 %v7712_v42, %s4132_s0  ;;  %v6153_v28 = vmul.f32 0.1075771, %v7662_v46  ;;  %v1857_v49 = vmul.f32 0.032026093, %v6133_v43  ;;  %v7431_v31 = vrot.slane %v6131_v1, 1  ;;  %v2722_v59 = vadd.f32 %v2718_v61, %v2662_v50 }
 0x308   :  { %v3057_v3 = vadd.f32 %v7713_v15, %v2969_v10  ;;  %7714 = vst [vmem:[#allocation53_spill] sm:$0xff] %v6155_v20  ;;  %v3334_v63 = vadd.f32 0.16410556, %v3264_v14  ;;  %v6159_v30 = vmax.f32 %v1398_v45, 0.0  ;;  %v1856_v19 = vmul.f32 0.032026093, %v6138_v2 }
 0x309   :  { %v7716_v0 = vrot.slane %v5941_v21, 1  ;;  %v6166_v33 = vmul.f32 -0.12132685, %v6143_v23  ;;  %v6169_v9 = vmul.f32 0.115704656, %v6143_v23  ;;  %v2775_v14 = vsel %vm88_vm0, %v2773_v37, %v7431_v31 }
 0x30a   :  { %7715 = vst [vmem:[#allocation58_spill] sm:$0xff] %v6159_v30  ;;  %v6172_v41 = vmul.f32 -0.07909465, %v6143_v23  ;;  %v6176_v10 = vmul.f32 0.07967961, %v6143_v23  ;;  %v3131_v36 = vadd.f32 %v3127_v4, %v3057_v3  ;;  %v2861_v62 = vrot.slane %v2852_v47, 2 }
 0x30b   :  { %v3175_v34 = vadd.f32 %v7716_v0, %v3129_v8  ;;  %1866 = vrot.lane.b32.xlu1 %v1857_v49, %s4131_s16  ;;  %1864 = vrot.lane.b32.xlu0 %v1856_v19, %s4131_s16  ;;  %v6179_v21 = vmul.f32 -0.15182531, %v6143_v23  ;;  %v1859_v11 = vmul.f32 0.032026093, %v6155_v20  ;;  %v7430_v45 = vrot.slane %v6153_v28, 2  ;;  %v7721_v47 = vld [vmem:[#allocation20_spill] sm:$0xff] }
 0x30c   :  { %7717 = vst [vmem:[#allocation46_spill] sm:$0xff] %v6176_v10  ;;  %v1858_v8 = vmul.f32 0.032026093, %v6159_v30  ;;  %v6187_v50 = vmax.f32 %v3334_v63, 0.0  ;;  %v7719_v54 = vrot.slane %v6023_v16, 2  ;;  %v2782_v4 = vadd.f32 %v2775_v14, %v2722_v59  ;;  %v6216_v14 = vpop.permute.xlu1 %1366 }
 0x30d   :  { %v6193_v61 = vmul.f32 -0.060086332, %v6143_v23  ;;  %v3177_v37 = vadd.f32 %v3168_v25, %v3131_v36  ;;  %v2926_v49 = vmul.f32 -0.11761633, %v7721_v47  ;;  %v2972_v63 = vmul.f32 -0.077917226, %v7721_v47 }
 0x30e   :  { %7718 = vst [vmem:[#allocation35_spill] sm:$0xff] %v6187_v50  ;;  %v3263_v7 = vadd.f32 %v7719_v54, %v3175_v34  ;;  %v1881_v19 = vmul.f32 -0.13119948, %v6133_v43  ;;  %v2863_v0 = vsel %vm171_vm1, %v2861_v62, %v7430_v45  ;;  %v6209_v34 = vmul.f32 -0.077917226, %v7677_v18  ;;  %v6224_v45 = vpop.permute.xlu0 %1364 }
 0x30f   :  { %1870 = vrot.lane.b32.xlu1 %v1859_v11, %s4131_s16  ;;  %7720 = vst [vmem:[#allocation47_spill] sm:$0xff] %v6193_v61  ;;  %1868 = vrot.lane.b32.xlu0 %v1858_v8, %s4131_s16  ;;  %v3060_v59 = vmul.f32 0.024832245, %v7721_v47  ;;  %v1880_v40 = vmul.f32 -0.13119948, %v6138_v2  ;;  %v2870_v11 = vadd.f32 %v2863_v0, %v2782_v4  ;;  %v3265_v31 = vadd.f32 %v3256_v58, %v3177_v37 }
 0x310   :  { %v6214_v25 = vmul.f32 0.07967961, %v6187_v50  ;;  %v3333_v36 = vadd.f32 0.16410556, %v3263_v7  ;;  %v1927_v8 = vmul.f32 0.08510622, %v6133_v43  ;;  %v6256_v5 = vpop.permute.xlu1 %1370 }
 0x311   :  { %v1926_v62 = vmul.f32 0.08510622, %v6138_v2  ;;  %v6222_v54 = vmul.f32 -0.060086332, %v6187_v50  ;;  %v6230_v7 = vmul.f32 -0.12132685, %v6187_v50 }
 0x312   :  { %7722 = vst [vmem:[#allocation59_spill] sm:$0xff] %v6214_v25  ;;  %v6233_v4 = vmul.f32 0.115704656, %v6187_v50  ;;  %v1883_v0 = vmul.f32 -0.13119948, %v6155_v20  ;;  %v2981_v38 = vrot.slane %v2972_v63, 1 }
 0x313   :  { %1890 = vrot.lane.b32.xlu1 %v1881_v19, %s4132_s0  ;;  %7723 = vst [vmem:[#allocation60_spill] sm:$0xff] %v6222_v54  ;;  %1888 = vrot.lane.b32.xlu0 %v1880_v40, %s4132_s0  ;;  %v6236_v19 = vmul.f32 -0.07909465, %v6187_v50  ;;  %v6241_v16 = vmul.f32 0.024832245, %v7677_v18  ;;  %v6245_v37 = vmax.f32 %v3333_v36, 0.0  ;;  %v2930_v40 = vadd.f32 %v2926_v49, %v2870_v11 }
 0x314   :  { %v1882_v56 = vmul.f32 -0.13119948, %v6159_v30  ;;  %v1929_v58 = vmul.f32 0.08510622, %v6155_v20  ;;  %v1935_v3 = vrot.slane %v1927_v8, 1  ;;  %v1934_v15 = vrot.slane %v1926_v62, 1 }
 0x315   :  { %7724 = vst [vmem:[#allocation61_spill] sm:$0xff] %v6241_v16  ;;  %7725 = vst [vmem:[#allocation62_spill] sm:$0xff] %v6245_v37  ;;  %v1928_v42 = vmul.f32 0.08510622, %v6159_v30  ;;  %v6250_v63 = vmul.f32 -0.15182531, %v6187_v50  ;;  %v6263_v50 = vpop.permute.xlu0 %1368 }
 0x316   :  { %v3335_v6 = vadd.f32 0.16410556, %v3265_v31  ;;  %v7727_v49 = vrot.slane %v6209_v34, 1  ;;  %v3069_v8 = vrot.slane %v3060_v59, 2  ;;  %v1938_v31 = vrot.slane %v1929_v58, 1 }
 0x317   :  { %1894 = vrot.lane.b32.xlu1 %v1883_v0, %s4132_s0  ;;  %7726 = vst [vmem:[#allocation63_spill] sm:$0xff] %v6250_v63  ;;  %1892 = vrot.lane.b32.xlu0 %v1882_v56, %s4132_s0  ;;  %v3134_v0 = vmul.f32 -0.09296386, %v7689_v57  ;;  %v3409_v56 = vmul.f32 -0.12132685, %v6245_v37  ;;  %v1936_v36 = vsel %vm88_vm0, %v1934_v15, %v1935_v3  ;;  %v1937_v24 = vrot.slane %v1928_v42, 1 }
 0x318   :  { %v2983_v11 = vsel %vm88_vm0, %v2981_v38, %v7727_v49  ;;  %v3180_v47 = vmul.f32 -0.2805107, %v7689_v57  ;;  %v1957_v38 = vmul.f32 0.037148517, %v6133_v43  ;;  %v1956_v59 = vmul.f32 0.037148517, %v6138_v2 }
 0x319   :  { %v2990_v23 = vadd.f32 %v2983_v11, %v2930_v40  ;;  %v3431_v49 = vmul.f32 0.115704656, %v6245_v37  ;;  %v6273_v62 = vmax.f32 %v3335_v6, 0.0  ;;  %v3471_v58 = vmul.f32 -0.07909465, %v6245_v37 }
 0x31a   :  { %v3493_v54 = vmul.f32 -0.15182531, %v6245_v37  ;;  %v7729_v42 = vrot.slane %v6241_v16, 2  ;;  %v1959_v6 = vmul.f32 0.037148517, %v6155_v20  ;;  %v3417_v55 = vrot.slane %v3409_v56, 1 }
 0x31b   :  { %1942 = vrot.lane.b32.xlu1 %v1935_v3, %s4131_s16  ;;  %1940 = vrot.lane.b32.xlu0 %v1936_v36, %s4131_s16  ;;  %7728 = vst [vmem:[#allocation64_spill] sm:$0xff] %v6273_v62  ;;  %v6284_v3 = vmul.f32 -0.2805107, %v7692_v13  ;;  %v3268_v36 = vmul.f32 -0.14458926, %v7689_v57  ;;  %v1939_v37 = vsel %vm88_vm0, %v1937_v24, %v1938_v31  ;;  %v1965_v61 = vrot.slane %v1957_v38, 1 }
 0x31c   :  { %v6277_v11 = vpop.permute.xlu1 %1426  ;;  %v3071_v15 = vsel %vm171_vm1, %v3069_v8, %v7729_v42  ;;  %v6289_v40 = vmul.f32 -0.14458926, %v7692_v13  ;;  %v1964_v12 = vrot.slane %v1956_v59, 1  ;;  %v1958_v8 = vmul.f32 0.037148517, %v6159_v30  ;;  %v7734_v59 = vld [vmem:[#allocation52_spill] sm:$0xff] }
 0x31d   :  { %7730 = vst [vmem:[#allocation65_spill] sm:$0xff] %v6284_v3  ;;  %v1425_v52 = vpop.permute.xlu0 %1424  ;;  %v3078_v25 = vadd.f32 %v3071_v15, %v2990_v23  ;;  %v3439_v42 = vrot.slane %v3431_v49, 1  ;;  %v6296_v57 = vmul.f32 -0.12132685, %v6273_v62  ;;  %v3479_v10 = vrot.slane %v3471_v58, 2 }
 0x31e   :  { %7731 = vst [vmem:[#allocation66_spill] sm:$0xff] %v6289_v40  ;;  %v3189_v56 = vrot.slane %v3180_v47, 1  ;;  %v7732_v15 = vrot.slane %v6166_v33, 1  ;;  %v3501_v24 = vrot.slane %v3493_v54, 2  ;;  %v3277_v38 = vrot.slane %v3268_v36, 2 }
 0x31f   :  { %1946 = vrot.lane.b32.xlu1 %v1938_v31, %s4131_s16  ;;  %1944 = vrot.lane.b32.xlu0 %v1939_v37, %s4131_s16  ;;  %v7450_v31 = vrot.slane %v6284_v3, 1  ;;  %v1412_v16 = vmul.f32 -0.13358574, %v7734_v59  ;;  %v2009_v49 = vmul.f32 0.04446602, %v6133_v43  ;;  %v7735_v63 = vrot.slane %v6169_v9, 1 }
 0x320   :  { %v6298_v23 = vpop.permute.xlu1 %1430  ;;  %v6303_v13 = vsel %vm88_vm0, %v7732_v15, %v3417_v55  ;;  %v3138_v58 = vadd.f32 %v3134_v0, %v3078_v25  ;;  %v1966_v55 = vsel %vm88_vm0, %v1964_v12, %v1965_v61  ;;  %v1968_v33 = vrot.slane %v1959_v6, 1 }
 0x321   :  { %7733 = vst [vmem:[#allocation67_spill] sm:$0xff] %v6303_v13  ;;  %v1429_v37 = vpop.permute.xlu0 %1428  ;;  %v6311_v47 = vsel %vm88_vm0, %v7735_v63, %v3439_v42  ;;  %v1967_v54 = vrot.slane %v1958_v8, 1  ;;  %v2008_v15 = vmul.f32 0.04446602, %v6138_v2  ;;  %v3420_v36 = vrot.slane %v6296_v57, 1  ;;  %v7740_v8 = vld [vmem:[#allocation57_spill] sm:$0xff] }
 0x322   :  { %7736 = vst [vmem:[#allocation52_spill] sm:$0xff] %v6311_v47  ;;  %v6319_v59 = vmul.f32 0.115704656, %v6273_v62  ;;  %v6322_v9 = vmul.f32 -0.07909465, %v6273_v62  ;;  %v7737_v25 = vrot.slane %v6172_v41, 2  ;;  %v1436_v12 = vadd.f32 %v1425_v52, %v1412_v16 }
 0x323   :  { %1972 = vrot.lane.b32.xlu1 %v1965_v61, %s4132_s0  ;;  %1970 = vrot.lane.b32.xlu0 %v1966_v55, %s4132_s0  ;;  %v6332_v0 = vmul.f32 -0.15182531, %v6273_v62  ;;  %v3191_v57 = vsel %vm88_vm0, %v3189_v56, %v7450_v31  ;;  %v1414_v42 = vmul.f32 -0.13358574, %v7740_v8  ;;  %v2017_v47 = vrot.slane %v2009_v49, 2  ;;  %v7743_v49 = vld [vmem:[#allocation8_spill] sm:$0xff] }
 0x324   :  { %v6327_v63 = vsel %vm171_vm1, %v7737_v25, %v3479_v10  ;;  %v6329_v61 = vpop.permute.xlu1 %1450  ;;  %v2011_v41 = vmul.f32 0.04446602, %v6155_v20  ;;  %v3198_v10 = vadd.f32 %v3191_v57, %v3138_v58  ;;  %v1969_v52 = vsel %vm88_vm0, %v1967_v54, %v1968_v33  ;;  %v7744_v58 = vld [vmem:[#allocation7_spill] sm:$0xff] }
 0x325   :  { %7738 = vst [vmem:[#allocation68_spill] sm:$0xff] %v6327_v63  ;;  %7739 = vst [vmem:[#allocation69_spill] sm:$0xff] %v6332_v0  ;;  %v1449_v55 = vpop.permute.xlu0 %1448  ;;  %v2016_v16 = vrot.slane %v2008_v15, 2  ;;  %v2010_v62 = vmul.f32 0.04446602, %v6159_v30  ;;  %v3442_v56 = vrot.slane %v6319_v59, 1  ;;  %v1438_v57 = vadd.f32 %v1429_v37, %v1414_v42 }
 0x326   :  { %v1460_v25 = vadd.f32 %v1449_v55, %v1436_v12  ;;  %v7741_v31 = vrot.slane %v6179_v21, 2  ;;  %v2554_v6 = vmul.f32 -0.12198373, %v7743_v49  ;;  %v6352_v12 = vmul.f32 -0.12198373, %v7744_v58  ;;  %v7749_v15 = vld [vmem:[#allocation54_spill] sm:$0xff] }
 0x327   :  { %1976 = vrot.lane.b32.xlu1 %v1968_v33, %s4132_s0  ;;  %1974 = vrot.lane.b32.xlu0 %v1969_v52, %s4132_s0  ;;  %v7745_v33 = vld [vmem:[#allocation50_spill] sm:$0xff]  ;;  %v7746_v59 = vrot.slane %v6289_v40, 2  ;;  %v7747_v52 = vld [vmem:[#allocation41_spill] sm:$0xff]  ;;  %v2020_v63 = vrot.slane %v2011_v41, 2  ;;  %v2039_v3 = vmul.f32 0.013293147, %v6133_v43  ;;  %v2018_v42 = vsel %vm171_vm1, %v2016_v16, %v2017_v47 }
 0x328   :  { %v6348_v8 = vsel %vm171_vm1, %v7741_v31, %v3501_v24  ;;  %v6354_v55 = vpop.permute.xlu1 %1454  ;;  %v6357_v54 = vadd.f32 %v7745_v33, %v1460_v25  ;;  %v7748_v24 = vld [vmem:[#allocation45_spill] sm:$0xff]  ;;  %v2019_v25 = vrot.slane %v2010_v62, 2  ;;  %v2038_v33 = vmul.f32 0.013293147, %v6138_v2  ;;  %v7750_v40 = vld [vmem:[#allocation42_spill] sm:$0xff] }
 0x329   :  { %7742 = vst [vmem:[#allocation57_spill] sm:$0xff] %v6348_v8  ;;  %v3279_v21 = vsel %vm171_vm1, %v3277_v38, %v7746_v59  ;;  %v1281_v31 = vadd.f32 %v7748_v24, %v7747_v52  ;;  %v1453_v8 = vpop.permute.xlu0 %1452  ;;  %v1280_v22 = vadd.f32 %v7750_v40, %v7749_v15  ;;  %v2562_v38 = vrot.slane %v2554_v6, 1  ;;  %v7754_v6 = vld [vmem:[#allocation56_spill] sm:$0xff]  ;;  %v7755_v16 = vld [vmem:[#allocation33_spill] sm:$0xff] }
 0x32a   :  { %v3286_v13 = vadd.f32 %v3279_v21, %v3198_v10  ;;  %v1462_v37 = vadd.f32 %v1453_v8, %v1438_v57  ;;  %v2642_v41 = vmul.f32 -0.030051352, %v7743_v49  ;;  %v7751_v57 = vld [vmem:[#allocation27_spill] sm:$0xff]  ;;  %v7752_v62 = vrot.slane %v6230_v7, 1 }
 0x32b   :  { %2024 = vrot.lane.b32.xlu1 %v2017_v47, %s4131_s16  ;;  %2022 = vrot.lane.b32.xlu0 %v2018_v42, %s4131_s16  ;;  %v1377_v10 = vadd.f32 %v6216_v14, %v1281_v31  ;;  %v6386_v40 = vmul.f32 -0.030051352, %v7744_v58  ;;  %v1283_v15 = vadd.f32 %v7755_v16, %v7754_v6  ;;  %v1376_v52 = vadd.f32 %v6224_v45, %v1280_v22 }
 0x32c   :  { %v6375_v8 = vpop.permute.xlu1 %1646  ;;  %v6378_v21 = vadd.f32 %v7751_v57, %v1462_v37  ;;  %v6383_v47 = vsel %vm88_vm0, %v7752_v62, %v3420_v36  ;;  %v2047_v14 = vrot.slane %v2039_v3, 2  ;;  %v2520_v31 = vmul.f32 0.24072729, %v7743_v49  ;;  %v7756_v57 = vld [vmem:[#allocation32_spill] sm:$0xff]  ;;  %v7757_v62 = vld [vmem:[#allocation49_spill] sm:$0xff] }
 0x32d   :  { %7753 = vst [vmem:[#allocation8_spill] sm:$0xff] %v6383_v47  ;;  %v6391_v24 = vpop.permute.xlu0 %1644  ;;  %v2021_v7 = vsel %vm171_vm1, %v2019_v25, %v2020_v63  ;;  %v2046_v37 = vrot.slane %v2038_v33, 2  ;;  %v2041_v36 = vmul.f32 0.013293147, %v6155_v20  ;;  %v2040_v42 = vmul.f32 0.013293147, %v6159_v30 }
 0x32e   :  { %v1282_v59 = vadd.f32 %v7757_v62, %v7756_v57  ;;  %v3342_v22 = vadd.f32 0.1826225, %v3286_v13  ;;  %v7758_v45 = vrot.slane %v6352_v12, 1  ;;  %v2650_v6 = vrot.slane %v2642_v41, 2  ;;  %v7759_v33 = vld [vmem:[#allocation10_spill] sm:$0xff] }
 0x32f   :  { %2028 = vrot.lane.b32.xlu1 %v2020_v63, %s4131_s16  ;;  %2026 = vrot.lane.b32.xlu0 %v2021_v7, %s4131_s16  ;;  %v1405_v16 = vadd.f32 -0.05406375, %v1377_v10  ;;  %v1379_v43 = vadd.f32 %v6256_v5, %v1283_v15  ;;  %v6409_v30 = vmul.f32 0.20564933, %v7759_v33  ;;  %v1404_v20 = vadd.f32 -0.05406375, %v1376_v52 }
 0x330   :  { %v2564_v3 = vsel %vm88_vm0, %v2562_v38, %v7758_v45  ;;  %v6405_v63 = vpop.permute.xlu1 %1502  ;;  %v1378_v57 = vadd.f32 %v6263_v50, %v1282_v59  ;;  %v6413_v13 = vmul.f32 0.20564933, %v7642_v27  ;;  %v6416_v38 = vmul.f32 0.1075771, %v7759_v33 }
 0x331   :  { %v1501_v7 = vpop.permute.xlu0 %1500  ;;  %v2048_v5 = vsel %vm171_vm1, %v2046_v37, %v2047_v14  ;;  %v2050_v41 = vrot.slane %v2041_v36, 2  ;;  %v2049_v10 = vrot.slane %v2040_v42, 2  ;;  %v2572_v15 = vadd.f32 %v2564_v3, %v2520_v31  ;;  %v7764_v42 = vld [vmem:[#allocation34_spill] sm:$0xff] }
 0x332   :  { %v7760_v52 = vrot.slane %v6233_v4, 1  ;;  %v6427_v62 = vmax.f32 %v3342_v22, 0.0  ;;  %v2716_v45 = vmul.f32 -0.22825252, %v7759_v33  ;;  %v6430_v25 = vmax.f32 %v1405_v16, 0.0 }
 0x333   :  { %2054 = vrot.lane.b32.xlu1 %v2047_v14, %s4132_s0  ;;  %2052 = vrot.lane.b32.xlu0 %v2048_v5, %s4132_s0  ;;  %v1407_v2 = vadd.f32 -0.05406375, %v1379_v43  ;;  %v7763_v31 = vrot.slane %v6386_v40, 2  ;;  %v6438_v4 = vmul.f32 0.1075771, %v7642_v27  ;;  %v2770_v5 = vrot.slane %v6409_v30, 1 }
 0x334   :  { %v6424_v50 = vsel %vm88_vm0, %v7760_v52, %v3442_v56  ;;  %7762 = vst [vmem:[#allocation50_spill] sm:$0xff] %v6427_v62  ;;  %v6432_v14 = vpop.permute.xlu1 %1506  ;;  %v6440_v56 = vmax.f32 %v1404_v20, 0.0  ;;  %v1406_v36 = vadd.f32 -0.05406375, %v1378_v57  ;;  %v1413_v22 = vmul.f32 -0.13358574, %v7764_v42 }
 0x335   :  { %7761 = vst [vmem:[#allocation7_spill] sm:$0xff] %v6424_v50  ;;  %v2652_v37 = vsel %vm171_vm1, %v2650_v6, %v7763_v31  ;;  %v1505_v3 = vpop.permute.xlu0 %1504  ;;  %v2051_v43 = vsel %vm171_vm1, %v2049_v10, %v2050_v41  ;;  %v2858_v6 = vrot.slane %v6416_v38, 2  ;;  %v7765_v20 = vld [vmem:[#allocation11_spill] sm:$0xff]  ;;  %v6452_v42 = vmul.f32 -0.077917226, %v7649_v53 }
 0x336   :  { %v2660_v16 = vadd.f32 %v2652_v37, %v2572_v15  ;;  %v1437_v31 = vadd.f32 %v6277_v11, %v1413_v22  ;;  %v2970_v57 = vmul.f32 -0.077917226, %v7765_v20  ;;  %v3058_v30 = vmul.f32 0.024832245, %v7765_v20  ;;  %v7768_v37 = vld [vmem:[#allocation43_spill] sm:$0xff] }
 0x337   :  { %2058 = vrot.lane.b32.xlu1 %v2050_v41, %s4132_s0  ;;  %2056 = vrot.lane.b32.xlu0 %v2051_v43, %s4132_s0  ;;  %7766 = vst [vmem:[#allocation41_spill] sm:$0xff] %v6452_v42  ;;  %v6455_v59 = vmax.f32 %v1407_v2, 0.0  ;;  %v1512_v41 = vadd.f32 %v1501_v7, %v6357_v54  ;;  %v2077_v15 = vmul.f32 0.119933486, %v6430_v25  ;;  %v6460_v38 = vmul.f32 0.024832245, %v7649_v53 }
 0x338   :  { %v1533_v10 = vpop.permute.xlu1 %1532  ;;  %v6462_v11 = vmax.f32 %v1406_v36, 0.0  ;;  %v1415_v22 = vmul.f32 -0.13358574, %v7768_v37  ;;  %v1461_v43 = vadd.f32 %v6329_v61, %v1437_v31  ;;  %v2076_v50 = vmul.f32 0.119933486, %v6440_v56  ;;  %v7770_v54 = vld [vmem:[#allocation6_spill] sm:$0xff] }
 0x339   :  { %7767 = vst [vmem:[#allocation45_spill] sm:$0xff] %v6460_v38  ;;  %v1531_v52 = vpop.permute.xlu0 %1530  ;;  %v2720_v2 = vadd.f32 %v2716_v45, %v2660_v16  ;;  %v2924_v7 = vmul.f32 -0.11761633, %v7765_v20  ;;  %v2978_v36 = vrot.slane %v2970_v57, 1  ;;  %v7465_v37 = vrot.slane %v6452_v42, 1 }
 0x33a   :  { %v1542_v47 = vadd.f32 %v1531_v52, %v1512_v41  ;;  %v1439_v33 = vadd.f32 %v6298_v23, %v1415_v22  ;;  %v3066_v62 = vrot.slane %v3058_v30, 2  ;;  %v1514_v61 = vadd.f32 %v1505_v3, %v6378_v21  ;;  %v7769_v41 = vld [vmem:[#allocation15_spill] sm:$0xff] }
 0x33b   :  { %2086 = vrot.lane.b32.xlu1 %v2077_v15, %s4131_s16  ;;  %2084 = vrot.lane.b32.xlu0 %v2076_v50, %s4131_s16  ;;  %v2079_v52 = vmul.f32 0.119933486, %v6455_v59  ;;  %v7464_v45 = vrot.slane %v6460_v38, 2  ;;  %v7771_v20 = vrot.slane %v7770_v54, 1  ;;  %v2078_v50 = vmul.f32 0.119933486, %v6462_v11 }
 0x33c   :  { %v1537_v31 = vpop.permute.xlu1 %1536  ;;  %v1564_v15 = vadd.f32 %v7769_v41, %v1542_v47  ;;  %v1463_v16 = vadd.f32 %v6354_v55, %v1439_v33  ;;  %v7772_v57 = vrot.slane %v6413_v13, 1  ;;  %v7773_v47 = vrot.slane %v6438_v4, 2  ;;  %v7774_v54 = vld [vmem:[#allocation51_spill] sm:$0xff] }
 0x33d   :  { %v1483_v23 = vadd.f32 %v7771_v20, %v1461_v43  ;;  %v1535_v22 = vpop.permute.xlu0 %1534  ;;  %v6489_v55 = vmul.f32 -0.09296386, %v7667_v29  ;;  %v2980_v20 = vsel %vm88_vm0, %v2978_v36, %v7465_v37  ;;  %v6500_v43 = vmul.f32 -0.2805107, %v7668_v17  ;;  %v7775_v36 = vld [vmem:[#allocation48_spill] sm:$0xff] }
 0x33e   :  { %v2772_v30 = vsel %vm88_vm0, %v2770_v5, %v7772_v57  ;;  %v1544_v21 = vadd.f32 %v1535_v22, %v1514_v61  ;;  %v2860_v41 = vsel %vm171_vm1, %v2858_v6, %v7773_v47  ;;  %v6497_v5 = vmul.f32 -0.2805107, %v7667_v29 }
 0x33f   :  { %2090 = vrot.lane.b32.xlu1 %v2079_v52, %s4131_s16  ;;  %v2780_v3 = vadd.f32 %v2772_v30, %v2720_v2  ;;  %v1513_v33 = vadd.f32 %v6405_v63, %v1483_v23  ;;  %2088 = vrot.lane.b32.xlu0 %v2078_v50, %s4131_s16  ;;  %v2101_v6 = vmul.f32 0.16415529, %v6430_v25  ;;  %v6507_v63 = vsel %vm171_vm1, %v3066_v62, %v7464_v45 }
 0x340   :  { %v1585_v2 = vpop.permute.xlu1 %1584  ;;  %v1566_v61 = vadd.f32 %v7774_v54, %v1544_v21  ;;  %v6510_v52 = vmul.f32 -0.14458926, %v7667_v29  ;;  %v7776_v23 = vrot.slane %v7775_v36, 1  ;;  %v2100_v30 = vmul.f32 0.16415529, %v6440_v56 }
 0x341   :  { %v1543_v50 = vadd.f32 %v1533_v10, %v1513_v33  ;;  %v1583_v57 = vpop.permute.xlu0 %1582  ;;  %v2523_v47 = vmul.f32 0.24072729, %v7644_v48  ;;  %v2147_v21 = vmul.f32 -0.025521636, %v6430_v25  ;;  %v2146_v54 = vmul.f32 -0.025521636, %v6440_v56 }
 0x342   :  { %v1485_v22 = vadd.f32 %v7776_v23, %v1463_v16  ;;  %v2868_v62 = vadd.f32 %v2860_v41, %v2780_v3  ;;  %v2521_v45 = vmul.f32 0.24072729, %v7744_v58  ;;  %v6524_v16 = vmul.f32 -0.14458926, %v7668_v17 }
 0x343   :  { %2110 = vrot.lane.b32.xlu1 %v2101_v6, %s4132_s0  ;;  %2108 = vrot.lane.b32.xlu0 %v2100_v30, %s4132_s0  ;;  %v7777_v33 = vrot.slane %v6057_v51, 1  ;;  %v2103_v23 = vmul.f32 0.16415529, %v6455_v59  ;;  %v7778_v41 = vrot.slane %v6352_v12, 1  ;;  %v7779_v30 = vld [vmem:[#allocation55_spill] sm:$0xff]  ;;  %v7781_v12 = vrot.slane %v6093_v60, 2 }
 0x344   :  { %v1515_v37 = vadd.f32 %v6432_v14, %v1485_v22  ;;  %v1589_v6 = vpop.permute.xlu1 %1588  ;;  %v7780_v38 = vrot.slane %v7779_v30, 2  ;;  %v2102_v17 = vmul.f32 0.16415529, %v6462_v11  ;;  %v2149_v51 = vmul.f32 -0.025521636, %v6455_v59 }
 0x345   :  { %v2575_v36 = vadd.f32 %v7777_v33, %v2523_v47  ;;  %v2573_v14 = vadd.f32 %v7778_v41, %v2521_v45  ;;  %v1587_v0 = vpop.permute.xlu0 %1586  ;;  %v2155_v47 = vrot.slane %v2147_v21, 1  ;;  %v2154_v33 = vrot.slane %v2146_v54, 1 }
 0x346   :  { %v1545_v22 = vadd.f32 %v1537_v31, %v1515_v37  ;;  %v1565_v10 = vadd.f32 %v7780_v38, %v1543_v50  ;;  %v2148_v29 = vmul.f32 -0.025521636, %v6462_v11  ;;  %v2928_v42 = vadd.f32 %v2924_v7, %v2868_v62  ;;  %v7783_v7 = vld [vmem:[#allocation5_spill] sm:$0xff] }
 0x347   :  { %2114 = vrot.lane.b32.xlu1 %v2103_v23, %s4132_s0  ;;  %2112 = vrot.lane.b32.xlu0 %v2102_v17, %s4132_s0  ;;  %v2663_v37 = vadd.f32 %v7781_v12, %v2575_v36  ;;  %v2719_v38 = vmul.f32 -0.22825252, %v7662_v46  ;;  %v2717_v31 = vmul.f32 -0.22825252, %v7642_v27  ;;  %v1594_v45 = vadd.f32 %v1583_v57, %v1564_v15 }
 0x348   :  { %v1595_v3 = vadd.f32 %v1585_v2, %v1565_v10  ;;  %v1629_v50 = vmul.f32 -0.15577857, %v5624_v39  ;;  %v1615_v41 = vpop.permute.xlu1 %1614  ;;  %v1628_v21 = vmul.f32 -0.15577857, %v5635_v44  ;;  %v7782_v54 = vrot.slane %v6386_v40, 2 }
 0x349   :  { %v7784_v2 = vrot.slane %v7783_v7, 2  ;;  %v1613_v10 = vpop.permute.xlu0 %1612  ;;  %v2158_v60 = vrot.slane %v2149_v51, 1  ;;  %v2177_v36 = vmul.f32 0.13599114, %v6430_v25  ;;  %v2156_v15 = vsel %vm88_vm0, %v2154_v33, %v2155_v47 }
 0x34a   :  { %v2661_v23 = vadd.f32 %v7782_v54, %v2573_v14  ;;  %v1625_v17 = vadd.f32 %v1615_v41, %v1595_v3  ;;  %v1624_v30 = vadd.f32 %v1613_v10, %v1594_v45  ;;  %v2157_v39 = vrot.slane %v2148_v29, 1 }
 0x34b   :  { %v1567_v62 = vadd.f32 %v7784_v2, %v1545_v22  ;;  %2162 = vrot.lane.b32.xlu1 %v2155_v47, %s4131_s16  ;;  %v2176_v57 = vmul.f32 0.13599114, %v6440_v56  ;;  %2160 = vrot.lane.b32.xlu0 %v2156_v15, %s4131_s16  ;;  %v2988_v40 = vadd.f32 %v2980_v20, %v2928_v42  ;;  %v2723_v14 = vadd.f32 %v2719_v38, %v2663_v37 }
 0x34c   :  { %v1633_v12 = vadd.f32 %v1629_v50, %v1625_v17  ;;  %v1596_v22 = vadd.f32 %v1587_v0, %v1566_v61  ;;  %v1632_v3 = vadd.f32 %v1628_v21, %v1624_v30  ;;  %v1619_v41 = vpop.permute.xlu1 %1618  ;;  %v1631_v51 = vmul.f32 -0.15577857, %v5677_v32 }
 0x34d   :  { %v1597_v44 = vadd.f32 %v1589_v6, %v1567_v62  ;;  %v2721_v54 = vadd.f32 %v2717_v31, %v2661_v23  ;;  %v1617_v7 = vpop.permute.xlu0 %1616  ;;  %v1630_v2 = vmul.f32 -0.15577857, %v5684_v35  ;;  %v2185_v47 = vrot.slane %v2177_v36, 1 }
 0x34e   :  { %v2179_v29 = vmul.f32 0.13599114, %v6455_v59  ;;  %v1626_v33 = vadd.f32 %v1617_v7, %v1596_v22  ;;  %v2159_v6 = vsel %vm88_vm0, %v2157_v39, %v2158_v60  ;;  %v2184_v42 = vrot.slane %v2176_v57, 1 }
 0x34f   :  { %v1627_v45 = vadd.f32 %v1619_v41, %v1597_v44  ;;  %2166 = vrot.lane.b32.xlu1 %v2158_v60, %s4131_s16  ;;  %v2178_v0 = vmul.f32 0.13599114, %v6462_v11  ;;  %2164 = vrot.lane.b32.xlu0 %v2159_v6, %s4131_s16  ;;  %v7785_v32 = vrot.slane %v6131_v1, 1  ;;  %v2578_v37 = vmul.f32 0.10101583, %v7643_v26 }
 0x350   :  { %v6566_v35 = vmul.f32 0.10101583, %v7644_v48  ;;  %v1651_v38 = vpop.permute.xlu1 %1650  ;;  %v1634_v31 = vadd.f32 %v1630_v2, %v1626_v33  ;;  %v3076_v50 = vadd.f32 %v6507_v63, %v2988_v40  ;;  %v3275_v21 = vrot.slane %v6524_v16, 2 }
 0x351   :  { %v1635_v20 = vadd.f32 %v1631_v51, %v1627_v45  ;;  %v2783_v61 = vadd.f32 %v7785_v32, %v2723_v14  ;;  %v7786_v23 = vrot.slane %v6413_v13, 1  ;;  %v1649_v17 = vpop.permute.xlu0 %1648  ;;  %v2229_v10 = vmul.f32 -0.1451317, %v6430_v25 }
 0x352   :  { %v2228_v1 = vmul.f32 -0.1451317, %v6440_v56  ;;  %v7787_v60 = vrot.slane %v6322_v9, 2  ;;  %v7788_v36 = vrot.slane %v6236_v19, 2  ;;  %v2927_v15 = vmul.f32 -0.11761633, %v7677_v18 }
 0x353   :  { %v2781_v62 = vadd.f32 %v7786_v23, %v2721_v54  ;;  %2192 = vrot.lane.b32.xlu1 %v2185_v47, %s4132_s0  ;;  %v2186_v63 = vsel %vm88_vm0, %v2184_v42, %v2185_v47  ;;  %v2188_v13 = vrot.slane %v2179_v29, 1  ;;  %v2187_v39 = vrot.slane %v2178_v0, 1 }
 0x354   :  { %v6579_v30 = vsel %vm171_vm1, %v7788_v36, %v7787_v60  ;;  %v2925_v57 = vmul.f32 -0.11761633, %v7649_v53  ;;  %2190 = vrot.lane.b32.xlu0 %v2186_v63, %s4132_s0  ;;  %v1657_v44 = vadd.f32 %v6375_v8, %v1633_v12  ;;  %v7789_v9 = vrot.slane %v6153_v28, 2  ;;  %v1671_v22 = vpop.permute.xlu1 %1670 }
 0x355   :  { %v2587_v40 = vrot.slane %v2578_v37, 1  ;;  %v2588_v14 = vrot.slane %v6566_v35, 1  ;;  %v1656_v41 = vadd.f32 %v6391_v24, %v1632_v3  ;;  %v3136_v51 = vadd.f32 %v6489_v55, %v3076_v50  ;;  %v1669_v47 = vpop.permute.xlu0 %1668  ;;  %v7791_v3 = vld [vmem:[#allocation21_spill] sm:$0xff]  ;;  %v7793_v50 = vld [vmem:[#allocation26_spill] sm:$0xff]  ;;  %v7822_v35 = vld [vmem:[#allocation67_spill] sm:$0xff] }
 0x356   :  { %v2871_v19 = vadd.f32 %v7789_v9, %v2783_v61  ;;  %v7790_v54 = vrot.slane %v6438_v4, 2  ;;  %v2666_v7 = vmul.f32 0.20621128, %v7643_v26  ;;  %v1681_v2 = vadd.f32 %v1671_v22, %v1657_v44 }
 0x357   :  { %v2237_v29 = vrot.slane %v2229_v10, 2  ;;  %v2236_v8 = vrot.slane %v2228_v1, 2  ;;  %v2231_v28 = vmul.f32 -0.1451317, %v6455_v59  ;;  %v1680_v12 = vadd.f32 %v1669_v47, %v1656_v41  ;;  %2196 = vrot.lane.b32.xlu1 %v2188_v13, %s4132_s0  ;;  %v7800_v47 = vld [vmem:[#allocation41_spill] sm:$0xff] }
 0x358   :  { %v2869_v45 = vadd.f32 %v7790_v54, %v2781_v62  ;;  %v2189_v33 = vsel %vm88_vm0, %v2187_v39, %v2188_v13  ;;  %v2230_v24 = vmul.f32 -0.1451317, %v6462_v11  ;;  %v6600_v55 = vmul.f32 0.20621128, %v7644_v48  ;;  %v1675_v37 = vpop.permute.xlu1 %1674  ;;  %v7794_v13 = vld [vmem:[#allocation25_spill] sm:$0xff] }
 0x359   :  { %v1659_v4 = vadd.f32 %v1651_v38, %v1635_v20  ;;  %2194 = vrot.lane.b32.xlu0 %v2189_v33, %s4132_s0  ;;  %v7792_v6 = vrot.slane %v7791_v3, 1  ;;  %v2931_v0 = vadd.f32 %v2927_v15, %v2871_v19  ;;  %v2589_v32 = vsel %vm88_vm0, %v2587_v40, %v2588_v14  ;;  %v1673_v60 = vpop.permute.xlu0 %1672 }
 0x35a   :  { %v1658_v61 = vadd.f32 %v1649_v17, %v1634_v31  ;;  %v1702_v23 = vadd.f32 %v7793_v50, %v1680_v12  ;;  %v2929_v62 = vadd.f32 %v2925_v57, %v2869_v45  ;;  %v2576_v10 = vmul.f32 0.10101583, %v7743_v49  ;;  %v7799_v45 = vld [vmem:[#allocation9_spill] sm:$0xff] }
 0x35b   :  { %v1703_v42 = vadd.f32 %v7792_v6, %v1681_v2  ;;  %v1683_v1 = vadd.f32 %v1675_v37, %v1659_v4  ;;  %v2238_v20 = vsel %vm171_vm1, %v2236_v8, %v2237_v29  ;;  %v2240_v38 = vrot.slane %v2231_v28, 2  ;;  %2244 = vrot.lane.b32.xlu1 %v2237_v29, %s4131_s16 }
 0x35c   :  { %v6612_v36 = vmul.f32 0.10101583, %v7744_v58  ;;  %v1682_v15 = vadd.f32 %v1673_v60, %v1658_v61  ;;  %v2239_v63 = vrot.slane %v2230_v24, 2  ;;  %v2258_v31 = vmul.f32 0.04117791, %v6440_v56  ;;  %v1723_v54 = vpop.permute.xlu1 %1722  ;;  %v7802_v24 = vld [vmem:[#allocation69_spill] sm:$0xff] }
 0x35d   :  { %v6617_v17 = vmul.f32 0.04117791, %v6430_v25  ;;  %2242 = vrot.lane.b32.xlu0 %v2238_v20, %s4131_s16  ;;  %v7795_v39 = vrot.slane %v7794_v13, 1  ;;  %v7796_v44 = vrot.slane %v6500_v43, 1  ;;  %v7797_v9 = vrot.slane %v6497_v5, 1  ;;  %v1721_v33 = vpop.permute.xlu0 %1720  ;;  %v7804_v5 = vld [vmem:[#allocation63_spill] sm:$0xff] }
 0x35e   :  { %v7798_v40 = vrot.slane %v6209_v34, 1  ;;  %v2526_v41 = vmul.f32 0.061629325, %v7643_v26  ;;  %v1704_v2 = vadd.f32 %v7799_v45, %v1682_v15  ;;  %v7801_v29 = vrot.slane %v7800_v47, 1  ;;  %v7808_v60 = vld [vmem:[#allocation61_spill] sm:$0xff]  ;;  %v7814_v47 = vld [vmem:[#allocation46_spill] sm:$0xff] }
 0x35f   :  { %v1705_v57 = vadd.f32 %v7795_v39, %v1683_v1  ;;  %v3188_v19 = vsel %vm88_vm0, %v7797_v9, %v7796_v44  ;;  %v2675_v28 = vrot.slane %v2666_v7, 2  ;;  %v2676_v12 = vrot.slane %v6600_v55, 2  ;;  %2248 = vrot.lane.b32.xlu1 %v2240_v38, %s4131_s16  ;;  %v7812_v9 = vld [vmem:[#allocation24_spill] sm:$0xff] }
 0x360   :  { %v2991_v22 = vadd.f32 %v7798_v40, %v2931_v0  ;;  %v2989_v8 = vadd.f32 %v7801_v29, %v2929_v62  ;;  %v7803_v4 = vrot.slane %v7802_v24, 2  ;;  %v7805_v3 = vrot.slane %v7804_v5, 2  ;;  %v7806_v62 = vld [vmem:[#allocation50_spill] sm:$0xff]  ;;  %v1727_v15 = vpop.permute.xlu1 %1726  ;;  %v7827_v55 = vld [vmem:[#allocation52_spill] sm:$0xff] }
 0x361   :  { %v3196_v34 = vadd.f32 %v3188_v19, %v3136_v51  ;;  %v2596_v0 = vadd.f32 %v2589_v32, %v2526_v41  ;;  %v2584_v26 = vrot.slane %v2576_v10, 1  ;;  %v2241_v61 = vsel %vm171_vm1, %v2239_v63, %v2240_v38  ;;  %v7810_v63 = vld [vmem:[#allocation45_spill] sm:$0xff]  ;;  %v1725_v44 = vpop.permute.xlu0 %1724 }
 0x362   :  { %v6639_v6 = vsel %vm171_vm1, %v7805_v3, %v7803_v4  ;;  %v2266_v37 = vrot.slane %v2258_v31, 2  ;;  %v2267_v7 = vrot.slane %v6617_v17, 2  ;;  %v2585_v50 = vrot.slane %v6612_v36, 1  ;;  %2246 = vrot.lane.b32.xlu0 %v2241_v61, %s4131_s16  ;;  %v7813_v41 = vld [vmem:[#allocation13_spill] sm:$0xff] }
 0x363   :  { %v6647_v1 = vmul.f32 -0.02919833, %v7806_v62  ;;  %v7807_v51 = vrot.slane %v6510_v52, 2  ;;  %v6655_v10 = vmul.f32 0.05763638, %v7806_v62  ;;  %v7809_v20 = vrot.slane %v7808_v60, 2  ;;  %3370 = vrot.lane.b32.xlu1 %v7814_v47, %s4131_s16 }
 0x364   :  { %v7811_v36 = vrot.slane %v7810_v63, 2  ;;  %v2677_v13 = vsel %vm171_vm1, %v2675_v28, %v2676_v12  ;;  %v2664_v39 = vmul.f32 0.20621128, %v7743_v49  ;;  %v2665_v52 = vmul.f32 0.20621128, %v7744_v58  ;;  %v7815_v28 = vld [vmem:[#allocation18_spill] sm:$0xff]  ;;  %v1753_v60 = vpop.permute.xlu1 %1752 }
 0x365   :  { %v3276_v32 = vsel %vm171_vm1, %v7807_v51, %v3275_v21  ;;  %v3079_v38 = vadd.f32 %v7809_v20, %v2991_v22  ;;  %v3135_v19 = vmul.f32 -0.09296386, %v7812_v9  ;;  %v6668_v40 = vmul.f32 0.14651267, %v7806_v62 }
 0x366   :  { %v3077_v31 = vadd.f32 %v7811_v36, %v2989_v8  ;;  %v3133_v22 = vmul.f32 -0.09296386, %v7813_v41  ;;  %v2684_v45 = vadd.f32 %v2677_v13, %v2596_v0  ;;  %v2268_v29 = vsel %vm171_vm1, %v2266_v37, %v2267_v7 }
 0x367   :  { %v6676_v8 = vadd.f32 %v3276_v32, %v3196_v34  ;;  %v2726_v24 = vmul.f32 -0.042095818, %v7815_v28  ;;  %v2586_v4 = vsel %vm88_vm0, %v2584_v26, %v2585_v50  ;;  %v1733_v5 = vadd.f32 %v1723_v54, %v1703_v42  ;;  %2272 = vrot.lane.b32.xlu0 %v2268_v29, %s4132_s0  ;;  %v1751_v32 = vpop.permute.xlu0 %1750  ;;  %v7816_v54 = vld [vmem:[#allocation47_spill] sm:$0xff] }
 0x368   :  { %v3139_v3 = vadd.f32 %v3135_v19, %v3079_v38  ;;  %v2786_v61 = vmul.f32 0.1446742, %v7815_v28  ;;  %v2524_v0 = vmul.f32 0.061629325, %v7743_v49  ;;  %v1732_v51 = vadd.f32 %v1721_v33, %v1702_v23  ;;  %3382 = vrot.lane.b32.xlu1 %v7816_v54, %s4132_s0  ;;  %v7817_v49 = vld [vmem:[#allocation10_spill] sm:$0xff]  ;;  %v1757_v29 = vpop.permute.xlu1 %1756  ;;  %v7826_v54 = vld [vmem:[#allocation17_spill] sm:$0xff] }
 0x369   :  { %v6683_v20 = vadd.f32 %v3133_v22, %v3077_v31  ;;  %v2672_v63 = vrot.slane %v2664_v39, 2  ;;  %v2673_v37 = vrot.slane %v2665_v52, 2  ;;  %v1763_v34 = vadd.f32 %v1753_v60, %v1733_v5  ;;  %v7818_v39 = vld [vmem:[#allocation59_spill] sm:$0xff]  ;;  %v7819_v52 = vld [vmem:[#allocation28_spill] sm:$0xff] }
 0x36a   :  { %v2730_v36 = vadd.f32 %v2726_v24, %v2684_v45  ;;  %v2594_v13 = vadd.f32 %v2586_v4, %v2524_v0  ;;  %v2527_v26 = vmul.f32 0.061629325, %v7644_v48  ;;  %v1762_v42 = vadd.f32 %v1751_v32, %v1732_v51  ;;  %v7821_v24 = vld [vmem:[#allocation16_spill] sm:$0xff] }
 0x36b   :  { %v6689_v38 = vmul.f32 0.1446742, %v7662_v46  ;;  %v2784_v23 = vmul.f32 0.1446742, %v7817_v49  ;;  %v2525_v33 = vmul.f32 0.061629325, %v7744_v58  ;;  %v1735_v31 = vadd.f32 %v1727_v15, %v1705_v57  ;;  %3372 = vrot.lane.b32.xlu0 %v7818_v39, %s4131_s16  ;;  %v1755_v5 = vpop.permute.xlu0 %1754 }
 0x36c   :  { %v7820_v19 = vrot.slane %v7819_v52, 2  ;;  %v6700_v48 = vmul.f32 0.1446742, %v7642_v27  ;;  %v2597_v45 = vadd.f32 %v2588_v14, %v2527_v26  ;;  %v1734_v47 = vadd.f32 %v1725_v44, %v1704_v2  ;;  %3422 = vrot.lane.b32.xlu1 %v7822_v35, %s4131_s16 }
 0x36d   :  { %v6705_v4 = vadd.f32 %v7821_v24, %v1762_v42  ;;  %v2674_v58 = vsel %vm171_vm1, %v2672_v63, %v2673_v37  ;;  %v2595_v57 = vadd.f32 %v2585_v50, %v2525_v33  ;;  %v1765_v15 = vadd.f32 %v1757_v29, %v1735_v31  ;;  %v7823_v63 = vld [vmem:[#allocation60_spill] sm:$0xff]  ;;  %v7824_v50 = vld [vmem:[#allocation29_spill] sm:$0xff] }
 0x36e   :  { %v6697_v22 = vadd.f32 %v7820_v19, %v1763_v34  ;;  %v2874_v0 = vmul.f32 0.029342243, %v7815_v28  ;;  %v6710_v51 = vmul.f32 0.029342243, %v7662_v46  ;;  %v2682_v60 = vadd.f32 %v2674_v58, %v2594_v13  ;;  %v7829_v58 = vld [vmem:[#allocation65_spill] sm:$0xff] }
 0x36f   :  { %v1764_v34 = vadd.f32 %v1755_v5, %v1734_v47  ;;  %v2795_v14 = vrot.slane %v2786_v61, 1  ;;  %v2796_v2 = vrot.slane %v6689_v38, 1  ;;  %v2724_v44 = vmul.f32 -0.042095818, %v7817_v49  ;;  %3384 = vrot.lane.b32.xlu0 %v7823_v63, %s4132_s0  ;;  %v6728_v61 = vpop.permute.xlu1 %1804  ;;  %v6734_v52 = vpop.permute.xlu0 %1802  ;;  %v7832_v63 = vld [vmem:[#allocation20_spill] sm:$0xff] }
 0x370   :  { %v7825_v32 = vrot.slane %v7824_v50, 2  ;;  %v2872_v28 = vmul.f32 0.029342243, %v7817_v49  ;;  %v6724_v13 = vmul.f32 0.029342243, %v7642_v27  ;;  %v2685_v42 = vadd.f32 %v2676_v12, %v2597_v45  ;;  %3444 = vrot.lane.b32.xlu1 %v7827_v55, %s4132_s0 }
 0x371   :  { %v6731_v38 = vadd.f32 %v7826_v54, %v1764_v34  ;;  %v2792_v33 = vrot.slane %v2784_v23, 1  ;;  %v2793_v31 = vrot.slane %v6700_v48, 1  ;;  %v2683_v39 = vadd.f32 %v2673_v37, %v2595_v57  ;;  %v7828_v37 = vld [vmem:[#allocation8_spill] sm:$0xff] }
 0x372   :  { %v6720_v26 = vadd.f32 %v7825_v32, %v1765_v15  ;;  %v2883_v19 = vrot.slane %v2874_v0, 2  ;;  %v2884_v49 = vrot.slane %v6710_v51, 2  ;;  %v2728_v47 = vadd.f32 %v2724_v44, %v2682_v60 }
 0x373   :  { %v2727_v29 = vmul.f32 -0.042095818, %v7662_v46  ;;  %v2261_v12 = vmul.f32 0.04117791, %v6455_v59  ;;  %v2260_v45 = vmul.f32 0.04117791, %v6462_v11  ;;  %v2797_v23 = vsel %vm88_vm0, %v2795_v14, %v2796_v2  ;;  %3424 = vrot.lane.b32.xlu0 %v7828_v37, %s4131_s16  ;;  %v6749_v0 = vpop.permute.xlu1 %1808  ;;  %v6753_v14 = vpop.permute.xlu0 %1806 }
 0x374   :  { %v2725_v48 = vmul.f32 -0.042095818, %v7642_v27  ;;  %v3340_v24 = vadd.f32 0.1826225, %v6676_v8  ;;  %v7830_v57 = vrot.slane %v7829_v58, 1  ;;  %v2804_v46 = vadd.f32 %v2797_v23, %v2730_v36  ;;  %2274 = vrot.lane.b32.xlu1 %v2267_v7, %s4132_s0  ;;  %v7837_v7 = vld [vmem:[#allocation11_spill] sm:$0xff] }
 0x375   :  { %v2731_v5 = vadd.f32 %v2727_v29, %v2685_v42  ;;  %v2794_v51 = vsel %vm88_vm0, %v2792_v33, %v2793_v31  ;;  %v2880_v60 = vrot.slane %v2872_v28, 2  ;;  %v2881_v34 = vrot.slane %v6724_v13, 2  ;;  %v7833_v42 = vld [vmem:[#allocation7_spill] sm:$0xff] }
 0x376   :  { %v3199_v15 = vadd.f32 %v7830_v57, %v3139_v3  ;;  %v2729_v35 = vadd.f32 %v2725_v48, %v2683_v39  ;;  %v3571_v27 = vrot.slane %v6668_v40, 1  ;;  %v7831_v8 = vrot.slane %v6500_v43, 1  ;;  %v7835_v43 = vld [vmem:[#allocation66_spill] sm:$0xff] }
 0x377   :  { %v2994_v3 = vmul.f32 -0.24322627, %v7832_v63  ;;  %v2802_v36 = vadd.f32 %v2794_v51, %v2728_v47  ;;  %v2270_v50 = vrot.slane %v2261_v12, 2  ;;  %v2269_v32 = vrot.slane %v2260_v45, 2  ;;  %3446 = vrot.lane.b32.xlu0 %v7833_v42, %s4132_s0  ;;  %v6773_v29 = vpop.permute.xlu1 %1834  ;;  %v6778_v45 = vpop.permute.xlu0 %1832  ;;  %v7838_v42 = vld [vmem:[#allocation68_spill] sm:$0xff] }
 0x378   :  { %v3197_v44 = vadd.f32 %v7831_v8, %v6683_v20  ;;  %v2885_v28 = vsel %vm171_vm1, %v2883_v19, %v2884_v49  ;;  %v6765_v13 = vmul.f32 -0.24322627, %v7677_v18  ;;  %v6769_v54 = vmax.f32 %v3340_v24, 0.0 }
 0x379   :  { %v7836_v20 = vrot.slane %v7835_v43, 2  ;;  %v2892_v39 = vadd.f32 %v2885_v28, %v2804_v46  ;;  %v2805_v47 = vadd.f32 %v2796_v2, %v2731_v5  ;;  %v2882_v17 = vsel %vm171_vm1, %v2880_v60, %v2881_v34  ;;  %2278 = vrot.lane.b32.xlu1 %v2270_v50, %s4132_s0 }
 0x37a   :  { %7834 = vst [vmem:[#allocation54_spill] sm:$0xff] %v6769_v54  ;;  %v2992_v55 = vmul.f32 -0.24322627, %v7837_v7  ;;  %v2993_v19 = vmul.f32 -0.24322627, %v7649_v53  ;;  %v2803_v12 = vadd.f32 %v2793_v31, %v2729_v35  ;;  %v3285_v23 = vadd.f32 %v3275_v21, %v3197_v44 }
 0x37b   :  { %v3287_v33 = vadd.f32 %v7836_v20, %v3199_v15  ;;  %v2934_v48 = vmul.f32 -0.03271614, %v7832_v63  ;;  %v3082_v37 = vmul.f32 0.16464804, %v7832_v63  ;;  %v2890_v24 = vadd.f32 %v2882_v17, %v2802_v36  ;;  %v6793_v5 = vpop.permute.xlu1 %1838  ;;  %v6796_v44 = vpop.permute.xlu0 %1836 }
 0x37c   :  { %v2271_v2 = vsel %vm171_vm1, %v2269_v32, %v2270_v50  ;;  %v3003_v58 = vrot.slane %v2994_v3, 1  ;;  %v3004_v57 = vrot.slane %v6765_v13, 1  ;;  %v6788_v15 = vmul.f32 0.16464804, %v7677_v18 }
 0x37d   :  { %2276 = vrot.lane.b32.xlu0 %v2271_v2, %s4132_s0  ;;  %v2938_v31 = vadd.f32 %v2934_v48, %v2892_v39  ;;  %v2932_v16 = vmul.f32 -0.03271614, %v7837_v7  ;;  %v3080_v21 = vmul.f32 0.16464804, %v7837_v7  ;;  %v2893_v46 = vadd.f32 %v2884_v49, %v2805_v47  ;;  %3486 = vrot.lane.b32.xlu1 %v6579_v30, %s4131_s16 }
 0x37e   :  { %v3000_v51 = vrot.slane %v2992_v55, 1  ;;  %v3001_v60 = vrot.slane %v2993_v19, 1  ;;  %v3081_v35 = vmul.f32 0.16464804, %v7649_v53  ;;  %v2891_v8 = vadd.f32 %v2881_v34, %v2803_v12 }
 0x37f   :  { %v3343_v63 = vadd.f32 0.1826225, %v3287_v33  ;;  %v3341_v3 = vadd.f32 0.1826225, %v3285_v23  ;;  %v2936_v36 = vadd.f32 %v2932_v16, %v2890_v24  ;;  %v2935_v50 = vmul.f32 -0.03271614, %v7677_v18  ;;  %v6812_v33 = vpop.permute.xlu1 %1866  ;;  %v6815_v7 = vpop.permute.xlu0 %1864 }
 0x380   :  { %v3005_v32 = vsel %vm88_vm0, %v3003_v58, %v3004_v57  ;;  %v3091_v49 = vrot.slane %v3082_v37, 2  ;;  %v3092_v28 = vrot.slane %v6788_v15, 2  ;;  %v2933_v13 = vmul.f32 -0.03271614, %v7649_v53  ;;  %v7841_v37 = vld [vmem:[#allocation23_spill] sm:$0xff]  ;;  %v7842_v58 = vld [vmem:[#allocation57_spill] sm:$0xff] }
 0x381   :  { %3484 = vrot.lane.b32.xlu0 %v7838_v42, %s4131_s16  ;;  %v6807_v34 = vmul.f32 0.14651267, %v6769_v54  ;;  %v6810_v43 = vmul.f32 -0.15166073, %v7806_v62  ;;  %v3012_v18 = vadd.f32 %v3005_v32, %v2938_v31  ;;  %v2939_v20 = vadd.f32 %v2935_v50, %v2893_v46  ;;  %3508 = vrot.lane.b32.xlu1 %v6639_v6, %s4132_s0  ;;  %v7843_v16 = vld [vmem:[#allocation14_spill] sm:$0xff] }
 0x382   :  { %v3002_v30 = vsel %vm88_vm0, %v3000_v51, %v3001_v60  ;;  %v3088_v39 = vrot.slane %v3080_v21, 2  ;;  %v3089_v47 = vrot.slane %v3081_v35, 2  ;;  %v2937_v17 = vadd.f32 %v2933_v13, %v2891_v8 }
 0x383   :  { %v3518_v53 = vmul.f32 -0.02919833, %v6769_v54  ;;  %v6818_v55 = vmax.f32 %v3343_v63, 0.0  ;;  %v6820_v19 = vmax.f32 %v3341_v3, 0.0  ;;  %v3010_v12 = vadd.f32 %v3002_v30, %v2936_v36  ;;  %v6836_v6 = vpop.permute.xlu1 %1870  ;;  %v6841_v3 = vpop.permute.xlu0 %1868 }
 0x384   :  { %v3530_v23 = vmul.f32 0.05763638, %v6769_v54  ;;  %v3093_v48 = vsel %vm171_vm1, %v3091_v49, %v3092_v28  ;;  %v3202_v24 = vmul.f32 0.17414314, %v7841_v37  ;;  %v6828_v2 = vmul.f32 0.17414314, %v7812_v9 }
 0x385   :  { %7839 = vst [vmem:[#allocation42_spill] sm:$0xff] %v6818_v55  ;;  %7840 = vst [vmem:[#allocation27_spill] sm:$0xff] %v6820_v19  ;;  %3506 = vrot.lane.b32.xlu0 %v7842_v58, %s4132_s0  ;;  %v6833_v15 = vmul.f32 -0.15166073, %v6769_v54  ;;  %v3100_v31 = vadd.f32 %v3093_v48, %v3012_v18  ;;  %v3200_v21 = vmul.f32 0.17414314, %v7843_v16  ;;  %v3013_v46 = vadd.f32 %v3004_v57, %v2939_v20 }
 0x386   :  { %v3568_v51 = vrot.slane %v6807_v34, 1  ;;  %v3090_v35 = vsel %vm171_vm1, %v3088_v39, %v3089_v47  ;;  %v3201_v8 = vmul.f32 0.17414314, %v7813_v41  ;;  %v3011_v63 = vadd.f32 %v3001_v60, %v2937_v17  ;;  %3524 = vrot.lane.b32.xlu1 %v6647_v1, %s4131_s16 }
 0x387   :  { %v3563_v36 = vmul.f32 0.14651267, %v6818_v55  ;;  %v3561_v50 = vmul.f32 0.14651267, %v6820_v19  ;;  %v3142_v32 = vmul.f32 -0.019169075, %v7841_v37  ;;  %v3098_v49 = vadd.f32 %v3090_v35, %v3010_v12  ;;  %v6855_v39 = vpop.permute.xlu1 %1890 }
 0x388   :  { %v3211_v57 = vrot.slane %v3202_v24, 1  ;;  %v3212_v13 = vrot.slane %v6828_v2, 1  ;;  %v3290_v42 = vmul.f32 0.2345959, %v7841_v37  ;;  %v6851_v34 = vmul.f32 0.2345959, %v7812_v9  ;;  %v6859_v24 = vpop.permute.xlu0 %1888 }
 0x389   :  { %3522 = vrot.lane.b32.xlu0 %v3518_v53, %s4131_s16  ;;  %v3146_v60 = vadd.f32 %v3142_v32, %v3100_v31  ;;  %v3140_v18 = vmul.f32 -0.019169075, %v7843_v16  ;;  %v3208_v20 = vrot.slane %v3200_v21, 1  ;;  %v3101_v30 = vadd.f32 %v3092_v28, %v3013_v46 }
 0x38a   :  { %v3209_v17 = vrot.slane %v3201_v8, 1  ;;  %v3288_v1 = vmul.f32 0.2345959, %v7843_v16  ;;  %v3289_v12 = vmul.f32 0.2345959, %v7813_v41  ;;  %v3099_v48 = vadd.f32 %v3089_v47, %v3011_v63  ;;  %3536 = vrot.lane.b32.xlu1 %v6655_v10, %s4132_s0 }
 0x38b   :  { %v3585_v37 = vmul.f32 -0.15166073, %v6818_v55  ;;  %v3583_v2 = vmul.f32 -0.15166073, %v6820_v19  ;;  %v3144_v53 = vadd.f32 %v3140_v18, %v3098_v49  ;;  %v3143_v58 = vmul.f32 -0.019169075, %v7812_v9  ;;  %v6870_v63 = vpop.permute.xlu1 %1894 }
 0x38c   :  { %v3572_v28 = vrot.slane %v3563_v36, 1  ;;  %v3569_v31 = vrot.slane %v3561_v50, 1  ;;  %v3213_v21 = vsel %vm88_vm0, %v3211_v57, %v3212_v13  ;;  %v3141_v16 = vmul.f32 -0.019169075, %v7813_v41  ;;  %v6873_v36 = vpop.permute.xlu0 %1892 }
 0x38d   :  { %3534 = vrot.lane.b32.xlu0 %v3530_v23, %s4132_s0  ;;  %v3220_v47 = vadd.f32 %v3213_v21, %v3146_v60  ;;  %v3299_v46 = vrot.slane %v3290_v42, 2  ;;  %v3300_v35 = vrot.slane %v6851_v34, 2  ;;  %v3147_v8 = vadd.f32 %v3143_v58, %v3101_v30 }
 0x38e   :  { %v3210_v9 = vsel %vm88_vm0, %v3208_v20, %v3209_v17  ;;  %v3296_v32 = vrot.slane %v3288_v1, 2  ;;  %v3297_v49 = vrot.slane %v3289_v12, 2  ;;  %v3145_v10 = vadd.f32 %v3141_v16, %v3099_v48 }
 0x38f   :  { %v3573_v41 = vsel %vm88_vm0, %v3571_v27, %v3572_v28  ;;  %v3593_v23 = vrot.slane %v6810_v43, 1  ;;  %v3624_v50 = vmul.f32 0.15458357, %v7806_v62  ;;  %v3218_v57 = vadd.f32 %v3210_v9, %v3144_v53  ;;  %v6888_v30 = vpop.permute.xlu1 %1942 }
 0x390   :  { %3576 = vrot.lane.b32.xlu1 %v3573_v41, %s4131_s16  ;;  %v3570_v42 = vsel %vm88_vm0, %v3568_v51, %v3569_v31  ;;  %v3590_v34 = vrot.slane %v6833_v15, 1  ;;  %v3625_v60 = vmul.f32 0.15458357, %v6818_v55  ;;  %v3622_v18 = vmul.f32 0.15458357, %v6769_v54  ;;  %v6891_v15 = vpop.permute.xlu0 %1940 }
 0x391   :  { %3574 = vrot.lane.b32.xlu0 %v3570_v42, %s4131_s16  ;;  %v3594_v40 = vrot.slane %v3585_v37, 1  ;;  %v3623_v27 = vmul.f32 0.15458357, %v6820_v19  ;;  %v3301_v43 = vsel %vm171_vm1, %v3299_v46, %v3300_v35  ;;  %v3221_v20 = vadd.f32 %v3212_v13, %v3147_v8 }
 0x392   :  { %v3591_v1 = vrot.slane %v3583_v2, 1  ;;  %v3308_v12 = vadd.f32 %v3301_v43, %v3220_v47  ;;  %v3298_v51 = vsel %vm171_vm1, %v3296_v32, %v3297_v49  ;;  %v3219_v48 = vadd.f32 %v3209_v17, %v3145_v10 }
 0x393   :  { %v3595_v53 = vsel %vm88_vm0, %v3593_v23, %v3594_v40  ;;  %v3633_v58 = vrot.slane %v3624_v50, 2  ;;  %v3646_v28 = vmul.f32 0.046939533, %v7806_v62  ;;  %v3306_v37 = vadd.f32 %v3298_v51, %v3218_v57  ;;  %v6900_v47 = vpop.permute.xlu1 %1946 }
 0x394   :  { %3598 = vrot.lane.b32.xlu1 %v3595_v53, %s4132_s0  ;;  %v3592_v31 = vsel %vm88_vm0, %v3590_v34, %v3591_v1  ;;  %v3630_v13 = vrot.slane %v3622_v18, 2  ;;  %v3644_v21 = vmul.f32 0.046939533, %v6769_v54  ;;  %v3634_v2 = vrot.slane %v3625_v60, 2  ;;  %v6903_v10 = vpop.permute.xlu0 %1944 }
 0x395   :  { %3596 = vrot.lane.b32.xlu0 %v3592_v31, %s4132_s0  ;;  %v3647_v17 = vmul.f32 0.046939533, %v6818_v55  ;;  %v3309_v16 = vadd.f32 %v3300_v35, %v3221_v20  ;;  %v3631_v46 = vrot.slane %v3623_v27, 2  ;;  %v3645_v8 = vmul.f32 0.046939533, %v6820_v19  ;;  %v7850_v19 = vld [vmem:[#allocation38_spill] sm:$0xff] }
 0x396   :  { %v3350_v9 = vadd.f32 0.23719627, %v3308_v12  ;;  %v3307_v32 = vadd.f32 %v3297_v49, %v3219_v48  ;;  %v3635_v41 = vsel %vm171_vm1, %v3633_v58, %v3634_v2  ;;  %v3655_v23 = vrot.slane %v3646_v28, 2 }
 0x397   :  { %v3348_v50 = vadd.f32 0.23719627, %v3306_v37  ;;  %v3632_v57 = vsel %vm171_vm1, %v3630_v13, %v3631_v46  ;;  %v3652_v42 = vrot.slane %v3644_v21, 2  ;;  %v3656_v35 = vrot.slane %v3647_v17, 2  ;;  %v6909_v60 = vpop.permute.xlu1 %1972 }
 0x398   :  { %3638 = vrot.lane.b32.xlu1 %v3635_v41, %s4131_s16  ;;  %v3351_v34 = vadd.f32 0.23719627, %v3309_v16  ;;  %v3653_v18 = vrot.slane %v3645_v8, 2  ;;  %v6911_v40 = vmax.f32 %v3350_v9, 0.0  ;;  %v3349_v49 = vadd.f32 0.23719627, %v3307_v32  ;;  %v6913_v27 = vpop.permute.xlu0 %1970 }
 0x399   :  { %3636 = vrot.lane.b32.xlu0 %v3632_v57, %s4131_s16  ;;  %v3657_v43 = vsel %vm171_vm1, %v3655_v23, %v3656_v35  ;;  %v6916_v20 = vmax.f32 %v3348_v50, 0.0  ;;  %v3866_v55 = vmul.f32 0.12138884, %v7850_v19 }
 0x39a   :  { %7844 = vst [vmem:[#allocation56_spill] sm:$0xff] %v6911_v40  ;;  %v3654_v1 = vsel %vm171_vm1, %v3652_v42, %v3653_v18  ;;  %v6921_v12 = vmax.f32 %v3351_v34, 0.0  ;;  %v3671_v48 = vmul.f32 0.055881344, %v6911_v40  ;;  %v6926_v53 = vmax.f32 %v3349_v49, 0.0 }
 0x39b   :  { %7845 = vst [vmem:[#allocation33_spill] sm:$0xff] %v6916_v20  ;;  %v6923_v51 = vpop.permute.xlu1 %1976  ;;  %v3670_v28 = vmul.f32 0.055881344, %v6916_v20  ;;  %v3714_v37 = vmul.f32 0.037651025, %v6911_v40 }
 0x39c   :  { %3660 = vrot.lane.b32.xlu1 %v3657_v43, %s4132_s0  ;;  %7846 = vst [vmem:[#allocation32_spill] sm:$0xff] %v6921_v12  ;;  %7847 = vst [vmem:[#allocation49_spill] sm:$0xff] %v6926_v53  ;;  %v6928_v58 = vpop.permute.xlu0 %1974  ;;  %v3712_v31 = vmul.f32 0.037651025, %v6916_v20  ;;  %v3715_v13 = vmul.f32 0.037651025, %v6921_v12 }
 0x39d   :  { %3658 = vrot.lane.b32.xlu0 %v3654_v1, %s4132_s0  ;;  %v3683_v2 = vmul.f32 0.12562995, %v6911_v40  ;;  %v3713_v17 = vmul.f32 0.037651025, %v6926_v53  ;;  %v3682_v46 = vmul.f32 0.12562995, %v6916_v20 }
 0x39e   :  { %v3723_v8 = vrot.slane %v3714_v37, 1  ;;  %v3736_v9 = vmul.f32 0.047149025, %v6911_v40  ;;  %v3720_v32 = vrot.slane %v3712_v31, 1  ;;  %v3734_v41 = vmul.f32 0.047149025, %v6916_v20 }
 0x39f   :  { %v6936_v21 = vpop.permute.xlu1 %2024  ;;  %v3724_v23 = vrot.slane %v3715_v13, 1  ;;  %v3737_v50 = vmul.f32 0.047149025, %v6921_v12  ;;  %v3721_v42 = vrot.slane %v3713_v17, 1  ;;  %v3735_v35 = vmul.f32 0.047149025, %v6926_v53 }
 0x3a0   :  { %3676 = vrot.lane.b32.xlu1 %v3671_v48, %s4131_s16  ;;  %v6940_v16 = vpop.permute.xlu0 %2022  ;;  %v3745_v49 = vrot.slane %v3736_v9, 1  ;;  %v3776_v43 = vmul.f32 0.06151291, %v6911_v40  ;;  %v3742_v48 = vrot.slane %v3734_v41, 1  ;;  %v3777_v31 = vmul.f32 0.06151291, %v6921_v12 }
 0x3a1   :  { %3674 = vrot.lane.b32.xlu0 %v3670_v28, %s4131_s16  ;;  %v3725_v18 = vsel %vm88_vm0, %v3723_v8, %v3724_v23  ;;  %v3722_v1 = vsel %vm88_vm0, %v3720_v32, %v3721_v42  ;;  %v3774_v28 = vmul.f32 0.06151291, %v6916_v20  ;;  %v3746_v37 = vrot.slane %v3737_v50, 1 }
 0x3a2   :  { %v1814_v13 = vadd.f32 %v6734_v52, %v6705_v4  ;;  %v3743_v17 = vrot.slane %v3735_v35, 1  ;;  %v3785_v32 = vrot.slane %v3776_v43, 2  ;;  %v3798_v41 = vmul.f32 0.13725202, %v6911_v40 }
 0x3a3   :  { %v6948_v57 = vpop.permute.xlu1 %2028  ;;  %v3747_v9 = vsel %vm88_vm0, %v3745_v49, %v3746_v37  ;;  %v3782_v42 = vrot.slane %v3774_v28, 2  ;;  %v3796_v4 = vmul.f32 0.13725202, %v6916_v20  ;;  %v3786_v52 = vrot.slane %v3777_v31, 2 }
 0x3a4   :  { %3688 = vrot.lane.b32.xlu1 %v3683_v2, %s4132_s0  ;;  %v6951_v34 = vpop.permute.xlu0 %2026  ;;  %v1844_v23 = vadd.f32 %v6778_v45, %v1814_v13  ;;  %v3744_v50 = vsel %vm88_vm0, %v3742_v48, %v3743_v17  ;;  %v3799_v35 = vmul.f32 0.13725202, %v6921_v12  ;;  %v3797_v37 = vmul.f32 0.13725202, %v6926_v53  ;;  %v7849_v45 = vld [vmem:[#allocation12_spill] sm:$0xff] }
 0x3a5   :  { %3686 = vrot.lane.b32.xlu0 %v3682_v46, %s4132_s0  ;;  %v3775_v46 = vmul.f32 0.06151291, %v6926_v53  ;;  %v6980_v13 = vmul.f32 0.10668592, %v7849_v45  ;;  %v3787_v17 = vsel %vm171_vm1, %v3785_v32, %v3786_v52  ;;  %v3804_v12 = vrot.slane %v3796_v4, 2 }
 0x3a6   :  { %v3805_v40 = vrot.slane %v3797_v37, 2  ;;  %v7005_v52 = vmul.f32 -0.11738845, %v7850_v19 }
 0x3a7   :  { %v6962_v2 = vpop.permute.xlu1 %2054  ;;  %v3783_v43 = vrot.slane %v3775_v46, 2  ;;  %v3808_v46 = vrot.slane %v3799_v35, 2  ;;  %v7485_v54 = vrot.slane %v6980_v13, 1  ;;  %v7008_v35 = vmul.f32 -0.11105113, %v7850_v19 }
 0x3a8   :  { %3728 = vrot.lane.b32.xlu1 %v3725_v18, %s4131_s16  ;;  %v6965_v8 = vpop.permute.xlu0 %2052  ;;  %v7848_v18 = vld [vmem:[#allocation19_spill] sm:$0xff]  ;;  %v3806_v4 = vsel %vm171_vm1, %v3804_v12, %v3805_v40  ;;  %v7018_v12 = vmul.f32 -0.03330378, %v7849_v45 }
 0x3a9   :  { %3726 = vrot.lane.b32.xlu0 %v3722_v1, %s4131_s16  ;;  %v1848_v1 = vmul.f32 0.048604887, %v7848_v18  ;;  %v1904_v48 = vmul.f32 0.10668592, %v7848_v18  ;;  %v1986_v37 = vmul.f32 -0.03330378, %v7848_v18 }
 0x3ab   :  { %v6976_v49 = vpop.permute.xlu1 %2058  ;;  %v1852_v31 = vadd.f32 %v1848_v1, %v1844_v23  ;;  %v1912_v32 = vrot.slane %v1904_v48, 1 }
 0x3ac   :  { %3750 = vrot.lane.b32.xlu1 %v3747_v9, %s4132_s0  ;;  %v6983_v28 = vpop.permute.xlu0 %2056  ;;  %v3807_v9 = vrot.slane %v3798_v41, 2 }
 0x3ad   :  { %3748 = vrot.lane.b32.xlu0 %v3744_v50, %s4132_s0  ;;  %v3784_v50 = vsel %vm171_vm1, %v3782_v42, %v3783_v43  ;;  %v1876_v53 = vadd.f32 %v6815_v7, %v1852_v31  ;;  %v7001_v7 = vmul.f32 0.08495788, %v7850_v19  ;;  %v3823_v43 = vmul.f32 -0.13284545, %v7850_v19 }
 0x3ae   :  { %v3809_v23 = vsel %vm171_vm1, %v3807_v9, %v3808_v46  ;;  %v1914_v40 = vsel %vm88_vm0, %v1912_v32, %v7485_v54  ;;  %v1815_v32 = vadd.f32 %v6728_v61, %v6697_v22  ;;  %v1816_v61 = vadd.f32 %v6753_v14, %v6731_v38 }
 0x3af   :  { %v6990_v20 = vpop.permute.xlu1 %2086  ;;  %v1900_v42 = vadd.f32 %v6859_v24, %v1876_v53  ;;  %v3835_v24 = vmul.f32 -0.09648077, %v7850_v19  ;;  %v3875_v53 = vrot.slane %v3866_v55, 1  ;;  %v3897_v55 = vrot.slane %v7001_v7, 1  ;;  %v7856_v7 = vld [vmem:[#allocation36_spill] sm:$0xff] }
 0x3b0   :  { %3790 = vrot.lane.b32.xlu1 %v3787_v17, %s4131_s16  ;;  %v6994_v41 = vpop.permute.xlu0 %2084  ;;  %v7853_v17 = vld [vmem:[#allocation30_spill] sm:$0xff]  ;;  %v3865_v19 = vmul.f32 0.12138884, %v7856_v7  ;;  %v1845_v22 = vadd.f32 %v6773_v29, %v1815_v32  ;;  %v1849_v29 = vmul.f32 0.048604887, %v7849_v45  ;;  %v1846_v38 = vadd.f32 %v6796_v44, %v1816_v61 }
 0x3b1   :  { %3788 = vrot.lane.b32.xlu0 %v3784_v50, %s4131_s16  ;;  %v3822_v9 = vmul.f32 -0.13284545, %v7853_v17  ;;  %v1922_v31 = vadd.f32 %v1914_v40, %v1900_v42  ;;  %v3864_v50 = vmul.f32 0.12138884, %v7853_v17  ;;  %v3886_v46 = vmul.f32 0.08495788, %v7853_v17 }
 0x3b2   :  { %v3834_v40 = vmul.f32 -0.09648077, %v7853_v17  ;;  %v7040_v62 = vmul.f32 -0.11738845, %v7853_v17 }
 0x3b3   :  { %v7010_v1 = vpop.permute.xlu1 %2090  ;;  %v1952_v42 = vadd.f32 %v6891_v15, %v1922_v31  ;;  %v3872_v31 = vrot.slane %v3864_v50, 1  ;;  %v3887_v50 = vmul.f32 0.08495788, %v7856_v7 }
 0x3b4   :  { %3812 = vrot.lane.b32.xlu1 %v3809_v23, %s4132_s0  ;;  %7851 = vst [vmem:[#allocation34_spill] sm:$0xff] %v7010_v1  ;;  %v7021_v48 = vpop.permute.xlu0 %2088  ;;  %v7854_v23 = vld [vmem:[#allocation39_spill] sm:$0xff]  ;;  %v3894_v1 = vrot.slane %v3886_v46, 1  ;;  %v3934_v46 = vrot.slane %v7040_v62, 2 }
 0x3b5   :  { %3810 = vrot.lane.b32.xlu0 %v3806_v4, %s4132_s0  ;;  %7852 = vst [vmem:[#allocation43_spill] sm:$0xff] %v7021_v48  ;;  %v3867_v18 = vmul.f32 0.12138884, %v7854_v23  ;;  %v3937_v4 = vrot.slane %v7005_v52, 2  ;;  %v7047_v52 = vmul.f32 -0.11105113, %v7853_v17  ;;  %v1982_v15 = vadd.f32 %v6913_v27, %v1952_v42 }
 0x3b6   :  { %v3889_v54 = vmul.f32 0.08495788, %v7854_v23  ;;  %v3929_v32 = vmul.f32 -0.11738845, %v7854_v23 }
 0x3b8   :  { %3828 = vrot.lane.b32.xlu1 %v3823_v43, %s4131_s16  ;;  %v7035_v43 = vpop.permute.xlu1 %2110  ;;  %v7044_v48 = vpop.permute.xlu0 %2108  ;;  %v3898_v17 = vrot.slane %v3889_v54, 1 }
 0x3b9   :  { %3826 = vrot.lane.b32.xlu0 %v3822_v9, %s4131_s16  ;;  %7855 = vst [vmem:[#allocation15_spill] sm:$0xff] %v7035_v43  ;;  %v1994_v9 = vrot.slane %v1986_v37, 2  ;;  %v1817_v43 = vadd.f32 %v6749_v0, %v6720_v26  ;;  %v3876_v37 = vrot.slane %v3867_v18, 1  ;;  %v1853_v26 = vadd.f32 %v1849_v29, %v1845_v22  ;;  %v7859_v29 = vld [vmem:[#allocation58_spill] sm:$0xff] }
 0x3ba   :  { %v7857_v0 = vrot.slane %v7018_v12, 2  ;;  %v3938_v22 = vrot.slane %v3929_v32, 2  ;;  %v3899_v61 = vsel %vm88_vm0, %v3897_v55, %v3898_v17 }
 0x3bb   :  { %v1847_v42 = vadd.f32 %v6793_v5, %v1817_v43  ;;  %v1877_v62 = vadd.f32 %v6812_v33, %v1853_v26  ;;  %v7858_v5 = vld [vmem:[#allocation53_spill] sm:$0xff] }
 0x3bc   :  { %3840 = vrot.lane.b32.xlu1 %v3835_v24, %s4132_s0  ;;  %v7059_v27 = vpop.permute.xlu1 %2114  ;;  %v3873_v24 = vrot.slane %v3865_v19, 1  ;;  %v1996_v45 = vsel %vm171_vm1, %v1994_v9, %v7857_v0  ;;  %v7067_v18 = vpop.permute.xlu0 %2112  ;;  %v1851_v43 = vmul.f32 0.048604887, %v7858_v5  ;;  %v3927_v9 = vmul.f32 -0.11738845, %v7856_v7 }
 0x3bd   :  { %3838 = vrot.lane.b32.xlu0 %v3834_v40, %s4132_s0  ;;  %v3877_v40 = vsel %vm88_vm0, %v3875_v53, %v3876_v37  ;;  %v2004_v14 = vadd.f32 %v1996_v45, %v1982_v15  ;;  %v1850_v0 = vmul.f32 0.048604887, %v7859_v29  ;;  %v3895_v15 = vrot.slane %v3887_v50, 1 }
 0x3be   :  { %v3874_v19 = vsel %vm88_vm0, %v3872_v31, %v3873_v24  ;;  %v1855_v31 = vadd.f32 %v1851_v43, %v1847_v42  ;;  %v1901_v54 = vadd.f32 %v6855_v39, %v1877_v62  ;;  %v1907_v33 = vmul.f32 0.10668592, %v7858_v5 }
 0x3bf   :  { %v2034_v53 = vadd.f32 %v6940_v16, %v2004_v14  ;;  %v1906_v37 = vmul.f32 0.10668592, %v7859_v29  ;;  %v1854_v32 = vadd.f32 %v1850_v0, %v1846_v38  ;;  %v3896_v16 = vsel %vm88_vm0, %v3894_v1, %v3895_v15 }
 0x3c0   :  { %3880 = vrot.lane.b32.xlu1 %v3877_v40, %s4131_s16  ;;  %v7079_v44 = vpop.permute.xlu1 %2162  ;;  %v2161_v24 = vpop.permute.xlu0 %2160  ;;  %v3951_v45 = vmul.f32 -0.11105113, %v7854_v23  ;;  %v1879_v17 = vadd.f32 %v6836_v6, %v1855_v31  ;;  %v3939_v39 = vsel %vm171_vm1, %v3937_v4, %v3938_v22  ;;  %v3935_v55 = vrot.slane %v3927_v9, 2 }
 0x3c1   :  { %3878 = vrot.lane.b32.xlu0 %v3874_v19, %s4131_s16  ;;  %v2064_v26 = vadd.f32 %v6965_v8, %v2034_v53  ;;  %v3949_v50 = vmul.f32 -0.11105113, %v7856_v7  ;;  %v1878_v42 = vadd.f32 %v6841_v3, %v1854_v32  ;;  %v2068_v40 = vmul.f32 -0.11796781, %v6440_v56 }
 0x3c2   :  { %v7096_v8 = vmul.f32 -0.008000135, %v6430_v25  ;;  %v2124_v1 = vmul.f32 -0.008000135, %v6440_v56  ;;  %v1903_v6 = vadd.f32 %v6870_v63, %v1879_v17  ;;  %v7860_v23 = vrot.slane %v6980_v13, 1 }
 0x3c3   :  { %v1916_v4 = vrot.slane %v1907_v33, 1  ;;  %v1915_v19 = vrot.slane %v1906_v37, 1  ;;  %v1902_v3 = vadd.f32 %v6873_v36, %v1878_v42  ;;  %v2072_v7 = vadd.f32 %v2068_v40, %v2064_v26 }
 0x3c4   :  { %3902 = vrot.lane.b32.xlu1 %v3899_v61, %s4132_s0  ;;  %v7099_v38 = vpop.permute.xlu1 %2166  ;;  %v1923_v14 = vadd.f32 %v7860_v23, %v1901_v54  ;;  %v7104_v62 = vpop.permute.xlu0 %2164  ;;  %v3936_v43 = vsel %vm171_vm1, %v3934_v46, %v3935_v55  ;;  %v3956_v22 = vrot.slane %v7047_v52, 2  ;;  %v1989_v63 = vmul.f32 -0.03330378, %v7858_v5 }
 0x3c5   :  { %3900 = vrot.lane.b32.xlu0 %v3896_v16, %s4132_s0  ;;  %v3960_v13 = vrot.slane %v3951_v45, 2  ;;  %v3957_v0 = vrot.slane %v3949_v50, 2  ;;  %v1988_v53 = vmul.f32 -0.03330378, %v7859_v29  ;;  %v2096_v61 = vadd.f32 %v6994_v41, %v2072_v7 }
 0x3c6   :  { %v1953_v9 = vadd.f32 %v6888_v30, %v1923_v14  ;;  %v2133_v36 = vrot.slane %v7096_v8, 1  ;;  %v2132_v15 = vrot.slane %v2124_v1, 1  ;;  %v1925_v46 = vadd.f32 %v1916_v4, %v1903_v6 }
 0x3c7   :  { %v1917_v52 = vsel %vm88_vm0, %v1915_v19, %v1916_v4  ;;  %v7861_v5 = vrot.slane %v7008_v35, 2  ;;  %v2120_v29 = vadd.f32 %v7044_v48, %v2096_v61  ;;  %v3958_v41 = vsel %vm171_vm1, %v3956_v22, %v3957_v0 }
 0x3c8   :  { %3942 = vrot.lane.b32.xlu1 %v3939_v39, %s4131_s16  ;;  %v7116_v31 = vpop.permute.xlu1 %2192  ;;  %v1983_v30 = vadd.f32 %v6909_v60, %v1953_v9  ;;  %v2191_v54 = vpop.permute.xlu0 %2190  ;;  %v1924_v37 = vadd.f32 %v1917_v52, %v1902_v3  ;;  %v1955_v32 = vadd.f32 %v6900_v47, %v1925_v46  ;;  %v1998_v16 = vrot.slane %v1989_v63, 2  ;;  %v7863_v46 = vld [vmem:[#allocation15_spill] sm:$0xff] }
 0x3c9   :  { %3940 = vrot.lane.b32.xlu0 %v3936_v43, %s4131_s16  ;;  %v3961_v33 = vsel %vm171_vm1, %v7861_v5, %v3960_v13  ;;  %v1997_v60 = vrot.slane %v1988_v53, 2  ;;  %v2134_v35 = vsel %vm88_vm0, %v2132_v15, %v2133_v36  ;;  %v7862_v17 = vrot.slane %v7018_v12, 2 }
 0x3ca   :  { %v1954_v26 = vadd.f32 %v6903_v10, %v1924_v37  ;;  %v1985_v48 = vadd.f32 %v6923_v51, %v1955_v32  ;;  %v7140_v47 = vmul.f32 0.018455705, %v6430_v25  ;;  %v2206_v10 = vmul.f32 0.018455705, %v6440_v56  ;;  %v7865_v37 = vld [vmem:[#allocation43_spill] sm:$0xff] }
 0x3cb   :  { %v2005_v39 = vadd.f32 %v7862_v17, %v1983_v30  ;;  %v2142_v42 = vadd.f32 %v2134_v35, %v2120_v29  ;;  %v1999_v1 = vsel %vm171_vm1, %v1997_v60, %v1998_v16  ;;  %v2127_v0 = vmul.f32 -0.008000135, %v6455_v59  ;;  %v7866_v17 = vld [vmem:[#allocation35_spill] sm:$0xff] }
 0x3cc   :  { %3964 = vrot.lane.b32.xlu1 %v3961_v33, %s4132_s0  ;;  %v7132_v45 = vpop.permute.xlu1 %2196  ;;  %v7137_v55 = vpop.permute.xlu0 %2194  ;;  %v1984_v50 = vadd.f32 %v6928_v58, %v1954_v26  ;;  %v2007_v51 = vadd.f32 %v1998_v16, %v1985_v48  ;;  %v2215_v14 = vrot.slane %v7140_v47, 2  ;;  %v2214_v4 = vrot.slane %v2206_v10, 2 }
 0x3cd   :  { %3962 = vrot.lane.b32.xlu0 %v3958_v41, %s4132_s0  ;;  %v2035_v40 = vadd.f32 %v6936_v21, %v2005_v39  ;;  %v2172_v6 = vadd.f32 %v2161_v24, %v2142_v42  ;;  %v2069_v58 = vmul.f32 -0.11796781, %v6430_v25  ;;  %v2071_v25 = vmul.f32 -0.11796781, %v6455_v59 }
 0x3ce   :  { %v2006_v3 = vadd.f32 %v1999_v1, %v1984_v50  ;;  %v2037_v56 = vadd.f32 %v6948_v57, %v2007_v51  ;;  %v2136_v29 = vrot.slane %v2127_v0, 1  ;;  %v3392_v39 = vmul.f32 -0.02600674, %v7866_v17  ;;  %v7867_v50 = vld [vmem:[#allocation22_spill] sm:$0xff]  ;;  %v7869_v51 = vld [vmem:[#allocation64_spill] sm:$0xff] }
 0x3cf   :  { %v2065_v12 = vadd.f32 %v6962_v2, %v2035_v40  ;;  %v2202_v7 = vadd.f32 %v2191_v54, %v2172_v6  ;;  %v2216_v2 = vsel %vm171_vm1, %v2214_v4, %v2215_v14  ;;  %v3364_v42 = vmul.f32 -0.10796146, %v7867_v50  ;;  %v7868_v1 = vld [vmem:[#allocation62_spill] sm:$0xff] }
 0x3d0   :  { %v7146_v23 = vpop.permute.xlu1 %2244  ;;  %v2243_v19 = vpop.permute.xlu0 %2242  ;;  %v2036_v21 = vadd.f32 %v6951_v34, %v2006_v3  ;;  %v2067_v24 = vadd.f32 %v6976_v49, %v2037_v56  ;;  %v2070_v34 = vmul.f32 -0.11796781, %v6462_v11  ;;  %v2126_v49 = vmul.f32 -0.008000135, %v6462_v11 }
 0x3d1   :  { %v2073_v22 = vadd.f32 %v2069_v58, %v2065_v12  ;;  %v2224_v13 = vadd.f32 %v2216_v2, %v2202_v7  ;;  %v3365_v40 = vmul.f32 -0.10796146, %v7866_v17  ;;  %v3393_v12 = vmul.f32 -0.02600674, %v7869_v51 }
 0x3d2   :  { %v2066_v63 = vadd.f32 %v6983_v28, %v2036_v21  ;;  %v2075_v15 = vadd.f32 %v2071_v25, %v2067_v24  ;;  %v7864_v28 = vld [vmem:[#allocation34_spill] sm:$0xff]  ;;  %v2135_v41 = vrot.slane %v2126_v49, 1  ;;  %v3401_v21 = vrot.slane %v3392_v39, 1 }
 0x3d3   :  { %v2097_v57 = vadd.f32 %v6990_v20, %v2073_v22  ;;  %v2254_v53 = vadd.f32 %v2243_v19, %v2224_v13  ;;  %v3402_v25 = vrot.slane %v3393_v12, 1 }
 0x3d4   :  { %v7153_v43 = vpop.permute.xlu1 %2248  ;;  %v7159_v9 = vpop.permute.xlu0 %2246  ;;  %v2074_v54 = vadd.f32 %v2070_v34, %v2066_v63  ;;  %v2099_v33 = vadd.f32 %v7864_v28, %v2075_v15  ;;  %v2137_v8 = vsel %vm88_vm0, %v2135_v41, %v2136_v29 }
 0x3d5   :  { %v2121_v52 = vadd.f32 %v7863_v46, %v2097_v57 }
 0x3d6   :  { %v2098_v20 = vadd.f32 %v7865_v37, %v2074_v54  ;;  %v2123_v16 = vadd.f32 %v7059_v27, %v2099_v33  ;;  %v3390_v27 = vmul.f32 -0.02600674, %v7867_v50 }
 0x3d7   :  { %v2143_v60 = vadd.f32 %v2133_v36, %v2121_v52  ;;  %v2209_v36 = vmul.f32 0.018455705, %v6455_v59 }
 0x3d8   :  { %v3371_v61 = vpop.permute.xlu1 %3370  ;;  %v2122_v48 = vadd.f32 %v7067_v18, %v2098_v20  ;;  %v3391_v18 = vmul.f32 -0.02600674, %v7868_v1  ;;  %v2145_v4 = vadd.f32 %v2136_v29, %v2123_v16  ;;  %v3398_v22 = vrot.slane %v3390_v27, 1 }
 0x3d9   :  { %v2273_v30 = vpop.permute.xlu0 %2272  ;;  %v2173_v10 = vadd.f32 %v7079_v44, %v2143_v60  ;;  %v2208_v44 = vmul.f32 0.018455705, %v6462_v11  ;;  %v3376_v58 = vadd.f32 %v3371_v61, %v3364_v42  ;;  %v3453_v20 = vmul.f32 -0.043111287, %v7868_v1 }
 0x3da   :  { %v2284_v5 = vadd.f32 %v2273_v30, %v2254_v53  ;;  %v2144_v56 = vadd.f32 %v2137_v8, %v2122_v48  ;;  %v2175_v24 = vadd.f32 %v7099_v38, %v2145_v4  ;;  %v3399_v13 = vrot.slane %v3391_v18, 1 }
 0x3db   :  { %v2203_v19 = vadd.f32 %v7116_v31, %v2173_v10  ;;  %v2218_v31 = vrot.slane %v2209_v36, 2  ;;  %v2217_v0 = vrot.slane %v2208_v44, 2  ;;  %v3403_v38 = vsel %vm88_vm0, %v3401_v21, %v3402_v25  ;;  %v7870_v44 = vld [vmem:[#allocation50_spill] sm:$0xff]  ;;  %v7873_v25 = vld [vmem:[#allocation27_spill] sm:$0xff] }
 0x3dc   :  { %v7170_v32 = vadd.f32 -0.10048493, %v2284_v5  ;;  %v3383_v26 = vpop.permute.xlu1 %3382  ;;  %v2174_v59 = vadd.f32 %v7104_v62, %v2144_v56  ;;  %v2205_v34 = vadd.f32 %v7132_v45, %v2175_v24  ;;  %v3400_v62 = vsel %vm88_vm0, %v3398_v22, %v3399_v13  ;;  %v7871_v56 = vld [vmem:[#allocation54_spill] sm:$0xff] }
 0x3dd   :  { %v3373_v35 = vpop.permute.xlu0 %3372  ;;  %v3388_v63 = vadd.f32 %v3383_v26, %v3376_v58  ;;  %v2225_v11 = vadd.f32 %v2215_v14, %v2203_v19  ;;  %v3454_v30 = vmul.f32 -0.043111287, %v7866_v17  ;;  %v2219_v47 = vsel %vm171_vm1, %v2217_v0, %v2218_v31 }
 0x3de   :  { %3976 = vrot.lane.b32.xlu0 %v7170_v32, %s4133_s2  ;;  %v3377_v3 = vadd.f32 %v3373_v35, %v3365_v40  ;;  %v2204_v53 = vadd.f32 %v7137_v55, %v2174_v59  ;;  %v2227_v45 = vadd.f32 %v2218_v31, %v2205_v34  ;;  %v3452_v5 = vmul.f32 -0.043111287, %v7867_v50 }
 0x3df   :  { %v2255_v61 = vadd.f32 %v7146_v23, %v2225_v11  ;;  %v3406_v46 = vadd.f32 %v3400_v62, %v3388_v63  ;;  %v3455_v55 = vmul.f32 -0.043111287, %v7869_v51  ;;  %v3463_v16 = vrot.slane %v3454_v30, 2  ;;  %v7872_v63 = vld [vmem:[#allocation42_spill] sm:$0xff] }
 0x3e0   :  { %v3423_v6 = vpop.permute.xlu1 %3422  ;;  %v2226_v28 = vadd.f32 %v2219_v47, %v2204_v53  ;;  %v2257_v33 = vadd.f32 %v7153_v43, %v2227_v45  ;;  %v3460_v17 = vrot.slane %v3452_v5, 2  ;;  %v3461_v42 = vrot.slane %v3453_v20, 2 }
 0x3e1   :  { %v3385_v7 = vpop.permute.xlu0 %3384  ;;  %v3428_v41 = vadd.f32 %v3423_v6, %v3406_v46  ;;  %v3464_v43 = vrot.slane %v3455_v55, 2  ;;  %v3514_v58 = vmul.f32 0.09768625, %v7871_v56  ;;  %v3544_v21 = vmul.f32 -0.014600754, %v7870_v44 }
 0x3e2   :  { %v3389_v2 = vadd.f32 %v3385_v7, %v3377_v3  ;;  %v2256_v29 = vadd.f32 %v7159_v9, %v2226_v28  ;;  %v3462_v36 = vsel %vm171_vm1, %v3460_v17, %v3461_v42  ;;  %v3515_v3 = vmul.f32 0.09768625, %v7870_v44 }
 0x3e3   :  { %v3465_v9 = vsel %vm171_vm1, %v3463_v16, %v3464_v43  ;;  %v3542_v22 = vmul.f32 -0.014600754, %v7871_v56  ;;  %v3545_v13 = vmul.f32 -0.014600754, %v7872_v63  ;;  %v3543_v34 = vmul.f32 -0.014600754, %v7873_v25 }
 0x3e4   :  { %v3445_v57 = vpop.permute.xlu1 %3444  ;;  %v3407_v15 = vadd.f32 %v3403_v38, %v3389_v2  ;;  %v3553_v11 = vrot.slane %v3544_v21, 1  ;;  %v3606_v30 = vmul.f32 0.049089234, %v7870_v44  ;;  %v3607_v28 = vmul.f32 0.049089234, %v7872_v63 }
 0x3e5   :  { %v3425_v49 = vpop.permute.xlu0 %3424  ;;  %v3450_v39 = vadd.f32 %v3445_v57, %v3428_v41  ;;  %v3550_v0 = vrot.slane %v3542_v22, 1  ;;  %v3554_v38 = vrot.slane %v3545_v13, 1 }
 0x3e6   :  { %v3429_v23 = vadd.f32 %v3425_v49, %v3407_v15  ;;  %v3551_v15 = vrot.slane %v3543_v34, 1  ;;  %v3616_v16 = vrot.slane %v3607_v28, 2 }
 0x3e7   :  { %v3468_v18 = vadd.f32 %v3462_v36, %v3450_v39 }
 0x3e8   :  { %v2275_v52 = vpop.permute.xlu1 %2274  ;;  %v3552_v47 = vsel %vm88_vm0, %v3550_v0, %v3551_v15 }
 0x3e9   :  { %v2285_v14 = vadd.f32 %v2275_v52, %v2255_v61  ;;  %v3447_v54 = vpop.permute.xlu0 %3446  ;;  %v3555_v52 = vsel %vm88_vm0, %v3553_v11, %v3554_v38 }
 0x3ea   :  { %v3451_v60 = vadd.f32 %v3447_v54, %v3429_v23  ;;  %v3615_v23 = vrot.slane %v3606_v30, 2 }
 0x3eb   :  { %v7203_v37 = vadd.f32 -0.10048493, %v2285_v14  ;;  %v3604_v14 = vmul.f32 0.049089234, %v7871_v56 }
 0x3ec   :  { %v2279_v26 = vpop.permute.xlu1 %2278  ;;  %v3469_v8 = vadd.f32 %v3465_v9, %v3451_v60  ;;  %v3617_v39 = vsel %vm171_vm1, %v3615_v23, %v3616_v16 }
 0x3ed   :  { %v2287_v35 = vadd.f32 %v2279_v26, %v2257_v33  ;;  %3978 = vrot.lane.b32.xlu1 %v7203_v37, %s4133_s2  ;;  %v3605_v33 = vmul.f32 0.049089234, %v7873_v25 }
 0x3ef   :  { %v2277_v48 = vpop.permute.xlu0 %2276  ;;  %v7209_v50 = vadd.f32 -0.10048493, %v2287_v35 }
 0x3f0   :  { %v2286_v10 = vadd.f32 %v2277_v48, %v2256_v29  ;;  %v3487_v27 = vpop.permute.xlu1 %3486  ;;  %v3612_v29 = vrot.slane %v3604_v14, 2  ;;  %v3613_v48 = vrot.slane %v3605_v33, 2 }
 0x3f1   :  { %3982 = vrot.lane.b32.xlu1 %v7209_v50, %s4133_s2  ;;  %v3491_v6 = vadd.f32 %v3487_v27, %v3469_v8 }
 0x3f2   :  { %v7211_v40 = vadd.f32 -0.10048493, %v2286_v10  ;;  %v3614_v43 = vsel %vm171_vm1, %v3612_v29, %v3613_v48 }
 0x3f3   :  { %v3485_v1 = vpop.permute.xlu0 %3484 }
 0x3f4   :  { %3980 = vrot.lane.b32.xlu0 %v7211_v40, %s4133_s2  ;;  %v3490_v51 = vadd.f32 %v3485_v1, %v3468_v18  ;;  %v3509_v12 = vpop.permute.xlu1 %3508 }
 0x3f5   :  { %v3513_v4 = vadd.f32 %v3509_v12, %v3491_v6  ;;  %3990 = vrot.lane.b32.xlu1 %v7203_v37, %s4134_s25 }
 0x3f7   :  { %v3507_v19 = vpop.permute.xlu0 %3506  ;;  %v3517_v24 = vadd.f32 %v3515_v3, %v3513_v4 }
 0x3f8   :  { %v3512_v7 = vadd.f32 %v3507_v19, %v3490_v51  ;;  %3988 = vrot.lane.b32.xlu0 %v7170_v32, %s4134_s25  ;;  %v3525_v2 = vpop.permute.xlu1 %3524  ;;  %v7874_v51 = vld [vmem:[#allocation56_spill] sm:$0xff]  ;;  %v7875_v19 = vld [vmem:[#allocation33_spill] sm:$0xff] }
 0x3f9   :  { %3994 = vrot.lane.b32.xlu1 %v7209_v50, %s4134_s25  ;;  %v3529_v31 = vadd.f32 %v3525_v2, %v3517_v24  ;;  %v3667_v12 = vmul.f32 -0.16346149, %v7874_v51  ;;  %v3666_v44 = vmul.f32 -0.16346149, %v7875_v19  ;;  %v3696_v3 = vmul.f32 -0.030509949, %v7874_v51  ;;  %v7876_v24 = vld [vmem:[#allocation32_spill] sm:$0xff] }
 0x3fa   :  { %v3516_v59 = vadd.f32 %v3514_v58, %v3512_v7  ;;  %v3694_v56 = vmul.f32 -0.030509949, %v7875_v19  ;;  %v3697_v22 = vmul.f32 -0.030509949, %v7876_v24 }
 0x3fb   :  { %v3523_v57 = vpop.permute.xlu0 %3522  ;;  %v3705_v13 = vrot.slane %v3696_v3, 1 }
 0x3fc   :  { %3992 = vrot.lane.b32.xlu0 %v7211_v40, %s4134_s25  ;;  %v3528_v49 = vadd.f32 %v3523_v57, %v3516_v59  ;;  %v3537_v53 = vpop.permute.xlu1 %3536  ;;  %v7877_v59 = vld [vmem:[#allocation49_spill] sm:$0xff]  ;;  %v3702_v25 = vrot.slane %v3694_v56, 1 }
 0x3fd   :  { %v3541_v61 = vadd.f32 %v3537_v53, %v3529_v31  ;;  %4002 = vrot.lane.b32.xlu1 %v7203_v37, %s4135_s26  ;;  %v3695_v63 = vmul.f32 -0.030509949, %v7877_v59  ;;  %v3706_v31 = vrot.slane %v3697_v22, 1  ;;  %v7880_v22 = vld [vmem:[#allocation40_spill] sm:$0xff] }
 0x3ff   :  { %v3535_v62 = vpop.permute.xlu0 %3534  ;;  %v3559_v45 = vadd.f32 %v3555_v52, %v3541_v61  ;;  %v3703_v53 = vrot.slane %v3695_v63, 1  ;;  %v3707_v61 = vsel %vm88_vm0, %v3705_v13, %v3706_v31  ;;  %v3756_v52 = vmul.f32 -0.0068281097, %v7875_v19  ;;  %v7881_v63 = vld [vmem:[#allocation44_spill] sm:$0xff] }
 0x400   :  { %v3540_v46 = vadd.f32 %v3535_v62, %v3528_v49  ;;  %4000 = vrot.lane.b32.xlu0 %v7170_v32, %s4135_s26  ;;  %v3758_v62 = vmul.f32 -0.0068281097, %v7874_v51 }
 0x401   :  { %4006 = vrot.lane.b32.xlu1 %v7209_v50, %s4135_s26 }
 0x402   :  { %v3577_v54 = vpop.permute.xlu1 %3576  ;;  %v3558_v5 = vadd.f32 %v3552_v47, %v3540_v46  ;;  %v3704_v46 = vsel %vm88_vm0, %v3702_v25, %v3703_v53  ;;  %v3759_v47 = vmul.f32 -0.0068281097, %v7876_v24  ;;  %v7882_v53 = vld [vmem:[#allocation31_spill] sm:$0xff] }
 0x403   :  { %v3575_v55 = vpop.permute.xlu0 %3574  ;;  %v3581_v20 = vadd.f32 %v3577_v54, %v3559_v45  ;;  %v3757_v54 = vmul.f32 -0.0068281097, %v7877_v59 }
 0x404   :  { %4004 = vrot.lane.b32.xlu0 %v7211_v40, %s4135_s26  ;;  %v3580_v41 = vadd.f32 %v3575_v55, %v3558_v5  ;;  %v3767_v5 = vrot.slane %v3758_v62, 2  ;;  %v3764_v55 = vrot.slane %v3756_v52, 2  ;;  %v7883_v62 = vld [vmem:[#allocation37_spill] sm:$0xff] }
 0x405   :  { %4014 = vrot.lane.b32.xlu1 %v7203_v37, %s4136_s27 }
 0x406   :  { %v3599_v26 = vpop.permute.xlu1 %3598 }
 0x407   :  { %v3603_v60 = vadd.f32 %v3599_v26, %v3581_v20  ;;  %v3597_v35 = vpop.permute.xlu0 %3596  ;;  %v3768_v20 = vrot.slane %v3759_v47, 2  ;;  %v3765_v26 = vrot.slane %v3757_v54, 2 }
 0x408   :  { %v3602_v17 = vadd.f32 %v3597_v35, %v3580_v41  ;;  %4012 = vrot.lane.b32.xlu0 %v7170_v32, %s4136_s27 }
 0x409   :  { %v3621_v10 = vadd.f32 %v3617_v39, %v3603_v60  ;;  %4018 = vrot.lane.b32.xlu1 %v7209_v50, %s4136_s27  ;;  %v3769_v60 = vsel %vm171_vm1, %v3767_v5, %v3768_v20  ;;  %v3766_v48 = vsel %vm171_vm1, %v3764_v55, %v3765_v26 }
 0x40a   :  { %v3639_v42 = vpop.permute.xlu1 %3638  ;;  %v3620_v9 = vadd.f32 %v3614_v43, %v3602_v17 }
 0x40b   :  { %v3637_v27 = vpop.permute.xlu0 %3636  ;;  %v3643_v8 = vadd.f32 %v3639_v42, %v3621_v10 }
 0x40c   :  { %4016 = vrot.lane.b32.xlu0 %v7211_v40, %s4136_s27  ;;  %v3642_v36 = vadd.f32 %v3637_v27, %v3620_v9 }
 0x40e   :  { %v3661_v1 = vpop.permute.xlu1 %3660 }
 0x40f   :  { %v3665_v18 = vadd.f32 %v3661_v1, %v3643_v8  ;;  %v3659_v6 = vpop.permute.xlu0 %3658 }
 0x410   :  { %v3664_v4 = vadd.f32 %v3659_v6, %v3642_v36  ;;  %v7878_v36 = vld [vmem:[#allocation38_spill] sm:$0xff] }
 0x411   :  { %v3669_v7 = vadd.f32 %v3667_v12, %v3665_v18  ;;  %v3819_v1 = vmul.f32 0.017094135, %v7878_v36  ;;  %v7879_v6 = vld [vmem:[#allocation30_spill] sm:$0xff] }
 0x412   :  { %v3677_v58 = vpop.permute.xlu1 %3676  ;;  %v3668_v21 = vadd.f32 %v3666_v44, %v3664_v4  ;;  %v3818_v51 = vmul.f32 0.017094135, %v7879_v6 }
 0x413   :  { %v3675_v2 = vpop.permute.xlu0 %3674  ;;  %v3681_v57 = vadd.f32 %v3677_v58, %v3669_v7 }
 0x414   :  { %v3680_v34 = vadd.f32 %v3675_v2, %v3668_v21 }
 0x416   :  { %v3689_v11 = vpop.permute.xlu1 %3688 }
 0x417   :  { %v3693_v0 = vadd.f32 %v3689_v11, %v3681_v57  ;;  %v3687_v49 = vpop.permute.xlu0 %3686 }
 0x418   :  { %v3692_v38 = vadd.f32 %v3687_v49, %v3680_v34 }
 0x419   :  { %v3711_v15 = vadd.f32 %v3707_v61, %v3693_v0 }
 0x41a   :  { %v3729_v30 = vpop.permute.xlu1 %3728  ;;  %v3710_v45 = vadd.f32 %v3704_v46, %v3692_v38 }
 0x41b   :  { %v3727_v14 = vpop.permute.xlu0 %3726  ;;  %v3733_v28 = vadd.f32 %v3729_v30, %v3711_v15 }
 0x41c   :  { %v3732_v33 = vadd.f32 %v3727_v14, %v3710_v45 }
 0x41e   :  { %v3751_v23 = vpop.permute.xlu1 %3750 }
 0x41f   :  { %v3755_v29 = vadd.f32 %v3751_v23, %v3733_v28  ;;  %v3749_v41 = vpop.permute.xlu0 %3748 }
 0x420   :  { %v3754_v16 = vadd.f32 %v3749_v41, %v3732_v33 }
 0x421   :  { %v3773_v35 = vadd.f32 %v3769_v60, %v3755_v29 }
 0x422   :  { %v3791_v17 = vpop.permute.xlu1 %3790  ;;  %v3772_v39 = vadd.f32 %v3766_v48, %v3754_v16 }
 0x423   :  { %v3789_v10 = vpop.permute.xlu0 %3788  ;;  %v3795_v43 = vadd.f32 %v3791_v17, %v3773_v35 }
 0x424   :  { %v3794_v42 = vadd.f32 %v3789_v10, %v3772_v39 }
 0x426   :  { %v3813_v9 = vpop.permute.xlu1 %3812 }
 0x427   :  { %v3817_v27 = vadd.f32 %v3813_v9, %v3795_v43  ;;  %v3811_v8 = vpop.permute.xlu0 %3810 }
 0x428   :  { %v3816_v18 = vadd.f32 %v3811_v8, %v3794_v42 }
 0x429   :  { %v3821_v12 = vadd.f32 %v3819_v1, %v3817_v27 }
 0x42a   :  { %v3829_v4 = vpop.permute.xlu1 %3828  ;;  %v3820_v19 = vadd.f32 %v3818_v51, %v3816_v18 }
 0x42b   :  { %v3827_v44 = vpop.permute.xlu0 %3826  ;;  %v3833_v3 = vadd.f32 %v3829_v4, %v3821_v12 }
 0x42c   :  { %v3832_v7 = vadd.f32 %v3827_v44, %v3820_v19 }
 0x42e   :  { %v3841_v56 = vpop.permute.xlu1 %3840 }
 0x42f   :  { %v3845_v58 = vadd.f32 %v3841_v56, %v3833_v3  ;;  %v3839_v21 = vpop.permute.xlu0 %3838 }
 0x430   :  { %v3844_v24 = vadd.f32 %v3839_v21, %v3832_v7 }
 0x431   :  { %v3863_v2 = vadd.f32 %v7880_v22, %v3845_v58 }
 0x432   :  { %v3881_v59 = vpop.permute.xlu1 %3880  ;;  %v3862_v13 = vadd.f32 %v7881_v63, %v3844_v24 }
 0x433   :  { %v3879_v57 = vpop.permute.xlu0 %3878  ;;  %v3885_v25 = vadd.f32 %v3881_v59, %v3863_v2 }
 0x434   :  { %v3884_v34 = vadd.f32 %v3879_v57, %v3862_v13 }
 0x436   :  { %v3903_v11 = vpop.permute.xlu1 %3902 }
 0x437   :  { %v3907_v31 = vadd.f32 %v3903_v11, %v3885_v25  ;;  %v3901_v0 = vpop.permute.xlu0 %3900 }
 0x438   :  { %v3906_v49 = vadd.f32 %v3901_v0, %v3884_v34 }
 0x439   :  { %v3925_v38 = vadd.f32 %v7882_v53, %v3907_v31 }
 0x43a   :  { %v3943_v61 = vpop.permute.xlu1 %3942  ;;  %v3924_v15 = vadd.f32 %v7883_v62, %v3906_v49 }
 0x43b   :  { %v3941_v46 = vpop.permute.xlu0 %3940  ;;  %v3947_v52 = vadd.f32 %v3943_v61, %v3925_v38 }
 0x43c   :  { %v3946_v30 = vadd.f32 %v3941_v46, %v3924_v15 }
 0x43e   :  { %v3965_v45 = vpop.permute.xlu1 %3964 }
 0x43f   :  { %v3969_v47 = vadd.f32 %v3965_v45, %v3947_v52  ;;  %v3963_v14 = vpop.permute.xlu0 %3962 }
 0x440   :  { %v3968_v54 = vadd.f32 %v3963_v14, %v3946_v30 }
 0x441   :  { %v3971_v5 = vadd.f32 -0.15854228, %v3969_v47 }
 0x442   :  { %v3970_v28 = vadd.f32 -0.15854228, %v3968_v54 }
 0x443   :  { %v4047_v55 = vrot.slane %v3971_v5, 7  ;;  %v4051_v33 = vrot.slane %v3971_v5, 6  ;;  %v4055_v23 = vrot.slane %v3971_v5, 5  ;;  %v4059_v20 = vrot.slane %v3971_v5, 4 }
 0x444   :  { %v4046_v29 = vrot.slane %v3970_v28, 7  ;;  %v4050_v41 = vrot.slane %v3970_v28, 6  ;;  %v4054_v26 = vrot.slane %v3970_v28, 5  ;;  %v4058_v16 = vrot.slane %v3970_v28, 4 }
 0x445   :  { %v4064_v60 = vsel %vm4062_vm4, %v3971_v5, %v4047_v55  ;;  %v4072_v35 = vsel %vm4070_vm6, %v4055_v23, %v4059_v20 }
 0x446   :  { %v4067_v48 = vsel %vm4065_vm5, %v4064_v60, %v4051_v33  ;;  %v4063_v17 = vsel %vm4062_vm4, %v3970_v28, %v4046_v29  ;;  %v4071_v39 = vsel %vm4070_vm6, %v4054_v26, %v4058_v16  ;;  %4096 = vst.msk [vmem:[%s7324_s1 + $0x38] sm:$0xf] %vm4075_vm7, %v4072_v35 }
 0x447   :  { %v4066_v10 = vsel %vm4065_vm5, %v4063_v17, %v4050_v41  ;;  %4094 = vst.msk [vmem:[%s7324_s1 + $0x18] sm:$0xf] %vm4075_vm7, %v4071_v39  ;;  %v4069_v43 = vsel %vm88_vm0, %v4067_v48, %v4055_v23 }
 0x448   :  { %v4068_v42 = vsel %vm88_vm0, %v4066_v10, %v4054_v26  ;;  %4095 = vst.msk [vmem:[%s7324_s1 + $0x30] sm:$0xff] %vm4073_vm8, %v4069_v43 }
 0x449   :  { %4093 = vst.msk [vmem:[%s7324_s1 + $0x10] sm:$0xff] %vm4073_vm8, %v4068_v42 }
 0x450   :  { %v3977_v27 = vpop.permute.xlu0 %3976 }
 0x451   :  { %v4025_v7 = vsel %vm4024_vm9, %v7170_v32, %v3977_v27 }
 0x45f   :  { %v3979_v9 = vpop.permute.xlu1 %3978 }
 0x460   :  { %v4026_v3 = vsel %vm4024_vm9, %v7203_v37, %v3979_v9 }
 0x463   :  { %v3983_v8 = vpop.permute.xlu1 %3982 }
 0x464   :  { %v4028_v63 = vsel %vm4024_vm9, %v7209_v50, %v3983_v8 }
 0x466   :  { %v3981_v36 = vpop.permute.xlu0 %3980 }
 0x467   :  { %v3991_v1 = vpop.permute.xlu1 %3990  ;;  %v4027_v37 = vsel %vm4024_vm9, %v7211_v40, %v3981_v36 }
 0x468   :  { %v4031_v56 = vsel %vm4029_vm10, %v4026_v3, %v3991_v1 }
 0x46a   :  { %v3989_v18 = vpop.permute.xlu0 %3988 }
 0x46b   :  { %v3995_v6 = vpop.permute.xlu1 %3994  ;;  %v4030_v58 = vsel %vm4029_vm10, %v4025_v7, %v3989_v18 }
 0x46c   :  { %v4033_v13 = vsel %vm4029_vm10, %v4028_v63, %v3995_v6 }
 0x46e   :  { %v3993_v51 = vpop.permute.xlu0 %3992 }
 0x46f   :  { %v4003_v12 = vpop.permute.xlu1 %4002  ;;  %v4032_v57 = vsel %vm4029_vm10, %v4027_v37, %v3993_v51 }
 0x470   :  { %v4036_v21 = vsel %vm4034_vm11, %v4031_v56, %v4003_v12 }
 0x472   :  { %v4001_v4 = vpop.permute.xlu0 %4000 }
 0x473   :  { %v4007_v19 = vpop.permute.xlu1 %4006  ;;  %v4035_v22 = vsel %vm4034_vm11, %v4030_v58, %v4001_v4 }
 0x474   :  { %v4038_v50 = vsel %vm4034_vm11, %v4033_v13, %v4007_v19 }
 0x476   :  { %v4005_v44 = vpop.permute.xlu0 %4004 }
 0x477   :  { %v4015_v24 = vpop.permute.xlu1 %4014  ;;  %v4037_v34 = vsel %vm4034_vm11, %v4032_v57, %v4005_v44 }
 0x478   :  { %v4041_v2 = vsel %vm4039_vm12, %v4036_v21, %v4015_v24 }
 0x479   :  { %4076 = vst.msk [vmem:[%s7324_s1 + $0x8] sm:$0xf] %vm4075_vm7, %v4041_v2 }
 0x47a   :  { %v4013_v59 = vpop.permute.xlu0 %4012 }
 0x47b   :  { %v4040_v32 = vsel %vm4039_vm12, %v4035_v22, %v4013_v59  ;;  %v4019_v25 = vpop.permute.xlu1 %4018 }
 0x47c   :  { %4074 = vst.msk [vmem:[%s7324_s1] sm:$0xff] %vm4073_vm8, %v4040_v32  ;;  %v4043_v11 = vsel %vm4039_vm12, %v4038_v50, %v4019_v25 }
 0x47d   :  { %4078 = vst.msk [vmem:[%s7324_s1 + $0x28] sm:$0xf] %vm4075_vm7, %v4043_v11 }
 0x47e   :  { %v4017_v31 = vpop.permute.xlu0 %4016 }
 0x47f   :  { %v4042_v40 = vsel %vm4039_vm12, %v4037_v34, %v4017_v31 }
 0x480   :  { %4077 = vst.msk [vmem:[%s7324_s1 + $0x20] sm:$0xff] %vm4073_vm8, %v4042_v40 }
 0x481   :  { %4092 = vsyncpa [#allocation3], 1 }

</bundles_post_ra>
